<compile_context>
chip_gen: v7x
topology: tpu7x:2x2x1
jax: 0.10.0
libtpu: 0.0.40
codegen_flags: <defaults>
</compile_context>

<pallas_src>
import functools

import jax
import jax.numpy as jnp
from jax.experimental import pallas as pl
from jax.experimental.pallas import tpu as pltpu

N = 23          # graph size is hard-coded to 23 inside the PyTorch module
NN = N * N      # 529 -- flattened (node_i, node_k) axis


def _round_up(x, m):
    return ((x + m - 1) // m) * m


def resgat_kernel(acat_ref, dcat_ref, out_ref):
    """One batch tile (bb graphs, batch on the lane axis) per grid step.

    acat_ref : (NN, 2*NN)  batch-invariant fused attention + residual matrix
    dcat_ref : (2*NN, bb)  rows [0,NN)    : data[b, m, i]  (for head 0)
                           rows [NN,2NN)  : data[b, i, m]  (for head 1 + residual)
    out_ref  : (NN, bb)    out[(i*N+k), b] = out[b, i, k]
    """
    # Pure-MXU kernel: both heads and the residual live inside Acat, so the
    # output comes straight off the matmul accumulator (no VPU epilogue).
    out_ref[...] = jnp.dot(acat_ref[...], dcat_ref[...],
                           preferred_element_type=jnp.float32)


@functools.partial(jax.jit, static_argnames=("block_b",))
def resgat_forward(flow_x, adj, params, *, block_b=512):
    assert block_b % 128 == 0 and block_b >= 128
    B = flow_x.shape[0]
    data = flow_x[:, :, :, -1].astype(jnp.float32)              # (B, N, N)

    adj = adj.astype(jnp.float32)
    adj = adj.at[jnp.arange(N), jnp.arange(N)].set(1.0)         # adj[i][i] = 1

    # --- batch-invariant attention normalization (hoisted out of the kernel) ---
    def att_of(W):
        mn = jnp.minimum(jnp.min(W, axis=-1, keepdims=True), 0.0)
        att = (W - mn) * adj[None, :, :]
        return att / jnp.sum(att, axis=-1, keepdims=True)

    att0 = att_of(params["W0"].astype(jnp.float32))             # (N, N, N)
    att1 = att_of(params["W1"].astype(jnp.float32))             # (N, N, N)

    ag = params["a_gat"] / params["a_gat"].sum(-1, keepdims=True)          # (N, N, 2)
    ar = params["a_res"][0] / params["a_res"][0].sum(-1, keepdims=True)    # (N, N, 2)

    # Fold the fusion weights into the attention tensors, expand block-diagonally
    # over i, fold the residual onto the diagonal of the second head, and
    # concatenate both heads along K so the whole forward is ONE MXU matmul.
    A0 = att0 * (ag[..., 0] * ar[..., 1])[:, :, None]           # (N, N, N)
    A1 = att1 * (ag[..., 1] * ar[..., 1])[:, :, None]           # (N, N, N)
    eye = jnp.eye(N, dtype=jnp.float32)
    A0big = (A0[:, :, None, :] * eye[:, None, :, None]).reshape(NN, NN)
    A1big = (A1[:, :, None, :] * eye[:, None, :, None]).reshape(NN, NN)
    idx = jnp.arange(NN)
    A1big = A1big.at[idx, idx].add(ar[..., 0].reshape(NN))      # residual diag
    Acat = jnp.concatenate([A0big, A1big], axis=1)              # (NN, 2*NN)

    # Lane-dense batch layout, both needed data views in one fused expression:
    #   rows [0,NN)   -> data[b, m, i]  (head 0 consumes the transposed view)
    #   rows [NN,2NN) -> data[b, i, m]  (head 1 + residual)
    dcat = jnp.concatenate(
        [jnp.transpose(data, (2, 1, 0)),    # [i, m, b] = data[b, m, i]
         jnp.transpose(data, (1, 2, 0))],   # [i, m, b] = data[b, i, m]
        axis=0).reshape(2 * NN, B)

    # Batch tile: multiple of 128 (lane width); >=256 fills the 256-wide MXU on
    # v6e/v7x; when the batch is big enough, keep >=2 grid steps so v7x's two
    # TensorCores both get work on the 'parallel' axis.
    bb = min(block_b, _round_up(B, 128))
    bp128 = _round_up(B, 128)
    if bp128 // bb < 2 and bp128 >= 512:
        bb = max(256, ((bp128 // 2) // 128) * 128)
    Bp = _round_up(B, bb)
    if Bp != B:
        dcat = jnp.pad(dcat, ((0, 0), (0, Bp - B)))             # zero cols, sliced off

    compiler_kwargs = {"dimension_semantics": ("parallel",)}
    # Double-buffered f32 tiles: Acat + Dcat tile + out tile.  Only raise the
    # scoped-VMEM limit when we'd exceed v5e's 16 MiB default (bb <= 512 fits).
    vmem_est = 2 * 4 * (NN * (2 * NN) + (2 * NN) * bb + NN * bb)
    if vmem_est > (14 << 20):
        compiler_kwargs["vmem_limit_bytes"] = int(min(vmem_est + (4 << 20), 32 << 20))

    out_flat = pl.pallas_call(
        resgat_kernel,
        out_shape=jax.ShapeDtypeStruct((NN, Bp), jnp.float32),
        grid=(Bp // bb,),
        in_specs=[
            pl.BlockSpec((NN, 2 * NN), lambda b: (0, 0)),       # Acat (batch-invariant)
            pl.BlockSpec((2 * NN, bb), lambda b: (0, b)),       # Dcat (batch tile)
        ],
        out_specs=pl.BlockSpec((NN, bb), lambda b: (0, b)),
        compiler_params=pltpu.CompilerParams(**compiler_kwargs),
    )(Acat, dcat)

    # NOTE: if the downstream consumer can accept the lane-dense (NN, B) layout,
    # return out_flat[:, :B] directly and skip this relayout (saves HBM passes).
    out = out_flat[:, :B].reshape(N, N, B)                      # [i, k, b]
    return jnp.transpose(out, (2, 0, 1))[..., None]             # (B, N, N, 1)


def resgat_reference(flow_x, adj, params):
    """Pure-JAX reference mirroring the PyTorch forward."""
    data = flow_x[:, :, :, -1].astype(jnp.float32)
    adj = adj.astype(jnp.float32)
    adj = adj.at[jnp.arange(N), jnp.arange(N)].set(1.0)

    def att_of(W):
        mn = jnp.minimum(jnp.min(W, axis=-1, keepdims=True), 0.0)
        att = (W - mn) * adj[None, :, :]
        return att / jnp.sum(att, axis=-1, keepdims=True)

    att0 = att_of(params["W0"])
    att1 = att_of(params["W1"])
    x1 = jnp.einsum("ikm,bmi->bik", att0, data, precision="highest")
    x2 = jnp.einsum("ikm,bim->bik", att1, data, precision="highest")
    ag = params["a_gat"] / params["a_gat"].sum(-1, keepdims=True)   # (N, N, 2)
    gat = x1 * ag[None, ..., 0] + x2 * ag[None, ..., 1]
    ar = params["a_res"] / params["a_res"].sum(-1, keepdims=True)   # (1, N, N, 2)
    out = data * ar[..., 0] + gat * ar[..., 1]
    return out[..., None]


if __name__ == "__main__":
    key = jax.random.PRNGKey(0)
    kW0, kW1, kag, kar, kx, kadj = jax.random.split(key, 6)

    # Deterministic parameters (shapes from the module __init__).
    # NOTE: MyGAT.B / MyGAT1.B are never used in forward, so they are omitted.
    params = {
        "W0": jax.random.uniform(kW0, (N, N, N), jnp.float32),          # MyGAT.W
        "W1": jax.random.uniform(kW1, (N, N, N), jnp.float32),          # MyGAT1.W
        "a_gat": jax.random.uniform(kag, (N, N, 2), jnp.float32),       # MyGAT3_1.a
        "a_res": jax.random.uniform(kar, (1, N, N, 2), jnp.float32),    # ResGAT.a
    }

    B, T = 4, 4
    flow_x = jax.random.uniform(kx, (B, N, N, T), jnp.float32)          # data['flow_x']
    adj = (jax.random.uniform(kadj, (N, N)) > 0.5).astype(jnp.float32)  # binary adjacency

    out = resgat_forward(flow_x, adj, params)
    out = jax.block_until_ready(out)

    ref = resgat_reference(flow_x, adj, params)
    assert out.shape == (B, N, N, 1), out.shape
    max_err = float(jnp.max(jnp.abs(out - ref)))
    assert jnp.allclose(out, ref, atol=1e-4, rtol=1e-4), f"max_err={max_err}"
    print("KERNEL_OK")
</pallas_src>

<mosaic_0001>
module attributes {stable_mosaic.version = 11 : i64} {
  func.func @resgat_kernel(%arg0: i32, %arg1: memref<529x1058xf32, #tpu.memory_space<vmem>>, %arg2: memref<1058x128xf32, #tpu.memory_space<vmem>>, %arg3: memref<529x128xf32, #tpu.memory_space<vmem>>) attributes {dimension_semantics = [#tpu.dimension_semantics<parallel>], iteration_bounds = array<i64: 1>, scalar_prefetch = 0 : i64, scratch_operands = 0 : i64, tpu.core_type = #tpu.core_type<tc>, window_params = [{pipeline_mode = #tpu.pipeline_mode<synchronous>, transform_indices = @transform_0, window_bounds = array<i64: 529, 1058>}, {transform_indices = @transform_1, window_bounds = array<i64: 1058, 128>}, {transform_indices = @transform_2, window_bounds = array<i64: 529, 128>}]} {
    %c0 = arith.constant 0 : index
    %c0_0 = arith.constant 0 : index
    %0 = vector.load %arg1[%c0, %c0_0] : memref<529x1058xf32, #tpu.memory_space<vmem>>, vector<529x1058xf32>
    %c0_1 = arith.constant 0 : index
    %c0_2 = arith.constant 0 : index
    %1 = vector.load %arg2[%c0_1, %c0_2] : memref<1058x128xf32, #tpu.memory_space<vmem>>, vector<1058x128xf32>
    %cst = arith.constant dense<0.000000e+00> : vector<529x128xf32>
    %2 = tpu.matmul %0, %1, %cst {dimension_numbers = #tpu.dot_dimension_numbers<[1], [0], [0], [1], [0, 0, 1, 1], [], []>} : vector<529x1058xf32>, vector<1058x128xf32>, vector<529x128xf32> -> vector<529x128xf32>
    %c0_3 = arith.constant 0 : index
    %c0_4 = arith.constant 0 : index
    %3 = vector.load %arg3[%c0_3, %c0_4] : memref<529x128xf32, #tpu.memory_space<vmem>>, vector<529x128xf32>
    tpu.vector_store %arg3[%c0_3, %c0_4], %2 {strides = array<i32>} : memref<529x128xf32, #tpu.memory_space<vmem>>, vector<529x128xf32>,
    return
  }
  func.func @transform_0(%arg0: i32) -> (i32, i32) {
    %c0_i32 = arith.constant 0 : i32
    %c0_i32_0 = arith.constant 0 : i32
    %c0_i32_1 = arith.constant 0 : i32
    return %c0_i32, %c0_i32_0 : i32, i32
  }
  func.func @transform_1(%arg0: i32) -> (i32, i32) {
    %c0_i32 = arith.constant 0 : i32
    %c0_i32_0 = arith.constant 0 : i32
    return %c0_i32, %arg0 : i32, i32
  }
  func.func @transform_2(%arg0: i32) -> (i32, i32) {
    %c0_i32 = arith.constant 0 : i32
    %c0_i32_0 = arith.constant 0 : i32
    return %c0_i32, %arg0 : i32, i32
  }
}

</mosaic_0001>

<bundles_post_ra>
// kernel: resgat_forward.1
= control target key start
LH: loop header
LB: loop body
LE: loop exit
PB: predicated region body
PF: predicated region fallthrough
CT: control target
= control target key end

     0   :  { %v4077_v0 = vmov 0.0|0.0   ;;  %vm949_vm0 = vcmask 1041408   ;;  %vm4079_vm1 = vmmov 0   ;;  %vm747_vm2 = vcmask 277504   ;;  %s6954_s1 = inlined_call_operand.vmem [shape: f32[1058,128], index: 1, kind: input, shape index: {}]   ;;  %s6955_s0 = inlined_call_operand.vmem [shape: f32[529,1058], index: 0, kind: input, shape index: {}]   ;;  %s6956_s2 = inlined_call_operand.vmem [shape: f32[529,128], index: 2, kind: output, shape index: {}]  }
   0x1   :  { %3375 = vmatprep.subr.bf16.mxu1 %v4077_v0  ;;  %3471 = vmatprep.subr.bf16.mxu0 %v4077_v0  ;;  %v614_v1 = vld [vmem:[%s6954_s1] sm:$0xff]  ;;  %v615_v2 = vld [vmem:[%s6954_s1 + $0x8] sm:$0xff]  ;;  %v616_v6 = vld [vmem:[%s6954_s1 + $0x10] sm:$0xff] }
   0x2   :  { %v678_v3 = vld [vmem:[%s6954_s1 + $0x200] sm:$0xff]  ;;  %v3376_v4 = vpack.c.bf16 %v615_v2, %v614_v1  ;;  %v679_v5 = vld [vmem:[%s6954_s1 + $0x208] sm:$0xff]  ;;  %v617_v7 = vld [vmem:[%s6954_s1 + $0x18] sm:$0xff] }
   0x3   :  { %v4115_v8 = vpack.c.bf16 %v679_v5, %v678_v3  ;;  %v680_v9 = vld [vmem:[%s6954_s1 + $0x210] sm:$0xff]  ;;  %v681_v10 = vld [vmem:[%s6954_s1 + $0x218] sm:$0xff]  ;;  %v3379_v11 = vpack.c.bf16 %v617_v7, %v616_v6  ;;  %v618_v13 = vld [vmem:[%s6954_s1 + $0x20] sm:$0xff] }
   0x4   :  { %3377 = vmatpush1.bf16.msra.mxu1 %v3376_v4  ;;  %v4125_v12 = vpack.c.bf16 %v681_v10, %v680_v9  ;;  %v619_v14 = vld [vmem:[%s6954_s1 + $0x28] sm:$0xff]  ;;  %v682_v15 = vld [vmem:[%s6954_s1 + $0x220] sm:$0xff]  ;;  %v620_v19 = vld [vmem:[%s6954_s1 + $0x30] sm:$0xff] }
   0x5   :  { %3473 = vmatpush1.bf16.msra.mxu0 %v4115_v8  ;;  %3378 = vmatprep.subr.bf16.mxu1 %v4077_v0  ;;  %v683_v16 = vld [vmem:[%s6954_s1 + $0x228] sm:$0xff]  ;;  %v3382_v17 = vpack.c.bf16 %v619_v14, %v618_v13  ;;  %v621_v20 = vld [vmem:[%s6954_s1 + $0x38] sm:$0xff]  ;;  %v684_v21 = vld [vmem:[%s6954_s1 + $0x230] sm:$0xff] }
   0x6   :  { %3474 = vmatprep.subr.bf16.mxu0 %v4077_v0  ;;  %v4142_v18 = vpack.c.bf16 %v683_v16, %v682_v15  ;;  %v685_v22 = vld [vmem:[%s6954_s1 + $0x238] sm:$0xff]  ;;  %v3385_v23 = vpack.c.bf16 %v621_v20, %v620_v19  ;;  %v622_v25 = vld [vmem:[%s6954_s1 + $0x40] sm:$0xff]  ;;  %v623_v26 = vld [vmem:[%s6954_s1 + $0x48] sm:$0xff] }
   0x7   :  { %v4159_v24 = vpack.c.bf16 %v685_v22, %v684_v21  ;;  %v686_v27 = vld [vmem:[%s6954_s1 + $0x240] sm:$0xff]  ;;  %v687_v28 = vld [vmem:[%s6954_s1 + $0x248] sm:$0xff]  ;;  %v3388_v29 = vpack.c.bf16 %v623_v26, %v622_v25  ;;  %v624_v31 = vld [vmem:[%s6954_s1 + $0x50] sm:$0xff] }
   0x8   :  { %3380 = vmatpush1.bf16.msra.mxu1 %v3379_v11  ;;  %v4176_v30 = vpack.c.bf16 %v687_v28, %v686_v27  ;;  %v625_v32 = vld [vmem:[%s6954_s1 + $0x58] sm:$0xff]  ;;  %v688_v33 = vld [vmem:[%s6954_s1 + $0x250] sm:$0xff]  ;;  %v626_v37 = vld [vmem:[%s6954_s1 + $0x60] sm:$0xff] }
   0x9   :  { %3476 = vmatpush1.bf16.msra.mxu0 %v4125_v12  ;;  %3381 = vmatprep.subr.bf16.mxu1 %v4077_v0  ;;  %v689_v34 = vld [vmem:[%s6954_s1 + $0x258] sm:$0xff]  ;;  %v3391_v35 = vpack.c.bf16 %v625_v32, %v624_v31  ;;  %v627_v38 = vld [vmem:[%s6954_s1 + $0x68] sm:$0xff]  ;;  %v690_v39 = vld [vmem:[%s6954_s1 + $0x260] sm:$0xff] }
   0xa   :  { %3477 = vmatprep.subr.bf16.mxu0 %v4077_v0  ;;  %v4193_v36 = vpack.c.bf16 %v689_v34, %v688_v33  ;;  %v691_v40 = vld [vmem:[%s6954_s1 + $0x268] sm:$0xff]  ;;  %v3394_v43 = vpack.c.bf16 %v627_v38, %v626_v37  ;;  %v628_v45 = vld [vmem:[%s6954_s1 + $0x70] sm:$0xff]  ;;  %v629_v46 = vld [vmem:[%s6954_s1 + $0x78] sm:$0xff] }
   0xb   :  { %v12_v41 = vld [vmem:[%s6955_s0 + $0x8] sm:$0xff]  ;;  %v4216_v44 = vpack.c.bf16 %v691_v40, %v690_v39  ;;  %v692_v47 = vld [vmem:[%s6954_s1 + $0x270] sm:$0xff]  ;;  %v693_v48 = vld [vmem:[%s6954_s1 + $0x278] sm:$0xff]  ;;  %v3397_v49 = vpack.c.bf16 %v629_v46, %v628_v45 }
   0xc   :  { %3383 = vmatpush1.bf16.msra.mxu1 %v3382_v17  ;;  %v16_v42 = vld [vmem:[%s6955_s0 + $0x28] sm:$0xff]  ;;  %1017 = vmatprep.mubr.f32.mxu1 %v12_v41  ;;  %v4233_v50 = vpack.c.bf16 %v693_v48, %v692_v47  ;;  %v630_v51 = vld [vmem:[%s6954_s1 + $0x80] sm:$0xff]  ;;  %v632_v57 = vld [vmem:[%s6954_s1 + $0x90] sm:$0xff] }
   0xd   :  { %3479 = vmatpush1.bf16.msra.mxu0 %v4142_v18  ;;  %3384 = vmatprep.subr.bf16.mxu1 %v4077_v0  ;;  %v631_v52 = vld [vmem:[%s6954_s1 + $0x88] sm:$0xff]  ;;  %v694_v53 = vld [vmem:[%s6954_s1 + $0x280] sm:$0xff]  ;;  %v633_v58 = vld [vmem:[%s6954_s1 + $0x98] sm:$0xff] }
   0xe   :  { %3480 = vmatprep.subr.bf16.mxu0 %v4077_v0  ;;  %1817 = vmatprep.mubr.f32.mxu0 %v16_v42  ;;  %v695_v54 = vld [vmem:[%s6954_s1 + $0x288] sm:$0xff]  ;;  %v3400_v55 = vpack.c.bf16 %v631_v52, %v630_v51  ;;  %v696_v59 = vld [vmem:[%s6954_s1 + $0x290] sm:$0xff]  ;;  %v697_v60 = vld [vmem:[%s6954_s1 + $0x298] sm:$0xff]  ;;  %v3403_v61 = vpack.c.bf16 %v633_v58, %v632_v57 }
   0xf   :  { %v4250_v56 = vpack.c.bf16 %v695_v54, %v694_v53  ;;  %v4267_v62 = vpack.c.bf16 %v697_v60, %v696_v59  ;;  %v634_v63 = vld [vmem:[%s6954_s1 + $0xa0] sm:$0xff]  ;;  %v635_v1 = vld [vmem:[%s6954_s1 + $0xa8] sm:$0xff]  ;;  %v636_v6 = vld [vmem:[%s6954_s1 + $0xb0] sm:$0xff] }
  0x10   :  { %3386 = vmatpush1.bf16.msra.mxu1 %v3385_v23  ;;  %v698_v2 = vld [vmem:[%s6954_s1 + $0x2a0] sm:$0xff]  ;;  %v699_v3 = vld [vmem:[%s6954_s1 + $0x2a8] sm:$0xff]  ;;  %v3406_v4 = vpack.c.bf16 %v635_v1, %v634_v63  ;;  %v637_v7 = vld [vmem:[%s6954_s1 + $0xb8] sm:$0xff] }
  0x11   :  { %3482 = vmatpush1.bf16.msra.mxu0 %v4159_v24  ;;  %3387 = vmatprep.subr.bf16.mxu1 %v4077_v0  ;;  %v4284_v5 = vpack.c.bf16 %v699_v3, %v698_v2  ;;  %v700_v9 = vld [vmem:[%s6954_s1 + $0x2b0] sm:$0xff]  ;;  %v701_v10 = vld [vmem:[%s6954_s1 + $0x2b8] sm:$0xff]  ;;  %v3409_v11 = vpack.c.bf16 %v637_v7, %v636_v6  ;;  %v638_v14 = vld [vmem:[%s6954_s1 + $0xc0] sm:$0xff] }
  0x12   :  { %3483 = vmatprep.subr.bf16.mxu0 %v4077_v0  ;;  %v4301_v13 = vpack.c.bf16 %v701_v10, %v700_v9  ;;  %v639_v15 = vld [vmem:[%s6954_s1 + $0xc8] sm:$0xff]  ;;  %v702_v16 = vld [vmem:[%s6954_s1 + $0x2c0] sm:$0xff]  ;;  %v640_v21 = vld [vmem:[%s6954_s1 + $0xd0] sm:$0xff] }
  0x13   :  { %v703_v17 = vld [vmem:[%s6954_s1 + $0x2c8] sm:$0xff]  ;;  %v3412_v19 = vpack.c.bf16 %v639_v15, %v638_v14  ;;  %v641_v22 = vld [vmem:[%s6954_s1 + $0xd8] sm:$0xff]  ;;  %v704_v23 = vld [vmem:[%s6954_s1 + $0x2d0] sm:$0xff] }
  0x14   :  { %3389 = vmatpush1.bf16.msra.mxu1 %v3388_v29  ;;  %v4318_v20 = vpack.c.bf16 %v703_v17, %v702_v16  ;;  %v705_v25 = vld [vmem:[%s6954_s1 + $0x2d8] sm:$0xff]  ;;  %v3415_v26 = vpack.c.bf16 %v641_v22, %v640_v21  ;;  %v642_v28 = vld [vmem:[%s6954_s1 + $0xe0] sm:$0xff]  ;;  %v643_v29 = vld [vmem:[%s6954_s1 + $0xe8] sm:$0xff] }
  0x15   :  { %3485 = vmatpush1.bf16.msra.mxu0 %v4176_v30  ;;  %3390 = vmatprep.subr.bf16.mxu1 %v4077_v0  ;;  %v4335_v27 = vpack.c.bf16 %v705_v25, %v704_v23  ;;  %v706_v31 = vld [vmem:[%s6954_s1 + $0x2e0] sm:$0xff]  ;;  %v707_v32 = vld [vmem:[%s6954_s1 + $0x2e8] sm:$0xff]  ;;  %v3418_v33 = vpack.c.bf16 %v643_v29, %v642_v28  ;;  %v645_v37 = vld [vmem:[%s6954_s1 + $0xf8] sm:$0xff] }
  0x16   :  { %3486 = vmatprep.subr.bf16.mxu0 %v4077_v0  ;;  %v4352_v34 = vpack.c.bf16 %v707_v32, %v706_v31  ;;  %v708_v38 = vld [vmem:[%s6954_s1 + $0x2f0] sm:$0xff]  ;;  %v709_v39 = vld [vmem:[%s6954_s1 + $0x2f8] sm:$0xff]  ;;  %v710_v42 = vld [vmem:[%s6954_s1 + $0x300] sm:$0xff] }
  0x17   :  { %v4369_v41 = vpack.c.bf16 %v709_v39, %v708_v38  ;;  %v646_v45 = vld [vmem:[%s6954_s1 + $0x100] sm:$0xff]  ;;  %v647_v46 = vld [vmem:[%s6954_s1 + $0x108] sm:$0xff]  ;;  %v21_v51 = vld [vmem:[%s6955_s0 + $0x50] sm:$0xff] }
  0x18   :  { %3392 = vmatpush1.bf16.msra.mxu1 %v3391_v35  ;;  %v644_v35 = vld [vmem:[%s6954_s1 + $0xf0] sm:$0xff]  ;;  %v11_v47 = vld [vmem:[%s6955_s0] sm:$0xff]  ;;  %v3424_v53 = vpack.c.bf16 %v647_v46, %v646_v45  ;;  %v649_v58 = vld [vmem:[%s6954_s1 + $0x118] sm:$0xff] }
  0x19   :  { %3488 = vmatpush1.bf16.msra.mxu0 %v4193_v36  ;;  %3393 = vmatprep.subr.bf16.mxu1 %v4077_v0  ;;  %v3421_v40 = vpack.c.bf16 %v645_v37, %v644_v35  ;;  %v15_v48 = vld [vmem:[%s6955_s0 + $0x20] sm:$0xff]  ;;  %v25_v52 = vld [vmem:[%s6955_s0 + $0x70] sm:$0xff]  ;;  %v20_v59 = vld [vmem:[%s6955_s0 + $0x48] sm:$0xff] }
  0x1a   :  { %3489 = vmatprep.subr.bf16.mxu0 %v4077_v0  ;;  %v712_v54 = vld [vmem:[%s6954_s1 + $0x310] sm:$0xff]  ;;  %v24_v60 = vld [vmem:[%s6955_s0 + $0x68] sm:$0xff]  ;;  %v34_v1 = vld [vmem:[%s6955_s0 + $0xb8] sm:$0xff] }
  0x1b   :  { %v648_v57 = vld [vmem:[%s6954_s1 + $0x110] sm:$0xff]  ;;  %v714_v2 = vld [vmem:[%s6954_s1 + $0x320] sm:$0xff]  ;;  %v715_v3 = vld [vmem:[%s6954_s1 + $0x328] sm:$0xff] }
  0x1c   :  { %3395 = vmatpush1.bf16.msra.mxu1 %v3394_v43  ;;  %v711_v43 = vld [vmem:[%s6954_s1 + $0x308] sm:$0xff]  ;;  %v650_v6 = vld [vmem:[%s6954_s1 + $0x120] sm:$0xff]  ;;  %v29_v9 = vld [vmem:[%s6955_s0 + $0x90] sm:$0xff]  ;;  %v3526_v14 = vpack.c.bf16 %v715_v3, %v714_v2 }
  0x1d   :  { %3491 = vmatpush1.bf16.msra.mxu0 %v4216_v44  ;;  %3396 = vmatprep.subr.bf16.mxu1 %v4077_v0  ;;  %v651_v7 = vld [vmem:[%s6954_s1 + $0x128] sm:$0xff]  ;;  %v33_v10 = vld [vmem:[%s6955_s0 + $0xb0] sm:$0xff]  ;;  %v43_v15 = vld [vmem:[%s6955_s0 + $0x100] sm:$0xff] }
  0x1e   :  { %3492 = vmatprep.subr.bf16.mxu0 %v4077_v0  ;;  %v716_v16 = vld [vmem:[%s6954_s1 + $0x330] sm:$0xff]  ;;  %v717_v17 = vld [vmem:[%s6954_s1 + $0x338] sm:$0xff]  ;;  %v52_v29 = vld [vmem:[%s6955_s0 + $0x148] sm:$0xff] }
  0x1f   :  { %v652_v21 = vld [vmem:[%s6954_s1 + $0x130] sm:$0xff]  ;;  %v653_v22 = vld [vmem:[%s6954_s1 + $0x138] sm:$0xff]  ;;  %v3529_v28 = vpack.c.bf16 %v717_v17, %v716_v16  ;;  %v718_v31 = vld [vmem:[%s6954_s1 + $0x340] sm:$0xff] }
  0x20   :  { %3398 = vmatpush1.bf16.msra.mxu1 %v3397_v49  ;;  %v3520_v49 = vpack.c.bf16 %v711_v43, %v710_v42  ;;  %v38_v23 = vld [vmem:[%s6955_s0 + $0xd8] sm:$0xff]  ;;  %v719_v32 = vld [vmem:[%s6954_s1 + $0x348] sm:$0xff]  ;;  %v654_v35 = vld [vmem:[%s6954_s1 + $0x140] sm:$0xff] }
  0x21   :  { %3494 = vmatpush1.bf16.msra.mxu0 %v4233_v50  ;;  %3399 = vmatprep.subr.bf16.mxu1 %v4077_v0  ;;  %v42_v25 = vld [vmem:[%s6955_s0 + $0xf8] sm:$0xff]  ;;  %v655_v37 = vld [vmem:[%s6954_s1 + $0x148] sm:$0xff]  ;;  %v47_v38 = vld [vmem:[%s6955_s0 + $0x120] sm:$0xff]  ;;  %v3532_v42 = vpack.c.bf16 %v719_v32, %v718_v31 }
  0x22   :  { %3495 = vmatprep.subr.bf16.mxu0 %v4077_v0  ;;  %v51_v39 = vld [vmem:[%s6955_s0 + $0x140] sm:$0xff]  ;;  %v61_v43 = vld [vmem:[%s6955_s0 + $0x190] sm:$0xff]  ;;  %v721_v46 = vld [vmem:[%s6954_s1 + $0x358] sm:$0xff] }
  0x23   :  { %v720_v45 = vld [vmem:[%s6954_s1 + $0x350] sm:$0xff]  ;;  %v75_v2 = vld [vmem:[%s6955_s0 + $0x200] sm:$0xff]  ;;  %v84_v16 = vld [vmem:[%s6955_s0 + $0x248] sm:$0xff] }
  0x24   :  { %3401 = vmatpush1.bf16.msra.mxu1 %v3400_v55  ;;  %v713_v55 = vld [vmem:[%s6954_s1 + $0x318] sm:$0xff]  ;;  %v93_v31 = vld [vmem:[%s6955_s0 + $0x290] sm:$0xff] }
  0x25   :  { %3497 = vmatpush1.bf16.msra.mxu0 %v4250_v56  ;;  %3402 = vmatprep.subr.bf16.mxu1 %v4077_v0  ;;  %v3523_v63 = vpack.c.bf16 %v713_v55, %v712_v54  ;;  %v3535_v54 = vpack.c.bf16 %v721_v46, %v720_v45  ;;  %v70_v55 = vld [vmem:[%s6955_s0 + $0x1d8] sm:$0xff] }
  0x26   :  { %3498 = vmatprep.subr.bf16.mxu0 %v4077_v0  ;;  %v102_v45 = vld [vmem:[%s6955_s0 + $0x2d8] sm:$0xff] }
  0x28   :  { %3404 = vmatpush1.bf16.msra.mxu1 %v3403_v61  ;;  %v30_v61 = vld [vmem:[%s6955_s0 + $0x98] sm:$0xff] }
  0x29   :  { %3500 = vmatpush1.bf16.msra.mxu0 %v4267_v62  ;;  %3405 = vmatprep.subr.bf16.mxu1 %v4077_v0 }
  0x2a   :  { %3501 = vmatprep.subr.bf16.mxu0 %v4077_v0 }
  0x2c   :  { %3407 = vmatpush1.bf16.msra.mxu1 %v3406_v4  ;;  %v3427_v4 = vpack.c.bf16 %v649_v58, %v648_v57  ;;  %v722_v57 = vld [vmem:[%s6954_s1 + $0x360] sm:$0xff]  ;;  %v723_v58 = vld [vmem:[%s6954_s1 + $0x368] sm:$0xff] }
  0x2d   :  { %3503 = vmatpush1.bf16.msra.mxu0 %v4284_v5  ;;  %3408 = vmatprep.subr.bf16.mxu1 %v4077_v0  ;;  %v3538_v3 = vpack.c.bf16 %v723_v58, %v722_v57  ;;  %v115_v57 = vld [vmem:[%s6955_s0 + $0x340] sm:$0xff]  ;;  %v732_v58 = vld [vmem:[%s6954_s1 + $0x3b0] sm:$0xff] }
  0x2e   :  { %3504 = vmatprep.subr.bf16.mxu0 %v4077_v0 }
  0x30   :  { %3410 = vmatpush1.bf16.msra.mxu1 %v3409_v11  ;;  %v39_v11 = vld [vmem:[%s6955_s0 + $0xe0] sm:$0xff] }
  0x31   :  { %3506 = vmatpush1.bf16.msra.mxu0 %v4301_v13  ;;  %3411 = vmatprep.subr.bf16.mxu1 %v4077_v0 }
  0x32   :  { %3507 = vmatprep.subr.bf16.mxu0 %v4077_v0 }
  0x34   :  { %3413 = vmatpush1.bf16.msra.mxu1 %v3412_v19  ;;  %v3430_v19 = vpack.c.bf16 %v651_v7, %v650_v6  ;;  %v724_v6 = vld [vmem:[%s6954_s1 + $0x370] sm:$0xff]  ;;  %v725_v7 = vld [vmem:[%s6954_s1 + $0x378] sm:$0xff] }
  0x35   :  { %3509 = vmatpush1.bf16.msra.mxu0 %v4318_v20  ;;  %3414 = vmatprep.subr.bf16.mxu1 %v4077_v0  ;;  %v3541_v17 = vpack.c.bf16 %v725_v7, %v724_v6  ;;  %v119_v6 = vld [vmem:[%s6955_s0 + $0x360] sm:$0xff] }
  0x36   :  { %3510 = vmatprep.subr.bf16.mxu0 %v4077_v0  ;;  %v666_v7 = vld [vmem:[%s6954_s1 + $0x1a0] sm:$0xff] }
  0x38   :  { %3416 = vmatpush1.bf16.msra.mxu1 %v3415_v26  ;;  %v48_v26 = vld [vmem:[%s6955_s0 + $0x128] sm:$0xff] }
  0x39   :  { %3512 = vmatpush1.bf16.msra.mxu0 %v4335_v27  ;;  %3417 = vmatprep.subr.bf16.mxu1 %v4077_v0 }
  0x3a   :  { %3513 = vmatprep.subr.bf16.mxu0 %v4077_v0 }
  0x3c   :  { %3419 = vmatpush1.bf16.msra.mxu1 %v3418_v33  ;;  %v3433_v33 = vpack.c.bf16 %v653_v22, %v652_v21  ;;  %v726_v21 = vld [vmem:[%s6954_s1 + $0x380] sm:$0xff]  ;;  %v727_v22 = vld [vmem:[%s6954_s1 + $0x388] sm:$0xff] }
  0x3d   :  { %3515 = vmatpush1.bf16.msra.mxu0 %v4352_v34  ;;  %3420 = vmatprep.subr.bf16.mxu1 %v4077_v0  ;;  %v3544_v32 = vpack.c.bf16 %v727_v22, %v726_v21  ;;  %v128_v21 = vld [vmem:[%s6955_s0 + $0x3a8] sm:$0xff] }
  0x3e   :  { %3516 = vmatprep.subr.bf16.mxu0 %v4077_v0  ;;  %v132_v22 = vld [vmem:[%s6955_s0 + $0x3c8] sm:$0xff] }
  0x40   :  { %3422 = vmatpush1.bf16.msra.mxu1 %v3421_v40  ;;  %v57_v40 = vld [vmem:[%s6955_s0 + $0x170] sm:$0xff] }
  0x41   :  { %3518 = vmatpush1.bf16.msra.mxu0 %v4369_v41  ;;  %3423 = vmatprep.subr.bf16.mxu1 %v4077_v0 }
  0x42   :  { %3519 = vmatprep.subr.bf16.mxu0 %v4077_v0 }
  0x43   :  { %1018 = vmatmul.mubr.f32.vlgmr.msra.gmra.mrb[0].mxu1 %v11_v47  ;;  %v3436_v47 = vpack.c.bf16 %v655_v37, %v654_v35  ;;  %v728_v35 = vld [vmem:[%s6954_s1 + $0x390] sm:$0xff]  ;;  %v729_v37 = vld [vmem:[%s6954_s1 + $0x398] sm:$0xff] }
  0x44   :  { %1818 = vmatmul.mubr.f32.vlgmr.msra.gmra.mrb[0].mxu0 %v15_v48  ;;  %1022 = vmatprep.mubr.f32.mxu1 %v21_v51  ;;  %v656_v48 = vld [vmem:[%s6954_s1 + $0x150] sm:$0xff]  ;;  %v56_v51 = vld [vmem:[%s6955_s0 + $0x168] sm:$0xff]  ;;  %v3547_v46 = vpack.c.bf16 %v729_v37, %v728_v35  ;;  %v151_v37 = vld [vmem:[%s6955_s0 + $0x460] sm:$0xff] }
  0x45   :  { %3521 = vmatpush1.bf16.msra.mxu0 %v3520_v49  ;;  %1822 = vmatprep.mubr.f32.mxu0 %v25_v52  ;;  %v657_v49 = vld [vmem:[%s6954_s1 + $0x158] sm:$0xff]  ;;  %v60_v52 = vld [vmem:[%s6955_s0 + $0x188] sm:$0xff] }
  0x46   :  { %3425 = vmatpush1.bf16.msra.mxu1 %v3424_v53  ;;  %3522 = vmatprep.subr.bf16.mxu0 %v4077_v0  ;;  %v66_v53 = vld [vmem:[%s6955_s0 + $0x1b8] sm:$0xff] }
  0x47   :  { %1023 = vmatmul.mubr.f32.gmra.mrb[2].mxu1 %v20_v59  ;;  %3426 = vmatprep.subr.bf16.mxu1 %v4077_v0  ;;  %v3439_v59 = vpack.c.bf16 %v657_v49, %v656_v48  ;;  %v730_v48 = vld [vmem:[%s6954_s1 + $0x3a0] sm:$0xff]  ;;  %v731_v49 = vld [vmem:[%s6954_s1 + $0x3a8] sm:$0xff] }
  0x48   :  { %1823 = vmatmul.mubr.f32.gmra.mrb[2].mxu0 %v24_v60  ;;  %1027 = vmatprep.mubr.f32.mxu1 %v30_v61  ;;  %v658_v60 = vld [vmem:[%s6954_s1 + $0x160] sm:$0xff]  ;;  %v659_v61 = vld [vmem:[%s6954_s1 + $0x168] sm:$0xff] }
  0x49   :  { %1827 = vmatprep.mubr.f32.mxu0 %v34_v1  ;;  %3524 = vmatpush1.bf16.msra.mxu0 %v3523_v63  ;;  %v65_v63 = vld [vmem:[%s6955_s0 + $0x1b0] sm:$0xff] }
  0x4a   :  { %3525 = vmatprep.subr.bf16.mxu0 %v4077_v0  ;;  %3428 = vmatpush1.bf16.msra.mxu1 %v3427_v4  ;;  %v69_v1 = vld [vmem:[%s6955_s0 + $0x1d0] sm:$0xff]  ;;  %v79_v4 = vld [vmem:[%s6955_s0 + $0x220] sm:$0xff] }
  0x4b   :  { %1028 = vmatmul.mubr.f32.gmra.mrb[4].mxu1 %v29_v9  ;;  %3429 = vmatprep.subr.bf16.mxu1 %v4077_v0  ;;  %v3442_v9 = vpack.c.bf16 %v659_v61, %v658_v60  ;;  %v110_v60 = vld [vmem:[%s6955_s0 + $0x318] sm:$0xff] }
  0x4c   :  { %1828 = vmatmul.mubr.f32.gmra.mrb[4].mxu0 %v33_v10  ;;  %1032 = vmatprep.mubr.f32.mxu1 %v39_v11  ;;  %v660_v10 = vld [vmem:[%s6954_s1 + $0x170] sm:$0xff]  ;;  %v661_v11 = vld [vmem:[%s6954_s1 + $0x178] sm:$0xff] }
  0x4d   :  { %1832 = vmatprep.mubr.f32.mxu0 %v43_v15  ;;  %3527 = vmatpush1.bf16.msra.mxu0 %v3526_v14  ;;  %v74_v14 = vld [vmem:[%s6955_s0 + $0x1f8] sm:$0xff] }
  0x4e   :  { %3528 = vmatprep.subr.bf16.mxu0 %v4077_v0  ;;  %3431 = vmatpush1.bf16.msra.mxu1 %v3430_v19  ;;  %v78_v15 = vld [vmem:[%s6955_s0 + $0x218] sm:$0xff]  ;;  %v88_v19 = vld [vmem:[%s6955_s0 + $0x268] sm:$0xff] }
  0x4f   :  { %1033 = vmatmul.mubr.f32.gmra.mrb[6].mxu1 %v38_v23  ;;  %3432 = vmatprep.subr.bf16.mxu1 %v4077_v0  ;;  %v3445_v23 = vpack.c.bf16 %v661_v11, %v660_v10  ;;  %v114_v61 = vld [vmem:[%s6955_s0 + $0x338] sm:$0xff]  ;;  %v123_v10 = vld [vmem:[%s6955_s0 + $0x380] sm:$0xff]  ;;  %v129_v11 = vld [vmem:[%s6955_s0 + $0x3b0] sm:$0xff] }
  0x50   :  { %1833 = vmatmul.mubr.f32.gmra.mrb[6].mxu0 %v42_v25  ;;  %1037 = vmatprep.mubr.f32.mxu1 %v48_v26  ;;  %v662_v25 = vld [vmem:[%s6954_s1 + $0x180] sm:$0xff]  ;;  %v663_v26 = vld [vmem:[%s6954_s1 + $0x188] sm:$0xff] }
  0x51   :  { %1837 = vmatprep.mubr.f32.mxu0 %v52_v29  ;;  %3530 = vmatpush1.bf16.msra.mxu0 %v3529_v28  ;;  %v83_v28 = vld [vmem:[%s6955_s0 + $0x240] sm:$0xff] }
  0x52   :  { %3531 = vmatprep.subr.bf16.mxu0 %v4077_v0  ;;  %3434 = vmatpush1.bf16.msra.mxu1 %v3433_v33  ;;  %v87_v29 = vld [vmem:[%s6955_s0 + $0x260] sm:$0xff]  ;;  %v97_v33 = vld [vmem:[%s6955_s0 + $0x2b0] sm:$0xff] }
  0x53   :  { %1038 = vmatmul.mubr.f32.gmra.mrb[8].mxu1 %v47_v38  ;;  %3435 = vmatprep.subr.bf16.mxu1 %v4077_v0  ;;  %v3448_v38 = vpack.c.bf16 %v663_v26, %v662_v25  ;;  %v142_v26 = vld [vmem:[%s6955_s0 + $0x418] sm:$0xff] }
  0x54   :  { %1838 = vmatmul.mubr.f32.gmra.mrb[8].mxu0 %v51_v39  ;;  %1042 = vmatprep.mubr.f32.mxu1 %v57_v40  ;;  %v664_v39 = vld [vmem:[%s6954_s1 + $0x190] sm:$0xff]  ;;  %v665_v40 = vld [vmem:[%s6954_s1 + $0x198] sm:$0xff] }
  0x55   :  { %1842 = vmatprep.mubr.f32.mxu0 %v61_v43  ;;  %3533 = vmatpush1.bf16.msra.mxu0 %v3532_v42  ;;  %v92_v42 = vld [vmem:[%s6955_s0 + $0x288] sm:$0xff] }
  0x56   :  { %3534 = vmatprep.subr.bf16.mxu0 %v4077_v0  ;;  %3437 = vmatpush1.bf16.msra.mxu1 %v3436_v47  ;;  %v96_v43 = vld [vmem:[%s6955_s0 + $0x2a8] sm:$0xff]  ;;  %v106_v47 = vld [vmem:[%s6955_s0 + $0x2f8] sm:$0xff] }
  0x57   :  { %1043 = vmatmul.mubr.f32.gmra.mrb[10].mxu1 %v56_v51  ;;  %3438 = vmatprep.subr.bf16.mxu1 %v4077_v0  ;;  %v3451_v51 = vpack.c.bf16 %v665_v40, %v664_v39  ;;  %v741_v39 = vld [vmem:[%s6954_s1 + $0x3f8] sm:$0xff] }
  0x58   :  { %1843 = vmatmul.mubr.f32.gmra.mrb[10].mxu0 %v60_v52  ;;  %1047 = vmatprep.mubr.f32.mxu1 %v66_v53  ;;  %v101_v52 = vld [vmem:[%s6955_s0 + $0x2d0] sm:$0xff]  ;;  %v146_v40 = vld [vmem:[%s6955_s0 + $0x438] sm:$0xff] }
  0x59   :  { %1847 = vmatprep.mubr.f32.mxu0 %v70_v55  ;;  %3536 = vmatpush1.bf16.msra.mxu0 %v3535_v54  ;;  %v105_v53 = vld [vmem:[%s6955_s0 + $0x2f0] sm:$0xff]  ;;  %v111_v54 = vld [vmem:[%s6955_s0 + $0x320] sm:$0xff]  ;;  %v3550_v55 = vpack.c.bf16 %v731_v49, %v730_v48  ;;  %v669_v49 = vld [vmem:[%s6954_s1 + $0x1b8] sm:$0xff] }
  0x5a   :  { %3537 = vmatprep.subr.bf16.mxu0 %v4077_v0  ;;  %3440 = vmatpush1.bf16.msra.mxu1 %v3439_v59  ;;  %v733_v59 = vld [vmem:[%s6954_s1 + $0x3b8] sm:$0xff]  ;;  %v668_v48 = vld [vmem:[%s6954_s1 + $0x1b0] sm:$0xff] }
  0x5b   :  { %1048 = vmatmul.mubr.f32.gmra.mrb[12].mxu1 %v65_v63  ;;  %3441 = vmatprep.subr.bf16.mxu1 %v4077_v0  ;;  %v120_v63 = vld [vmem:[%s6955_s0 + $0x368] sm:$0xff] }
  0x5c   :  { %1848 = vmatmul.mubr.f32.gmra.mrb[12].mxu0 %v69_v1  ;;  %1052 = vmatprep.mubr.f32.mxu1 %v75_v2  ;;  %v3553_v1 = vpack.c.bf16 %v733_v59, %v732_v58  ;;  %v124_v2 = vld [vmem:[%s6955_s0 + $0x388] sm:$0xff]  ;;  %v174_v58 = vld [vmem:[%s6955_s0 + $0x518] sm:$0xff] }
  0x5d   :  { %1852 = vmatprep.mubr.f32.mxu0 %v79_v4  ;;  %3539 = vmatpush1.bf16.msra.mxu0 %v3538_v3  ;;  %v734_v3 = vld [vmem:[%s6954_s1 + $0x3c0] sm:$0xff]  ;;  %v735_v4 = vld [vmem:[%s6954_s1 + $0x3c8] sm:$0xff]  ;;  %v178_v59 = vld [vmem:[%s6955_s0 + $0x538] sm:$0xff] }
  0x5e   :  { %3540 = vmatprep.subr.bf16.mxu0 %v4077_v0  ;;  %3443 = vmatpush1.bf16.msra.mxu1 %v3442_v9  ;;  %v667_v9 = vld [vmem:[%s6954_s1 + $0x1a8] sm:$0xff] }
  0x5f   :  { %1053 = vmatmul.mubr.f32.gmra.mrb[14].mxu1 %v74_v14  ;;  %3444 = vmatprep.subr.bf16.mxu1 %v4077_v0  ;;  %v3556_v14 = vpack.c.bf16 %v735_v4, %v734_v3  ;;  %v186_v3 = vld [vmem:[%s6955_s0 + $0x578] sm:$0xff]  ;;  %v192_v4 = vld [vmem:[%s6955_s0 + $0x5a8] sm:$0xff] }
  0x60   :  { %1853 = vmatmul.mubr.f32.gmra.mrb[14].mxu0 %v78_v15  ;;  %1057 = vmatprep.mubr.f32.mxu1 %v84_v16  ;;  %v133_v15 = vld [vmem:[%s6955_s0 + $0x3d0] sm:$0xff] }
  0x61   :  { %1857 = vmatprep.mubr.f32.mxu0 %v88_v19  ;;  %3542 = vmatpush1.bf16.msra.mxu0 %v3541_v17  ;;  %v736_v16 = vld [vmem:[%s6954_s1 + $0x3d0] sm:$0xff]  ;;  %v737_v17 = vld [vmem:[%s6954_s1 + $0x3d8] sm:$0xff]  ;;  %v3454_v19 = vpack.c.bf16 %v667_v9, %v666_v7  ;;  %v191_v7 = vld [vmem:[%s6955_s0 + $0x5a0] sm:$0xff] }
  0x62   :  { %3543 = vmatprep.subr.bf16.mxu0 %v4077_v0  ;;  %3446 = vmatpush1.bf16.msra.mxu1 %v3445_v23  ;;  %v138_v23 = vld [vmem:[%s6955_s0 + $0x3f8] sm:$0xff]  ;;  %v3559_v25 = vpack.c.bf16 %v737_v17, %v736_v16  ;;  %v670_v9 = vld [vmem:[%s6954_s1 + $0x1c0] sm:$0xff]  ;;  %v205_v16 = vld [vmem:[%s6955_s0 + $0x610] sm:$0xff] }
  0x63   :  { %1058 = vmatmul.mubr.f32.gmra.mrb[16].mxu1 %v83_v28  ;;  %3447 = vmatprep.subr.bf16.mxu1 %v4077_v0  ;;  %v738_v28 = vld [vmem:[%s6954_s1 + $0x3e0] sm:$0xff]  ;;  %v200_v17 = vld [vmem:[%s6955_s0 + $0x5e8] sm:$0xff] }
  0x64   :  { %1858 = vmatmul.mubr.f32.gmra.mrb[16].mxu0 %v87_v29  ;;  %1062 = vmatprep.mubr.f32.mxu1 %v93_v31  ;;  %v739_v29 = vld [vmem:[%s6954_s1 + $0x3e8] sm:$0xff]  ;;  %v137_v31 = vld [vmem:[%s6955_s0 + $0x3f0] sm:$0xff] }
  0x65   :  { %1862 = vmatprep.mubr.f32.mxu0 %v97_v33  ;;  %3545 = vmatpush1.bf16.msra.mxu0 %v3544_v32  ;;  %v141_v32 = vld [vmem:[%s6955_s0 + $0x410] sm:$0xff]  ;;  %v147_v33 = vld [vmem:[%s6955_s0 + $0x440] sm:$0xff]  ;;  %v3562_v35 = vpack.c.bf16 %v739_v29, %v738_v28  ;;  %v218_v29 = vld [vmem:[%s6955_s0 + $0x678] sm:$0xff] }
  0x66   :  { %3546 = vmatprep.subr.bf16.mxu0 %v4077_v0  ;;  %3449 = vmatpush1.bf16.msra.mxu1 %v3448_v38  ;;  %v740_v38 = vld [vmem:[%s6954_s1 + $0x3f0] sm:$0xff]  ;;  %v223_v28 = vld [vmem:[%s6955_s0 + $0x6a0] sm:$0xff] }
  0x67   :  { %1063 = vmatmul.mubr.f32.gmra.mrb[18].mxu1 %v92_v42  ;;  %3450 = vmatprep.subr.bf16.mxu1 %v4077_v0  ;;  %v150_v42 = vld [vmem:[%s6955_s0 + $0x458] sm:$0xff] }
  0x68   :  { %1863 = vmatmul.mubr.f32.gmra.mrb[18].mxu0 %v96_v43  ;;  %1067 = vmatprep.mubr.f32.mxu1 %v102_v45  ;;  %v156_v43 = vld [vmem:[%s6955_s0 + $0x488] sm:$0xff]  ;;  %v3565_v45 = vpack.c.bf16 %v741_v39, %v740_v38  ;;  %v673_v38 = vld [vmem:[%s6954_s1 + $0x1d8] sm:$0xff]  ;;  %v231_v39 = vld [vmem:[%s6955_s0 + $0x6e0] sm:$0xff] }
  0x69   :  { %1867 = vmatprep.mubr.f32.mxu0 %v106_v47  ;;  %3548 = vmatpush1.bf16.msra.mxu0 %v3547_v46  ;;  %v160_v46 = vld [vmem:[%s6955_s0 + $0x4a8] sm:$0xff]  ;;  %v155_v47 = vld [vmem:[%s6955_s0 + $0x480] sm:$0xff] }
  0x6a   :  { %3549 = vmatprep.subr.bf16.mxu0 %v4077_v0  ;;  %3452 = vmatpush1.bf16.msra.mxu1 %v3451_v51  ;;  %v159_v51 = vld [vmem:[%s6955_s0 + $0x4a0] sm:$0xff] }
  0x6b   :  { %1068 = vmatmul.mubr.f32.gmra.mrb[20].mxu1 %v101_v52  ;;  %3453 = vmatprep.subr.bf16.mxu1 %v4077_v0  ;;  %v165_v52 = vld [vmem:[%s6955_s0 + $0x4d0] sm:$0xff] }
  0x6c   :  { %1868 = vmatmul.mubr.f32.gmra.mrb[20].mxu0 %v105_v53  ;;  %1072 = vmatprep.mubr.f32.mxu1 %v111_v54  ;;  %v3457_v53 = vpack.c.bf16 %v669_v49, %v668_v48  ;;  %v169_v54 = vld [vmem:[%s6955_s0 + $0x4f0] sm:$0xff]  ;;  %v250_v48 = vld [vmem:[%s6955_s0 + $0x778] sm:$0xff] }
  0x6d   :  { %1872 = vmatprep.mubr.f32.mxu0 %v115_v57  ;;  %3551 = vmatpush1.bf16.msra.mxu0 %v3550_v55  ;;  %v164_v55 = vld [vmem:[%s6955_s0 + $0x4c8] sm:$0xff]  ;;  %v245_v49 = vld [vmem:[%s6955_s0 + $0x750] sm:$0xff] }
  0x6e   :  { %3552 = vmatprep.subr.bf16.mxu0 %v4077_v0  ;;  %3455 = vmatpush1.bf16.msra.mxu1 %v3454_v19  ;;  %v168_v57 = vld [vmem:[%s6955_s0 + $0x4e8] sm:$0xff] }
  0x6f   :  { %1073 = vmatmul.mubr.f32.gmra.mrb[22].mxu1 %v110_v60  ;;  %3456 = vmatprep.subr.bf16.mxu1 %v4077_v0  ;;  %v173_v60 = vld [vmem:[%s6955_s0 + $0x510] sm:$0xff]  ;;  %v204_v19 = vld [vmem:[%s6955_s0 + $0x608] sm:$0xff] }
  0x70   :  { %1873 = vmatmul.mubr.f32.gmra.mrb[22].mxu0 %v114_v61  ;;  %1077 = vmatprep.mubr.f32.mxu1 %v120_v63  ;;  %v177_v61 = vld [vmem:[%s6955_s0 + $0x530] sm:$0xff]  ;;  %v183_v63 = vld [vmem:[%s6955_s0 + $0x560] sm:$0xff] }
  0x71   :  { %1877 = vmatprep.mubr.f32.mxu0 %v124_v2  ;;  %3554 = vmatpush1.bf16.msra.mxu0 %v3553_v1  ;;  %v187_v1 = vld [vmem:[%s6955_s0 + $0x580] sm:$0xff]  ;;  %v182_v2 = vld [vmem:[%s6955_s0 + $0x558] sm:$0xff] }
  0x72   :  { %3555 = vmatprep.subr.bf16.mxu0 %v4077_v0  ;;  %3458 = vmatpush1.bf16.msra.mxu1 %v3457_v53  ;;  %v259_v53 = vld [vmem:[%s6955_s0 + $0x7c0] sm:$0xff] }
  0x73   :  { %1078 = vmatmul.mubr.f32.gmra.mrb[24].mxu1 %v119_v6  ;;  %3459 = vmatprep.subr.bf16.mxu1 %v4077_v0  ;;  %v196_v6 = vld [vmem:[%s6955_s0 + $0x5c8] sm:$0xff] }
  0x74   :  { %1878 = vmatmul.mubr.f32.gmra.mrb[24].mxu0 %v123_v10  ;;  %1082 = vmatprep.mubr.f32.mxu1 %v129_v11  ;;  %v671_v10 = vld [vmem:[%s6954_s1 + $0x1c8] sm:$0xff]  ;;  %v195_v11 = vld [vmem:[%s6955_s0 + $0x5c0] sm:$0xff] }
  0x75   :  { %1882 = vmatprep.mubr.f32.mxu0 %v133_v15  ;;  %3557 = vmatpush1.bf16.msra.mxu0 %v3556_v14  ;;  %v201_v14 = vld [vmem:[%s6955_s0 + $0x5f0] sm:$0xff]  ;;  %v3460_v15 = vpack.c.bf16 %v671_v10, %v670_v9  ;;  %v286_v9 = vld [vmem:[%s6955_s0 + $0x898] sm:$0xff] }
  0x76   :  { %3558 = vmatprep.subr.bf16.mxu0 %v4077_v0  ;;  %v281_v10 = vld [vmem:[%s6955_s0 + $0x870] sm:$0xff] }
  0x77   :  { %1083 = vmatmul.mubr.f32.gmra.mrb[26].mxu1 %v128_v21  ;;  %v210_v21 = vld [vmem:[%s6955_s0 + $0x638] sm:$0xff] }
  0x78   :  { %1883 = vmatmul.mubr.f32.gmra.mrb[26].mxu0 %v132_v22  ;;  %1087 = vmatprep.mubr.f32.mxu1 %v138_v23  ;;  %v214_v22 = vld [vmem:[%s6955_s0 + $0x658] sm:$0xff]  ;;  %v209_v23 = vld [vmem:[%s6955_s0 + $0x630] sm:$0xff] }
  0x79   :  { %1887 = vmatprep.mubr.f32.mxu0 %v142_v26  ;;  %3560 = vmatpush1.bf16.msra.mxu0 %v3559_v25  ;;  %v213_v25 = vld [vmem:[%s6955_s0 + $0x650] sm:$0xff]  ;;  %v219_v26 = vld [vmem:[%s6955_s0 + $0x680] sm:$0xff] }
  0x7a   :  { %3561 = vmatprep.subr.bf16.mxu0 %v4077_v0  ;;  %3461 = vmatpush1.bf16.msra.mxu1 %v3460_v15  ;;  %v295_v15 = vld [vmem:[%s6955_s0 + $0x8e0] sm:$0xff] }
  0x7b   :  { %1088 = vmatmul.mubr.f32.gmra.mrb[28].mxu1 %v137_v31  ;;  %3462 = vmatprep.subr.bf16.mxu1 %v4077_v0  ;;  %v222_v31 = vld [vmem:[%s6955_s0 + $0x698] sm:$0xff] }
  0x7c   :  { %1888 = vmatmul.mubr.f32.gmra.mrb[28].mxu0 %v141_v32  ;;  %1092 = vmatprep.mubr.f32.mxu1 %v147_v33  ;;  %v228_v32 = vld [vmem:[%s6955_s0 + $0x6c8] sm:$0xff] }
  0x7d   :  { %1892 = vmatprep.mubr.f32.mxu0 %v151_v37  ;;  %3563 = vmatpush1.bf16.msra.mxu0 %v3562_v35  ;;  %v232_v33 = vld [vmem:[%s6955_s0 + $0x6e8] sm:$0xff]  ;;  %v227_v35 = vld [vmem:[%s6955_s0 + $0x6c0] sm:$0xff]  ;;  %v672_v37 = vld [vmem:[%s6954_s1 + $0x1d0] sm:$0xff] }
  0x7e   :  { %3564 = vmatprep.subr.bf16.mxu0 %v4077_v0 }
  0x7f   :  { %1093 = vmatmul.mubr.f32.gmra.mrb[30].mxu1 %v146_v40  ;;  %v237_v40 = vld [vmem:[%s6955_s0 + $0x710] sm:$0xff] }
  0x80   :  { %1893 = vmatmul.mubr.f32.gmra.mrb[30].mxu0 %v150_v42  ;;  %1097 = vmatprep.mubr.f32.mxu1 %v156_v43  ;;  %v3463_v42 = vpack.c.bf16 %v673_v38, %v672_v37  ;;  %v241_v43 = vld [vmem:[%s6955_s0 + $0x730] sm:$0xff]  ;;  %v18_v37 = vld [vmem:[%s6955_s0 + $0x38] sm:$0xff]  ;;  %v742_v38 = vld [vmem:[%s6954_s1 + $0x400] sm:$0xff] }
  0x81   :  { %1897 = vmatprep.mubr.f32.mxu0 %v160_v46  ;;  %3566 = vmatpush1.bf16.msra.mxu0 %v3565_v45  ;;  %v236_v45 = vld [vmem:[%s6955_s0 + $0x708] sm:$0xff] }
  0x82   :  { %3567 = vmatprep.subr.bf16.mxu0 %v4077_v0  ;;  %v240_v46 = vld [vmem:[%s6955_s0 + $0x728] sm:$0xff]  ;;  %3464 = vmatpush1.bf16.msra.mxu1 %v3463_v42  ;;  %v17_v42 = vld [vmem:[%s6955_s0 + $0x30] sm:$0xff] }
  0x83   :  { %1098 = vmatmul.mubr.f32.gmra.mrb[32].mxu1 %v155_v47  ;;  %v246_v47 = vld [vmem:[%s6955_s0 + $0x758] sm:$0xff]  ;;  %3465 = vmatprep.subr.bf16.mxu1 %v4077_v0 }
  0x84   :  { %1898 = vmatmul.mubr.f32.gmra.mrb[32].mxu0 %v159_v51  ;;  %1102 = vmatprep.mubr.f32.mxu1 %v165_v52  ;;  %v249_v51 = vld [vmem:[%s6955_s0 + $0x770] sm:$0xff]  ;;  %v255_v52 = vld [vmem:[%s6955_s0 + $0x7a0] sm:$0xff] }
  0x85   :  { %1902 = vmatprep.mubr.f32.mxu0 %v169_v54  ;;  %v254_v54 = vld [vmem:[%s6955_s0 + $0x798] sm:$0xff] }
  0x87   :  { %1103 = vmatmul.mubr.f32.gmra.mrb[34].mxu1 %v164_v55  ;;  %v258_v55 = vld [vmem:[%s6955_s0 + $0x7b8] sm:$0xff] }
  0x88   :  { %1903 = vmatmul.mubr.f32.gmra.mrb[34].mxu0 %v168_v57  ;;  %1107 = vmatprep.mubr.f32.mxu1 %v174_v58  ;;  %v264_v57 = vld [vmem:[%s6955_s0 + $0x7e8] sm:$0xff] }
  0x89   :  { %1907 = vmatprep.mubr.f32.mxu0 %v178_v59  ;;  %v268_v58 = vld [vmem:[%s6955_s0 + $0x808] sm:$0xff]  ;;  %v263_v59 = vld [vmem:[%s6955_s0 + $0x7e0] sm:$0xff] }
  0x8b   :  { %1108 = vmatmul.mubr.f32.gmra.mrb[36].mxu1 %v173_v60  ;;  %v267_v60 = vld [vmem:[%s6955_s0 + $0x800] sm:$0xff] }
  0x8c   :  { %1908 = vmatmul.mubr.f32.gmra.mrb[36].mxu0 %v177_v61  ;;  %1112 = vmatprep.mubr.f32.mxu1 %v183_v63  ;;  %v273_v61 = vld [vmem:[%s6955_s0 + $0x830] sm:$0xff] }
  0x8d   :  { %1912 = vmatprep.mubr.f32.mxu0 %v187_v1  ;;  %v277_v63 = vld [vmem:[%s6955_s0 + $0x850] sm:$0xff]  ;;  %v674_v1 = vld [vmem:[%s6954_s1 + $0x1e0] sm:$0xff] }
  0x8f   :  { %1113 = vmatmul.mubr.f32.gmra.mrb[38].mxu1 %v182_v2  ;;  %v675_v2 = vld [vmem:[%s6954_s1 + $0x1e8] sm:$0xff] }
  0x90   :  { %1913 = vmatmul.mubr.f32.gmra.mrb[38].mxu0 %v186_v3  ;;  %1117 = vmatprep.mubr.f32.mxu1 %v192_v4  ;;  %v272_v3 = vld [vmem:[%s6955_s0 + $0x828] sm:$0xff]  ;;  %v3466_v4 = vpack.c.bf16 %v675_v2, %v674_v1  ;;  %v54_v1 = vld [vmem:[%s6955_s0 + $0x158] sm:$0xff]  ;;  %v353_v2 = vld [vmem:[%s6955_s0 + $0xab0] sm:$0xff] }
  0x91   :  { %1917 = vmatprep.mubr.f32.mxu0 %v196_v6  ;;  %v276_v6 = vld [vmem:[%s6955_s0 + $0x848] sm:$0xff] }
  0x92   :  { %3467 = vmatpush1.bf16.msra.mxu1 %v3466_v4  ;;  %v363_v4 = vld [vmem:[%s6955_s0 + $0xb00] sm:$0xff] }
  0x93   :  { %1118 = vmatmul.mubr.f32.gmra.mrb[40].mxu1 %v191_v7  ;;  %v282_v7 = vld [vmem:[%s6955_s0 + $0x878] sm:$0xff]  ;;  %3468 = vmatprep.subr.bf16.mxu1 %v4077_v0 }
  0x94   :  { %1918 = vmatmul.mubr.f32.gmra.mrb[40].mxu0 %v195_v11  ;;  %1122 = vmatprep.mubr.f32.mxu1 %v201_v14  ;;  %v285_v11 = vld [vmem:[%s6955_s0 + $0x890] sm:$0xff]  ;;  %v291_v14 = vld [vmem:[%s6955_s0 + $0x8c0] sm:$0xff] }
  0x95   :  { %1922 = vmatprep.mubr.f32.mxu0 %v205_v16  ;;  %v290_v16 = vld [vmem:[%s6955_s0 + $0x8b8] sm:$0xff] }
  0x97   :  { %1123 = vmatmul.mubr.f32.gmra.mrb[42].mxu1 %v200_v17  ;;  %v294_v17 = vld [vmem:[%s6955_s0 + $0x8d8] sm:$0xff] }
  0x98   :  { %1923 = vmatmul.mubr.f32.gmra.mrb[42].mxu0 %v204_v19  ;;  %1127 = vmatprep.mubr.f32.mxu1 %v210_v21  ;;  %v300_v19 = vld [vmem:[%s6955_s0 + $0x908] sm:$0xff] }
  0x99   :  { %1927 = vmatprep.mubr.f32.mxu0 %v214_v22  ;;  %v304_v21 = vld [vmem:[%s6955_s0 + $0x928] sm:$0xff]  ;;  %v299_v22 = vld [vmem:[%s6955_s0 + $0x900] sm:$0xff] }
  0x9b   :  { %1128 = vmatmul.mubr.f32.gmra.mrb[44].mxu1 %v209_v23  ;;  %v303_v23 = vld [vmem:[%s6955_s0 + $0x920] sm:$0xff] }
  0x9c   :  { %1928 = vmatmul.mubr.f32.gmra.mrb[44].mxu0 %v213_v25  ;;  %1132 = vmatprep.mubr.f32.mxu1 %v219_v26  ;;  %v309_v25 = vld [vmem:[%s6955_s0 + $0x950] sm:$0xff] }
  0x9d   :  { %1932 = vmatprep.mubr.f32.mxu0 %v223_v28  ;;  %v313_v26 = vld [vmem:[%s6955_s0 + $0x970] sm:$0xff]  ;;  %v308_v28 = vld [vmem:[%s6955_s0 + $0x948] sm:$0xff] }
  0x9f   :  { %1133 = vmatmul.mubr.f32.gmra.mrb[46].mxu1 %v218_v29  ;;  %v676_v29 = vld [vmem:[%s6954_s1 + $0x1f0] sm:$0xff] }
  0xa0   :  { %1933 = vmatmul.mubr.f32.gmra.mrb[46].mxu0 %v222_v31  ;;  %1137 = vmatprep.mubr.f32.mxu1 %v228_v32  ;;  %v677_v31 = vld [vmem:[%s6954_s1 + $0x1f8] sm:$0xff]  ;;  %v312_v32 = vld [vmem:[%s6955_s0 + $0x968] sm:$0xff] }
  0xa1   :  { %1937 = vmatprep.mubr.f32.mxu0 %v232_v33  ;;  %v318_v33 = vld [vmem:[%s6955_s0 + $0x998] sm:$0xff] }
  0xa3   :  { %1138 = vmatmul.mubr.f32.gmra.mrb[48].mxu1 %v227_v35  ;;  %v3469_v35 = vpack.c.bf16 %v677_v31, %v676_v29  ;;  %v99_v29 = vld [vmem:[%s6955_s0 + $0x2c0] sm:$0xff]  ;;  %v398_v31 = vld [vmem:[%s6955_s0 + $0xc18] sm:$0xff] }
  0xa4   :  { %1938 = vmatmul.mubr.f32.gmra.mrb[48].mxu0 %v231_v39  ;;  %1142 = vmatprep.mubr.f32.mxu1 %v237_v40  ;;  %v743_v39 = vld [vmem:[%s6954_s1 + $0x408] sm:$0xff]  ;;  %v317_v40 = vld [vmem:[%s6955_s0 + $0x990] sm:$0xff] }
  0xa5   :  { %1942 = vmatprep.mubr.f32.mxu0 %v241_v43  ;;  %v3568_v43 = vpack.c.bf16 %v743_v39, %v742_v38  ;;  %3470 = vmatpush1.bf16.msra.mxu1 %v3469_v35  ;;  %v108_v35 = vld [vmem:[%s6955_s0 + $0x308] sm:$0xff]  ;;  %v107_v38 = vld [vmem:[%s6955_s0 + $0x300] sm:$0xff]  ;;  %v417_v39 = vld [vmem:[%s6955_s0 + $0xcb0] sm:$0xff] }
  0xa6   :  { %3573 = vmatprep.subr.bf16.mxu1 %v4077_v0 }
  0xa7   :  { %1143 = vmatmul.mubr.f32.gmra.mrb[50].mxu1 %v236_v45  ;;  %v327_v45 = vld [vmem:[%s6955_s0 + $0x9e0] sm:$0xff] }
  0xa8   :  { %1943 = vmatmul.mubr.f32.gmra.mrb[50].mxu0 %v240_v46  ;;  %1147 = vmatprep.mubr.f32.mxu1 %v246_v47  ;;  %v27_v46 = vld [vmem:[%s6955_s0 + $0x80] sm:$0xff]  ;;  %v744_v47 = vld [vmem:[%s6954_s1 + $0x410] sm:$0xff] }
  0xa9   :  { %1947 = vmatprep.mubr.f32.mxu0 %v250_v48  ;;  %v745_v48 = vld [vmem:[%s6954_s1 + $0x418] sm:$0xff] }
  0xab   :  { %1148 = vmatmul.mubr.f32.gmra.mrb[52].mxu1 %v245_v49  ;;  %v326_v49 = vld [vmem:[%s6955_s0 + $0x9d8] sm:$0xff] }
  0xac   :  { %1948 = vmatmul.mubr.f32.gmra.mrb[52].mxu0 %v249_v51  ;;  %1152 = vmatprep.mubr.f32.mxu1 %v255_v52  ;;  %v26_v51 = vld [vmem:[%s6955_s0 + $0x78] sm:$0xff]  ;;  %v336_v52 = vld [vmem:[%s6955_s0 + $0xa28] sm:$0xff] }
  0xad   :  { %1952 = vmatprep.mubr.f32.mxu0 %v259_v53  ;;  %v3571_v53 = vpack.c.bf16 %v745_v48, %v744_v47  ;;  %v425_v47 = vld [vmem:[%s6955_s0 + $0xcf0] sm:$0xff] }
  0xae   :  { %v125_v48 = vld [vmem:[%s6955_s0 + $0x390] sm:$0xff] }
  0xaf   :  { %1153 = vmatmul.mubr.f32.gmra.mrb[54].mxu1 %v254_v54  ;;  %v36_v54 = vld [vmem:[%s6955_s0 + $0xc8] sm:$0xff] }
  0xb0   :  { %1953 = vmatmul.mubr.f32.gmra.mrb[54].mxu0 %v258_v55  ;;  %1157 = vmatprep.mubr.f32.mxu1 %v264_v57  ;;  %v335_v55 = vld [vmem:[%s6955_s0 + $0xa20] sm:$0xff] }
  0xb1   :  { %1957 = vmatprep.mubr.f32.mxu0 %v268_v58  ;;  %v35_v57 = vld [vmem:[%s6955_s0 + $0xc0] sm:$0xff]  ;;  %v345_v58 = vld [vmem:[%s6955_s0 + $0xa70] sm:$0xff] }
  0xb3   :  { %1158 = vmatmul.mubr.f32.gmra.mrb[56].mxu1 %v263_v59  ;;  %v45_v59 = vld [vmem:[%s6955_s0 + $0x110] sm:$0xff] }
  0xb4   :  { %1958 = vmatmul.mubr.f32.gmra.mrb[56].mxu0 %v267_v60  ;;  %1162 = vmatprep.mubr.f32.mxu1 %v273_v61  ;;  %v344_v60 = vld [vmem:[%s6955_s0 + $0xa68] sm:$0xff] }
  0xb5   :  { %1962 = vmatprep.mubr.f32.mxu0 %v277_v63  ;;  %v44_v61 = vld [vmem:[%s6955_s0 + $0x108] sm:$0xff]  ;;  %v354_v63 = vld [vmem:[%s6955_s0 + $0xab8] sm:$0xff] }
  0xb7   :  { %1163 = vmatmul.mubr.f32.gmra.mrb[58].mxu1 %v272_v3  ;;  %v53_v3 = vld [vmem:[%s6955_s0 + $0x150] sm:$0xff] }
  0xb8   :  { %1963 = vmatmul.mubr.f32.gmra.mrb[58].mxu0 %v276_v6  ;;  %1167 = vmatprep.mubr.f32.mxu1 %v282_v7  ;;  %v63_v6 = vld [vmem:[%s6955_s0 + $0x1a0] sm:$0xff]  ;;  %v362_v7 = vld [vmem:[%s6955_s0 + $0xaf8] sm:$0xff] }
  0xb9   :  { %1967 = vmatprep.mubr.f32.mxu0 %v286_v9  ;;  %v62_v9 = vld [vmem:[%s6955_s0 + $0x198] sm:$0xff] }
  0xbb   :  { %1168 = vmatmul.mubr.f32.gmra.mrb[60].mxu1 %v281_v10  ;;  %v372_v10 = vld [vmem:[%s6955_s0 + $0xb48] sm:$0xff] }
  0xbc   :  { %1968 = vmatmul.mubr.f32.gmra.mrb[60].mxu0 %v285_v11  ;;  %1172 = vmatprep.mubr.f32.mxu1 %v291_v14  ;;  %v72_v11 = vld [vmem:[%s6955_s0 + $0x1e8] sm:$0xff]  ;;  %v371_v14 = vld [vmem:[%s6955_s0 + $0xb40] sm:$0xff] }
  0xbd   :  { %1972 = vmatprep.mubr.f32.mxu0 %v295_v15  ;;  %v71_v15 = vld [vmem:[%s6955_s0 + $0x1e0] sm:$0xff] }
  0xbf   :  { %1173 = vmatmul.mubr.f32.gmra.mrb[62].mxu1 %v290_v16  ;;  %v381_v16 = vld [vmem:[%s6955_s0 + $0xb90] sm:$0xff] }
  0xc0   :  { %1973 = vmatmul.mubr.f32.gmra.mrb[62].mxu0 %v294_v17  ;;  %1177 = vmatprep.mubr.f32.mxu1 %v300_v19  ;;  %v81_v17 = vld [vmem:[%s6955_s0 + $0x230] sm:$0xff]  ;;  %v380_v19 = vld [vmem:[%s6955_s0 + $0xb88] sm:$0xff] }
  0xc1   :  { %1977 = vmatprep.mubr.f32.mxu0 %v304_v21  ;;  %v80_v21 = vld [vmem:[%s6955_s0 + $0x228] sm:$0xff] }
  0xc3   :  { %1178 = vmatmul.mubr.f32.gmra.mrb[64].mxu1 %v299_v22  ;;  %v390_v22 = vld [vmem:[%s6955_s0 + $0xbd8] sm:$0xff] }
  0xc4   :  { %1978 = vmatmul.mubr.f32.gmra.mrb[64].mxu0 %v303_v23  ;;  %1182 = vmatprep.mubr.f32.mxu1 %v309_v25  ;;  %v90_v23 = vld [vmem:[%s6955_s0 + $0x278] sm:$0xff]  ;;  %v389_v25 = vld [vmem:[%s6955_s0 + $0xbd0] sm:$0xff] }
  0xc5   :  { %1982 = vmatprep.mubr.f32.mxu0 %v313_v26  ;;  %v89_v26 = vld [vmem:[%s6955_s0 + $0x270] sm:$0xff] }
  0xc7   :  { %1183 = vmatmul.mubr.f32.gmra.mrb[66].mxu1 %v308_v28  ;;  %v399_v28 = vld [vmem:[%s6955_s0 + $0xc20] sm:$0xff] }
  0xc8   :  { %1983 = vmatmul.mubr.f32.gmra.mrb[66].mxu0 %v312_v32  ;;  %1187 = vmatprep.mubr.f32.mxu1 %v318_v33  ;;  %v98_v32 = vld [vmem:[%s6955_s0 + $0x2b8] sm:$0xff]  ;;  %v408_v33 = vld [vmem:[%s6955_s0 + $0xc68] sm:$0xff] }
  0xc9   :  { %2217 = vmatprep.mubr.f32.mxu0 %v18_v37  ;;  %v407_v37 = vld [vmem:[%s6955_s0 + $0xc60] sm:$0xff] }
  0xcb   :  { %1188 = vmatmul.mubr.f32.gmra.mrb[68].mxu1 %v317_v40  ;;  %v117_v40 = vld [vmem:[%s6955_s0 + $0x350] sm:$0xff] }
  0xcc   :  { %2218 = vmatmul.mubr.f32.vlgmr.msra.gmra.mrb[0].mxu0 %v17_v42  ;;  %1192 = vmatprep.mubr.f32.mxu1 %v327_v45  ;;  %v416_v42 = vld [vmem:[%s6955_s0 + $0xca8] sm:$0xff]  ;;  %v426_v45 = vld [vmem:[%s6955_s0 + $0xcf8] sm:$0xff] }
  0xcd   :  { %3569 = vmatpush3.bf16.msra.mxu0 %v3568_v43  ;;  %2222 = vmatprep.mubr.f32.mxu0 %v27_v46  ;;  %v116_v43 = vld [vmem:[%s6955_s0 + $0x348] sm:$0xff]  ;;  %v126_v46 = vld [vmem:[%s6955_s0 + $0x398] sm:$0xff] }
  0xce   :  { %3570 = vmatprep.subr.bf16.mxu0 %v4077_v0 }
  0xcf   :  { %1193 = vmatmul.mubr.f32.gmra.mrb[70].mxu1 %v326_v49  ;;  %v435_v49 = vld [vmem:[%s6955_s0 + $0xd40] sm:$0xff] }
  0xd0   :  { %2223 = vmatmul.mubr.f32.gmra.mrb[2].mxu0 %v26_v51  ;;  %1197 = vmatprep.mubr.f32.mxu1 %v336_v52  ;;  %v135_v51 = vld [vmem:[%s6955_s0 + $0x3e0] sm:$0xff]  ;;  %v434_v52 = vld [vmem:[%s6955_s0 + $0xd38] sm:$0xff] }
  0xd1   :  { %2227 = vmatprep.mubr.f32.mxu0 %v36_v54  ;;  %3572 = vmatpush3.bf16.msra.mxu0 %v3571_v53  ;;  %v134_v53 = vld [vmem:[%s6955_s0 + $0x3d8] sm:$0xff]  ;;  %v444_v54 = vld [vmem:[%s6955_s0 + $0xd88] sm:$0xff] }
  0xd3   :  { %1198 = vmatmul.mubr.f32.gmra.mrb[72].mxu1 %v335_v55  ;;  %v144_v55 = vld [vmem:[%s6955_s0 + $0x428] sm:$0xff] }
  0xd4   :  { %2228 = vmatmul.mubr.f32.gmra.mrb[4].mxu0 %v35_v57  ;;  %1202 = vmatprep.mubr.f32.mxu1 %v345_v58  ;;  %v4078_v57 = vmov 0.0   ;;  %v443_v58 = vld [vmem:[%s6955_s0 + $0xd80] sm:$0xff] }
  0xd5   :  { %2232 = vmatprep.mubr.f32.mxu0 %v45_v59  ;;  %3172 = vmatprep.subr.mxu0 %v4078_v57  ;;  %v746_v59 = vld [vmem:[%s6954_s1 + $0x420] sm:$0x3] }
  0xd6   :  { %3173 = vmatpush3.msk.msra.mxu0 %vm949_vm0, %v746_v59  ;;  %v552_v59 = vld [vmem:[%s6955_s0 + $0x10e8] sm:$0xff] }
  0xd7   :  { %1203 = vmatmul.mubr.f32.gmra.mrb[74].mxu1 %v344_v60  ;;  %v143_v60 = vld [vmem:[%s6955_s0 + $0x420] sm:$0xff] }
  0xd8   :  { %2233 = vmatmul.mubr.f32.gmra.mrb[6].mxu0 %v44_v61  ;;  %1207 = vmatprep.mubr.f32.mxu1 %v354_v63  ;;  %v453_v61 = vld [vmem:[%s6955_s0 + $0xdd0] sm:$0xff] }
  0xd9   :  { %2237 = vmatprep.mubr.f32.mxu0 %v54_v1  ;;  %v153_v63 = vld [vmem:[%s6955_s0 + $0x470] sm:$0xff]  ;;  %v452_v1 = vld [vmem:[%s6955_s0 + $0xdc8] sm:$0xff] }
  0xdb   :  { %1208 = vmatmul.mubr.f32.gmra.mrb[76].mxu1 %v353_v2  ;;  %v152_v2 = vld [vmem:[%s6955_s0 + $0x468] sm:$0xff] }
  0xdc   :  { %2238 = vmatmul.mubr.f32.gmra.mrb[8].mxu0 %v53_v3  ;;  %1212 = vmatprep.mubr.f32.mxu1 %v363_v4  ;;  %v462_v3 = vld [vmem:[%s6955_s0 + $0xe18] sm:$0xff] }
  0xdd   :  { %2242 = vmatprep.mubr.f32.mxu0 %v63_v6  ;;  %v162_v4 = vld [vmem:[%s6955_s0 + $0x4b8] sm:$0xff]  ;;  %v461_v6 = vld [vmem:[%s6955_s0 + $0xe10] sm:$0xff] }
  0xdf   :  { %1213 = vmatmul.mubr.f32.gmra.mrb[78].mxu1 %v362_v7  ;;  %v161_v7 = vld [vmem:[%s6955_s0 + $0x4b0] sm:$0xff] }
  0xe0   :  { %2243 = vmatmul.mubr.f32.gmra.mrb[10].mxu0 %v62_v9  ;;  %1217 = vmatprep.mubr.f32.mxu1 %v372_v10  ;;  %v471_v9 = vld [vmem:[%s6955_s0 + $0xe60] sm:$0xff] }
  0xe1   :  { %2247 = vmatprep.mubr.f32.mxu0 %v72_v11  ;;  %v171_v10 = vld [vmem:[%s6955_s0 + $0x500] sm:$0xff]  ;;  %v470_v11 = vld [vmem:[%s6955_s0 + $0xe58] sm:$0xff] }
  0xe3   :  { %1218 = vmatmul.mubr.f32.gmra.mrb[80].mxu1 %v371_v14  ;;  %v170_v14 = vld [vmem:[%s6955_s0 + $0x4f8] sm:$0xff] }
  0xe4   :  { %2248 = vmatmul.mubr.f32.gmra.mrb[12].mxu0 %v71_v15  ;;  %1222 = vmatprep.mubr.f32.mxu1 %v381_v16  ;;  %v480_v15 = vld [vmem:[%s6955_s0 + $0xea8] sm:$0xff] }
  0xe5   :  { %2252 = vmatprep.mubr.f32.mxu0 %v81_v17  ;;  %v180_v16 = vld [vmem:[%s6955_s0 + $0x548] sm:$0xff]  ;;  %v479_v17 = vld [vmem:[%s6955_s0 + $0xea0] sm:$0xff] }
  0xe7   :  { %1223 = vmatmul.mubr.f32.gmra.mrb[82].mxu1 %v380_v19  ;;  %v179_v19 = vld [vmem:[%s6955_s0 + $0x540] sm:$0xff] }
  0xe8   :  { %2253 = vmatmul.mubr.f32.gmra.mrb[14].mxu0 %v80_v21  ;;  %1227 = vmatprep.mubr.f32.mxu1 %v390_v22  ;;  %v489_v21 = vld [vmem:[%s6955_s0 + $0xef0] sm:$0xff] }
  0xe9   :  { %2257 = vmatprep.mubr.f32.mxu0 %v90_v23  ;;  %v189_v22 = vld [vmem:[%s6955_s0 + $0x590] sm:$0xff]  ;;  %v488_v23 = vld [vmem:[%s6955_s0 + $0xee8] sm:$0xff] }
  0xeb   :  { %1228 = vmatmul.mubr.f32.gmra.mrb[84].mxu1 %v389_v25  ;;  %v188_v25 = vld [vmem:[%s6955_s0 + $0x588] sm:$0xff] }
  0xec   :  { %2258 = vmatmul.mubr.f32.gmra.mrb[16].mxu0 %v89_v26  ;;  %1232 = vmatprep.mubr.f32.mxu1 %v399_v28  ;;  %v498_v26 = vld [vmem:[%s6955_s0 + $0xf38] sm:$0xff] }
  0xed   :  { %2262 = vmatprep.mubr.f32.mxu0 %v99_v29  ;;  %v198_v28 = vld [vmem:[%s6955_s0 + $0x5d8] sm:$0xff]  ;;  %v497_v29 = vld [vmem:[%s6955_s0 + $0xf30] sm:$0xff] }
  0xef   :  { %1233 = vmatmul.mubr.f32.gmra.mrb[86].mxu1 %v398_v31  ;;  %v197_v31 = vld [vmem:[%s6955_s0 + $0x5d0] sm:$0xff] }
  0xf0   :  { %2263 = vmatmul.mubr.f32.gmra.mrb[18].mxu0 %v98_v32  ;;  %1237 = vmatprep.mubr.f32.mxu1 %v408_v33  ;;  %v507_v32 = vld [vmem:[%s6955_s0 + $0xf80] sm:$0xff] }
  0xf1   :  { %2267 = vmatprep.mubr.f32.mxu0 %v108_v35  ;;  %v207_v33 = vld [vmem:[%s6955_s0 + $0x620] sm:$0xff]  ;;  %v506_v35 = vld [vmem:[%s6955_s0 + $0xf78] sm:$0xff] }
  0xf3   :  { %1238 = vmatmul.mubr.f32.gmra.mrb[88].mxu1 %v407_v37  ;;  %v206_v37 = vld [vmem:[%s6955_s0 + $0x618] sm:$0xff] }
  0xf4   :  { %2268 = vmatmul.mubr.f32.gmra.mrb[20].mxu0 %v107_v38  ;;  %1242 = vmatprep.mubr.f32.mxu1 %v417_v39  ;;  %v516_v38 = vld [vmem:[%s6955_s0 + $0xfc8] sm:$0xff] }
  0xf5   :  { %2272 = vmatprep.mubr.f32.mxu0 %v117_v40  ;;  %v216_v39 = vld [vmem:[%s6955_s0 + $0x668] sm:$0xff]  ;;  %v515_v40 = vld [vmem:[%s6955_s0 + $0xfc0] sm:$0xff] }
  0xf7   :  { %1243 = vmatmul.mubr.f32.gmra.mrb[90].mxu1 %v416_v42  ;;  %v215_v42 = vld [vmem:[%s6955_s0 + $0x660] sm:$0xff] }
  0xf8   :  { %2273 = vmatmul.mubr.f32.gmra.mrb[22].mxu0 %v116_v43  ;;  %1247 = vmatprep.mubr.f32.mxu1 %v426_v45  ;;  %v525_v43 = vld [vmem:[%s6955_s0 + $0x1010] sm:$0xff] }
  0xf9   :  { %2277 = vmatprep.mubr.f32.mxu0 %v126_v46  ;;  %v225_v45 = vld [vmem:[%s6955_s0 + $0x6b0] sm:$0xff]  ;;  %v524_v46 = vld [vmem:[%s6955_s0 + $0x1008] sm:$0xff] }
  0xfb   :  { %1248 = vmatmul.mubr.f32.gmra.mrb[92].mxu1 %v425_v47  ;;  %v224_v47 = vld [vmem:[%s6955_s0 + $0x6a8] sm:$0xff] }
  0xfc   :  { %2278 = vmatmul.mubr.f32.gmra.mrb[24].mxu0 %v125_v48  ;;  %1252 = vmatprep.mubr.f32.mxu1 %v435_v49  ;;  %v534_v48 = vld [vmem:[%s6955_s0 + $0x1058] sm:$0xff] }
  0xfd   :  { %2282 = vmatprep.mubr.f32.mxu0 %v135_v51  ;;  %v234_v49 = vld [vmem:[%s6955_s0 + $0x6f8] sm:$0xff]  ;;  %v533_v51 = vld [vmem:[%s6955_s0 + $0x1050] sm:$0xff] }
  0xff   :  { %1253 = vmatmul.mubr.f32.gmra.mrb[94].mxu1 %v434_v52  ;;  %v233_v52 = vld [vmem:[%s6955_s0 + $0x6f0] sm:$0xff] }
 0x100   :  { %2283 = vmatmul.mubr.f32.gmra.mrb[26].mxu0 %v134_v53  ;;  %1257 = vmatprep.mubr.f32.mxu1 %v444_v54  ;;  %v543_v53 = vld [vmem:[%s6955_s0 + $0x10a0] sm:$0xff] }
 0x101   :  { %2287 = vmatprep.mubr.f32.mxu0 %v144_v55  ;;  %v243_v54 = vld [vmem:[%s6955_s0 + $0x740] sm:$0xff]  ;;  %v542_v55 = vld [vmem:[%s6955_s0 + $0x1098] sm:$0xff] }
 0x103   :  { %1258 = vmatmul.mubr.f32.gmra.mrb[96].mxu1 %v443_v58  ;;  %v242_v58 = vld [vmem:[%s6955_s0 + $0x738] sm:$0xff] }
 0x104   :  { %2288 = vmatmul.mubr.f32.gmra.mrb[28].mxu0 %v143_v60  ;;  %1262 = vmatprep.mubr.f32.mxu1 %v453_v61  ;;  %v252_v60 = vld [vmem:[%s6955_s0 + $0x788] sm:$0xff]  ;;  %v551_v61 = vld [vmem:[%s6955_s0 + $0x10e0] sm:$0xff] }
 0x105   :  { %2292 = vmatprep.mubr.f32.mxu0 %v153_v63  ;;  %v251_v63 = vld [vmem:[%s6955_s0 + $0x780] sm:$0xff] }
 0x107   :  { %1263 = vmatmul.mubr.f32.gmra.mrb[98].mxu1 %v452_v1  ;;  %v561_v1 = vld [vmem:[%s6955_s0 + $0x1130] sm:$0xff] }
 0x108   :  { %2293 = vmatmul.mubr.f32.gmra.mrb[30].mxu0 %v152_v2  ;;  %1267 = vmatprep.mubr.f32.mxu1 %v462_v3  ;;  %v261_v2 = vld [vmem:[%s6955_s0 + $0x7d0] sm:$0xff]  ;;  %v560_v3 = vld [vmem:[%s6955_s0 + $0x1128] sm:$0xff] }
 0x109   :  { %2297 = vmatprep.mubr.f32.mxu0 %v162_v4  ;;  %v260_v4 = vld [vmem:[%s6955_s0 + $0x7c8] sm:$0xff] }
 0x10b   :  { %1268 = vmatmul.mubr.f32.gmra.mrb[100].mxu1 %v461_v6  ;;  %v570_v6 = vld [vmem:[%s6955_s0 + $0x1178] sm:$0xff] }
 0x10c   :  { %2298 = vmatmul.mubr.f32.gmra.mrb[32].mxu0 %v161_v7  ;;  %1272 = vmatprep.mubr.f32.mxu1 %v471_v9  ;;  %v270_v7 = vld [vmem:[%s6955_s0 + $0x818] sm:$0xff]  ;;  %v569_v9 = vld [vmem:[%s6955_s0 + $0x1170] sm:$0xff] }
 0x10d   :  { %2302 = vmatprep.mubr.f32.mxu0 %v171_v10  ;;  %v269_v10 = vld [vmem:[%s6955_s0 + $0x810] sm:$0xff] }
 0x10f   :  { %1273 = vmatmul.mubr.f32.gmra.mrb[102].mxu1 %v470_v11  ;;  %v579_v11 = vld [vmem:[%s6955_s0 + $0x11c0] sm:$0xff] }
 0x110   :  { %2303 = vmatmul.mubr.f32.gmra.mrb[34].mxu0 %v170_v14  ;;  %1277 = vmatprep.mubr.f32.mxu1 %v480_v15  ;;  %v279_v14 = vld [vmem:[%s6955_s0 + $0x860] sm:$0xff]  ;;  %v578_v15 = vld [vmem:[%s6955_s0 + $0x11b8] sm:$0xff] }
 0x111   :  { %2307 = vmatprep.mubr.f32.mxu0 %v180_v16  ;;  %v278_v16 = vld [vmem:[%s6955_s0 + $0x858] sm:$0xff] }
 0x113   :  { %1278 = vmatmul.mubr.f32.gmra.mrb[104].mxu1 %v479_v17  ;;  %v588_v17 = vld [vmem:[%s6955_s0 + $0x1208] sm:$0xff] }
 0x114   :  { %2308 = vmatmul.mubr.f32.gmra.mrb[36].mxu0 %v179_v19  ;;  %1282 = vmatprep.mubr.f32.mxu1 %v489_v21  ;;  %v288_v19 = vld [vmem:[%s6955_s0 + $0x8a8] sm:$0xff]  ;;  %v587_v21 = vld [vmem:[%s6955_s0 + $0x1200] sm:$0xff] }
 0x115   :  { %2312 = vmatprep.mubr.f32.mxu0 %v189_v22  ;;  %v287_v22 = vld [vmem:[%s6955_s0 + $0x8a0] sm:$0xff] }
 0x117   :  { %1283 = vmatmul.mubr.f32.gmra.mrb[106].mxu1 %v488_v23  ;;  %v597_v23 = vld [vmem:[%s6955_s0 + $0x1250] sm:$0xff] }
 0x118   :  { %2313 = vmatmul.mubr.f32.gmra.mrb[38].mxu0 %v188_v25  ;;  %1287 = vmatprep.mubr.f32.mxu1 %v498_v26  ;;  %v297_v25 = vld [vmem:[%s6955_s0 + $0x8f0] sm:$0xff]  ;;  %v596_v26 = vld [vmem:[%s6955_s0 + $0x1248] sm:$0xff] }
 0x119   :  { %2317 = vmatprep.mubr.f32.mxu0 %v198_v28  ;;  %v296_v28 = vld [vmem:[%s6955_s0 + $0x8e8] sm:$0xff] }
 0x11b   :  { %1288 = vmatmul.mubr.f32.gmra.mrb[108].mxu1 %v497_v29  ;;  %v606_v29 = vld [vmem:[%s6955_s0 + $0x1298] sm:$0x1] }
 0x11c   :  { %2318 = vmatmul.mubr.f32.gmra.mrb[40].mxu0 %v197_v31  ;;  %1292 = vmatprep.mubr.f32.mxu1 %v507_v32  ;;  %v306_v31 = vld [vmem:[%s6955_s0 + $0x938] sm:$0xff]  ;;  %v605_v32 = vld [vmem:[%s6955_s0 + $0x1290] sm:$0x1] }
 0x11d   :  { %2322 = vmatprep.mubr.f32.mxu0 %v207_v33  ;;  %v305_v33 = vld [vmem:[%s6955_s0 + $0x930] sm:$0xff] }
 0x11f   :  { %1293 = vmatmul.mubr.f32.gmra.mrb[110].mxu1 %v506_v35  ;;  %v14_v35 = vld [vmem:[%s6955_s0 + $0x18] sm:$0xff] }
 0x120   :  { %2323 = vmatmul.mubr.f32.gmra.mrb[42].mxu0 %v206_v37  ;;  %1297 = vmatprep.mubr.f32.mxu1 %v516_v38  ;;  %v315_v37 = vld [vmem:[%s6955_s0 + $0x980] sm:$0xff]  ;;  %v13_v38 = vld [vmem:[%s6955_s0 + $0x10] sm:$0xff] }
 0x121   :  { %2327 = vmatprep.mubr.f32.mxu0 %v216_v39  ;;  %v314_v39 = vld [vmem:[%s6955_s0 + $0x978] sm:$0xff] }
 0x123   :  { %1298 = vmatmul.mubr.f32.gmra.mrb[112].mxu1 %v515_v40  ;;  %v23_v40 = vld [vmem:[%s6955_s0 + $0x60] sm:$0xff] }
 0x124   :  { %2328 = vmatmul.mubr.f32.gmra.mrb[44].mxu0 %v215_v42  ;;  %1302 = vmatprep.mubr.f32.mxu1 %v525_v43  ;;  %v324_v42 = vld [vmem:[%s6955_s0 + $0x9c8] sm:$0xff]  ;;  %v22_v43 = vld [vmem:[%s6955_s0 + $0x58] sm:$0xff] }
 0x125   :  { %2332 = vmatprep.mubr.f32.mxu0 %v225_v45  ;;  %v323_v45 = vld [vmem:[%s6955_s0 + $0x9c0] sm:$0xff] }
 0x127   :  { %1303 = vmatmul.mubr.f32.gmra.mrb[114].mxu1 %v524_v46  ;;  %v32_v46 = vld [vmem:[%s6955_s0 + $0xa8] sm:$0xff] }
 0x128   :  { %2333 = vmatmul.mubr.f32.gmra.mrb[46].mxu0 %v224_v47  ;;  %1307 = vmatprep.mubr.f32.mxu1 %v534_v48  ;;  %v333_v47 = vld [vmem:[%s6955_s0 + $0xa10] sm:$0xff]  ;;  %v31_v48 = vld [vmem:[%s6955_s0 + $0xa0] sm:$0xff] }
 0x129   :  { %2337 = vmatprep.mubr.f32.mxu0 %v234_v49  ;;  %v41_v49 = vld [vmem:[%s6955_s0 + $0xf0] sm:$0xff] }
 0x12b   :  { %1308 = vmatmul.mubr.f32.gmra.mrb[116].mxu1 %v533_v51  ;;  %v342_v51 = vld [vmem:[%s6955_s0 + $0xa58] sm:$0xff] }
 0x12c   :  { %2338 = vmatmul.mubr.f32.gmra.mrb[48].mxu0 %v233_v52  ;;  %1312 = vmatprep.mubr.f32.mxu1 %v543_v53  ;;  %v40_v52 = vld [vmem:[%s6955_s0 + $0xe8] sm:$0xff]  ;;  %v341_v53 = vld [vmem:[%s6955_s0 + $0xa50] sm:$0xff] }
 0x12d   :  { %2342 = vmatprep.mubr.f32.mxu0 %v243_v54  ;;  %v351_v54 = vld [vmem:[%s6955_s0 + $0xaa0] sm:$0xff] }
 0x12f   :  { %1313 = vmatmul.mubr.f32.gmra.mrb[118].mxu1 %v542_v55  ;;  %v49_v55 = vld [vmem:[%s6955_s0 + $0x130] sm:$0xff] }
 0x130   :  { %2343 = vmatmul.mubr.f32.gmra.mrb[50].mxu0 %v242_v58  ;;  %1317 = vmatprep.mubr.f32.mxu1 %v552_v59  ;;  %v350_v58 = vld [vmem:[%s6955_s0 + $0xa98] sm:$0xff]  ;;  %v360_v59 = vld [vmem:[%s6955_s0 + $0xae8] sm:$0xff] }
 0x131   :  { %2347 = vmatprep.mubr.f32.mxu0 %v252_v60  ;;  %v58_v60 = vld [vmem:[%s6955_s0 + $0x178] sm:$0xff] }
 0x133   :  { %1318 = vmatmul.mubr.f32.gmra.mrb[120].mxu1 %v551_v61  ;;  %v359_v61 = vld [vmem:[%s6955_s0 + $0xae0] sm:$0xff] }
 0x134   :  { %2348 = vmatmul.mubr.f32.gmra.mrb[52].mxu0 %v251_v63  ;;  %1322 = vmatprep.mubr.f32.mxu1 %v561_v1  ;;  %v369_v63 = vld [vmem:[%s6955_s0 + $0xb30] sm:$0xff]  ;;  %v67_v1 = vld [vmem:[%s6955_s0 + $0x1c0] sm:$0xff] }
 0x135   :  { %2352 = vmatprep.mubr.f32.mxu0 %v261_v2  ;;  %v368_v2 = vld [vmem:[%s6955_s0 + $0xb28] sm:$0xff] }
 0x137   :  { %1323 = vmatmul.mubr.f32.gmra.mrb[122].mxu1 %v560_v3  ;;  %v378_v3 = vld [vmem:[%s6955_s0 + $0xb78] sm:$0xff] }
 0x138   :  { %2353 = vmatmul.mubr.f32.gmra.mrb[54].mxu0 %v260_v4  ;;  %1327 = vmatprep.mubr.f32.mxu1 %v570_v6  ;;  %v76_v4 = vld [vmem:[%s6955_s0 + $0x208] sm:$0xff]  ;;  %v377_v6 = vld [vmem:[%s6955_s0 + $0xb70] sm:$0xff] }
 0x139   :  { %2357 = vmatprep.mubr.f32.mxu0 %v270_v7  ;;  %v387_v7 = vld [vmem:[%s6955_s0 + $0xbc0] sm:$0xff] }
 0x13b   :  { %1328 = vmatmul.mubr.f32.gmra.mrb[124].mxu1 %v569_v9  ;;  %v85_v9 = vld [vmem:[%s6955_s0 + $0x250] sm:$0xff] }
 0x13c   :  { %2358 = vmatmul.mubr.f32.gmra.mrb[56].mxu0 %v269_v10  ;;  %1332 = vmatprep.mubr.f32.mxu1 %v579_v11  ;;  %v386_v10 = vld [vmem:[%s6955_s0 + $0xbb8] sm:$0xff]  ;;  %v396_v11 = vld [vmem:[%s6955_s0 + $0xc08] sm:$0xff] }
 0x13d   :  { %2362 = vmatprep.mubr.f32.mxu0 %v279_v14  ;;  %v94_v14 = vld [vmem:[%s6955_s0 + $0x298] sm:$0xff] }
 0x13f   :  { %1333 = vmatmul.mubr.f32.gmra.mrb[126].mxu1 %v578_v15  ;;  %v395_v15 = vld [vmem:[%s6955_s0 + $0xc00] sm:$0xff] }
 0x140   :  { %2363 = vmatmul.mubr.f32.gmra.mrb[58].mxu0 %v278_v16  ;;  %1337 = vmatprep.mubr.f32.mxu1 %v588_v17  ;;  %v405_v16 = vld [vmem:[%s6955_s0 + $0xc50] sm:$0xff]  ;;  %v103_v17 = vld [vmem:[%s6955_s0 + $0x2e0] sm:$0xff] }
 0x141   :  { %2367 = vmatprep.mubr.f32.mxu0 %v288_v19  ;;  %v404_v19 = vld [vmem:[%s6955_s0 + $0xc48] sm:$0xff] }
 0x143   :  { %1338 = vmatmul.mubr.f32.gmra.mrb[128].mxu1 %v587_v21  ;;  %v414_v21 = vld [vmem:[%s6955_s0 + $0xc98] sm:$0xff] }
 0x144   :  { %2368 = vmatmul.mubr.f32.gmra.mrb[60].mxu0 %v287_v22  ;;  %1342 = vmatprep.mubr.f32.mxu1 %v597_v23  ;;  %v112_v22 = vld [vmem:[%s6955_s0 + $0x328] sm:$0xff]  ;;  %v413_v23 = vld [vmem:[%s6955_s0 + $0xc90] sm:$0xff] }
 0x145   :  { %2372 = vmatprep.mubr.f32.mxu0 %v297_v25  ;;  %v423_v25 = vld [vmem:[%s6955_s0 + $0xce0] sm:$0xff] }
 0x147   :  { %1343 = vmatmul.mubr.f32.gmra.mrb[130].mxu1 %v596_v26  ;;  %v121_v26 = vld [vmem:[%s6955_s0 + $0x370] sm:$0xff] }
 0x148   :  { %2373 = vmatmul.mubr.f32.gmra.mrb[62].mxu0 %v296_v28  ;;  %1347 = vmatprep.mubr.f32.mxu1 %v606_v29  ;;  %v422_v28 = vld [vmem:[%s6955_s0 + $0xcd8] sm:$0xff]  ;;  %v432_v29 = vld [vmem:[%s6955_s0 + $0xd28] sm:$0xff] }
 0x149   :  { %2377 = vmatprep.mubr.f32.mxu0 %v306_v31  ;;  %v130_v31 = vld [vmem:[%s6955_s0 + $0x3b8] sm:$0xff] }
 0x14b   :  { %1348 = vmatmul.mubr.f32.gmra.mrb[132].mxu1 %v605_v32  ;;  %v431_v32 = vld [vmem:[%s6955_s0 + $0xd20] sm:$0xff] }
 0x14c   :  { %2378 = vmatmul.mubr.f32.gmra.mrb[64].mxu0 %v305_v33  ;;  %1417 = vmatprep.mubr.f32.mxu1 %v14_v35  ;;  %v441_v33 = vld [vmem:[%s6955_s0 + $0xd70] sm:$0xff]  ;;  %v139_v35 = vld [vmem:[%s6955_s0 + $0x400] sm:$0xff] }
 0x14d   :  { %2382 = vmatprep.mubr.f32.mxu0 %v315_v37  ;;  %v440_v37 = vld [vmem:[%s6955_s0 + $0xd68] sm:$0xff] }
 0x14f   :  { %1418 = vmatmul.mubr.f32.vlgmr.msra.gmra.mrb[0].mxu1 %v13_v38  ;;  %v450_v38 = vld [vmem:[%s6955_s0 + $0xdb8] sm:$0xff] }
 0x150   :  { %2383 = vmatmul.mubr.f32.gmra.mrb[66].mxu0 %v314_v39  ;;  %1422 = vmatprep.mubr.f32.mxu1 %v23_v40  ;;  %v148_v39 = vld [vmem:[%s6955_s0 + $0x448] sm:$0xff]  ;;  %v449_v40 = vld [vmem:[%s6955_s0 + $0xdb0] sm:$0xff] }
 0x151   :  { %2387 = vmatprep.mubr.f32.mxu0 %v324_v42  ;;  %3589 = vmatpush1.bf16.msra.mxu1 %v4115_v8  ;;  %v332_v8 = vld [vmem:[%s6955_s0 + $0xa08] sm:$0xff]  ;;  %v459_v42 = vld [vmem:[%s6955_s0 + $0xe00] sm:$0xff] }
 0x152   :  { %3574 = vmatprep.subr.bf16.mxu1 %v4077_v0 }
 0x153   :  { %1423 = vmatmul.mubr.f32.gmra.mrb[2].mxu1 %v22_v43  ;;  %v157_v43 = vld [vmem:[%s6955_s0 + $0x490] sm:$0xff] }
 0x154   :  { %2388 = vmatmul.mubr.f32.gmra.mrb[68].mxu0 %v323_v45  ;;  %1427 = vmatprep.mubr.f32.mxu1 %v32_v46  ;;  %v458_v45 = vld [vmem:[%s6955_s0 + $0xdf8] sm:$0xff] }
 0x155   :  { %2392 = vmatprep.mubr.f32.mxu0 %v333_v47  ;;  %3590 = vmatpush1.bf16.msra.mxu1 %v4125_v12  ;;  %v50_v12 = vld [vmem:[%s6955_s0 + $0x138] sm:$0xff]  ;;  %v467_v47 = vld [vmem:[%s6955_s0 + $0xe40] sm:$0xff] }
 0x156   :  { %3575 = vmatprep.subr.bf16.mxu1 %v4077_v0  ;;  %v166_v46 = vld [vmem:[%s6955_s0 + $0x4d8] sm:$0xff] }
 0x157   :  { %1428 = vmatmul.mubr.f32.gmra.mrb[4].mxu1 %v31_v48  ;;  %v477_v48 = vld [vmem:[%s6955_s0 + $0xe90] sm:$0xff] }
 0x158   :  { %2393 = vmatmul.mubr.f32.gmra.mrb[70].mxu0 %v332_v8  ;;  %1432 = vmatprep.mubr.f32.mxu1 %v41_v49  ;;  %v175_v8 = vld [vmem:[%s6955_s0 + $0x520] sm:$0xff]  ;;  %v476_v49 = vld [vmem:[%s6955_s0 + $0xe88] sm:$0xff] }
 0x159   :  { %2397 = vmatprep.mubr.f32.mxu0 %v342_v51  ;;  %3591 = vmatpush1.bf16.msra.mxu1 %v4142_v18  ;;  %v59_v18 = vld [vmem:[%s6955_s0 + $0x180] sm:$0xff]  ;;  %v185_v51 = vld [vmem:[%s6955_s0 + $0x570] sm:$0xff] }
 0x15a   :  { %3576 = vmatprep.subr.bf16.mxu1 %v4077_v0 }
 0x15b   :  { %1433 = vmatmul.mubr.f32.gmra.mrb[6].mxu1 %v40_v52  ;;  %v486_v52 = vld [vmem:[%s6955_s0 + $0xed8] sm:$0xff] }
 0x15c   :  { %2398 = vmatmul.mubr.f32.gmra.mrb[72].mxu0 %v341_v53  ;;  %1437 = vmatprep.mubr.f32.mxu1 %v50_v12  ;;  %v184_v53 = vld [vmem:[%s6955_s0 + $0x568] sm:$0xff]  ;;  %v485_v12 = vld [vmem:[%s6955_s0 + $0xed0] sm:$0xff] }
 0x15d   :  { %2402 = vmatprep.mubr.f32.mxu0 %v351_v54  ;;  %3592 = vmatpush1.bf16.msra.mxu1 %v4159_v24  ;;  %v68_v24 = vld [vmem:[%s6955_s0 + $0x1c8] sm:$0xff]  ;;  %v194_v54 = vld [vmem:[%s6955_s0 + $0x5b8] sm:$0xff] }
 0x15e   :  { %3577 = vmatprep.subr.bf16.mxu1 %v4077_v0 }
 0x15f   :  { %1438 = vmatmul.mubr.f32.gmra.mrb[8].mxu1 %v49_v55  ;;  %v495_v55 = vld [vmem:[%s6955_s0 + $0xf20] sm:$0xff] }
 0x160   :  { %2403 = vmatmul.mubr.f32.gmra.mrb[74].mxu0 %v350_v58  ;;  %1442 = vmatprep.mubr.f32.mxu1 %v59_v18  ;;  %v193_v58 = vld [vmem:[%s6955_s0 + $0x5b0] sm:$0xff]  ;;  %v494_v18 = vld [vmem:[%s6955_s0 + $0xf18] sm:$0xff] }
 0x161   :  { %2407 = vmatprep.mubr.f32.mxu0 %v360_v59  ;;  %3593 = vmatpush1.bf16.msra.mxu1 %v4176_v30  ;;  %v77_v30 = vld [vmem:[%s6955_s0 + $0x210] sm:$0xff]  ;;  %v203_v59 = vld [vmem:[%s6955_s0 + $0x600] sm:$0xff] }
 0x162   :  { %3578 = vmatprep.subr.bf16.mxu1 %v4077_v0 }
 0x163   :  { %1443 = vmatmul.mubr.f32.gmra.mrb[10].mxu1 %v58_v60  ;;  %v504_v60 = vld [vmem:[%s6955_s0 + $0xf68] sm:$0xff] }
 0x164   :  { %2408 = vmatmul.mubr.f32.gmra.mrb[76].mxu0 %v359_v61  ;;  %1447 = vmatprep.mubr.f32.mxu1 %v68_v24  ;;  %v202_v61 = vld [vmem:[%s6955_s0 + $0x5f8] sm:$0xff]  ;;  %v503_v24 = vld [vmem:[%s6955_s0 + $0xf60] sm:$0xff] }
 0x165   :  { %2412 = vmatprep.mubr.f32.mxu0 %v369_v63  ;;  %3594 = vmatpush1.bf16.msra.mxu1 %v4193_v36  ;;  %v86_v36 = vld [vmem:[%s6955_s0 + $0x258] sm:$0xff]  ;;  %v212_v63 = vld [vmem:[%s6955_s0 + $0x648] sm:$0xff] }
 0x166   :  { %3579 = vmatprep.subr.bf16.mxu1 %v4077_v0 }
 0x167   :  { %1448 = vmatmul.mubr.f32.gmra.mrb[12].mxu1 %v67_v1  ;;  %v513_v1 = vld [vmem:[%s6955_s0 + $0xfb0] sm:$0xff] }
 0x168   :  { %2413 = vmatmul.mubr.f32.gmra.mrb[78].mxu0 %v368_v2  ;;  %1452 = vmatprep.mubr.f32.mxu1 %v77_v30  ;;  %v211_v2 = vld [vmem:[%s6955_s0 + $0x640] sm:$0xff]  ;;  %v512_v30 = vld [vmem:[%s6955_s0 + $0xfa8] sm:$0xff] }
 0x169   :  { %2417 = vmatprep.mubr.f32.mxu0 %v378_v3  ;;  %3595 = vmatpush1.bf16.msra.mxu1 %v4216_v44  ;;  %v95_v44 = vld [vmem:[%s6955_s0 + $0x2a0] sm:$0xff]  ;;  %v221_v3 = vld [vmem:[%s6955_s0 + $0x690] sm:$0xff] }
 0x16a   :  { %3580 = vmatprep.subr.bf16.mxu1 %v4077_v0 }
 0x16b   :  { %1453 = vmatmul.mubr.f32.gmra.mrb[14].mxu1 %v76_v4  ;;  %v522_v4 = vld [vmem:[%s6955_s0 + $0xff8] sm:$0xff] }
 0x16c   :  { %2418 = vmatmul.mubr.f32.gmra.mrb[80].mxu0 %v377_v6  ;;  %1457 = vmatprep.mubr.f32.mxu1 %v86_v36  ;;  %v220_v6 = vld [vmem:[%s6955_s0 + $0x688] sm:$0xff]  ;;  %v521_v36 = vld [vmem:[%s6955_s0 + $0xff0] sm:$0xff] }
 0x16d   :  { %2422 = vmatprep.mubr.f32.mxu0 %v387_v7  ;;  %3596 = vmatpush1.bf16.msra.mxu1 %v4233_v50  ;;  %v104_v50 = vld [vmem:[%s6955_s0 + $0x2e8] sm:$0xff]  ;;  %v230_v7 = vld [vmem:[%s6955_s0 + $0x6d8] sm:$0xff] }
 0x16e   :  { %3581 = vmatprep.subr.bf16.mxu1 %v4077_v0 }
 0x16f   :  { %1458 = vmatmul.mubr.f32.gmra.mrb[16].mxu1 %v85_v9  ;;  %v531_v9 = vld [vmem:[%s6955_s0 + $0x1040] sm:$0xff] }
 0x170   :  { %2423 = vmatmul.mubr.f32.gmra.mrb[82].mxu0 %v386_v10  ;;  %1462 = vmatprep.mubr.f32.mxu1 %v95_v44  ;;  %v229_v10 = vld [vmem:[%s6955_s0 + $0x6d0] sm:$0xff]  ;;  %v530_v44 = vld [vmem:[%s6955_s0 + $0x1038] sm:$0xff] }
 0x171   :  { %2427 = vmatprep.mubr.f32.mxu0 %v396_v11  ;;  %3597 = vmatpush1.bf16.msra.mxu1 %v4250_v56  ;;  %v113_v56 = vld [vmem:[%s6955_s0 + $0x330] sm:$0xff]  ;;  %v239_v11 = vld [vmem:[%s6955_s0 + $0x720] sm:$0xff] }
 0x172   :  { %3582 = vmatprep.subr.bf16.mxu1 %v4077_v0 }
 0x173   :  { %1463 = vmatmul.mubr.f32.gmra.mrb[18].mxu1 %v94_v14  ;;  %v540_v14 = vld [vmem:[%s6955_s0 + $0x1088] sm:$0xff] }
 0x174   :  { %2428 = vmatmul.mubr.f32.gmra.mrb[84].mxu0 %v395_v15  ;;  %1467 = vmatprep.mubr.f32.mxu1 %v104_v50  ;;  %v238_v15 = vld [vmem:[%s6955_s0 + $0x718] sm:$0xff]  ;;  %v539_v50 = vld [vmem:[%s6955_s0 + $0x1080] sm:$0xff] }
 0x175   :  { %2432 = vmatprep.mubr.f32.mxu0 %v405_v16  ;;  %3598 = vmatpush1.bf16.msra.mxu1 %v4267_v62  ;;  %v122_v62 = vld [vmem:[%s6955_s0 + $0x378] sm:$0xff]  ;;  %v248_v16 = vld [vmem:[%s6955_s0 + $0x768] sm:$0xff] }
 0x176   :  { %3583 = vmatprep.subr.bf16.mxu1 %v4077_v0 }
 0x177   :  { %1468 = vmatmul.mubr.f32.gmra.mrb[20].mxu1 %v103_v17  ;;  %v549_v17 = vld [vmem:[%s6955_s0 + $0x10d0] sm:$0xff] }
 0x178   :  { %2433 = vmatmul.mubr.f32.gmra.mrb[86].mxu0 %v404_v19  ;;  %1472 = vmatprep.mubr.f32.mxu1 %v113_v56  ;;  %v247_v19 = vld [vmem:[%s6955_s0 + $0x760] sm:$0xff]  ;;  %v548_v56 = vld [vmem:[%s6955_s0 + $0x10c8] sm:$0xff] }
 0x179   :  { %2437 = vmatprep.mubr.f32.mxu0 %v414_v21  ;;  %3599 = vmatpush1.bf16.msra.mxu1 %v4284_v5  ;;  %v131_v5 = vld [vmem:[%s6955_s0 + $0x3c0] sm:$0xff]  ;;  %v257_v21 = vld [vmem:[%s6955_s0 + $0x7b0] sm:$0xff] }
 0x17a   :  { %3584 = vmatprep.subr.bf16.mxu1 %v4077_v0 }
 0x17b   :  { %1473 = vmatmul.mubr.f32.gmra.mrb[22].mxu1 %v112_v22  ;;  %v558_v22 = vld [vmem:[%s6955_s0 + $0x1118] sm:$0xff] }
 0x17c   :  { %2438 = vmatmul.mubr.f32.gmra.mrb[88].mxu0 %v413_v23  ;;  %1477 = vmatprep.mubr.f32.mxu1 %v122_v62  ;;  %v256_v23 = vld [vmem:[%s6955_s0 + $0x7a8] sm:$0xff]  ;;  %v557_v62 = vld [vmem:[%s6955_s0 + $0x1110] sm:$0xff] }
 0x17d   :  { %2442 = vmatprep.mubr.f32.mxu0 %v423_v25  ;;  %3600 = vmatpush1.bf16.msra.mxu1 %v4301_v13  ;;  %v140_v13 = vld [vmem:[%s6955_s0 + $0x408] sm:$0xff]  ;;  %v266_v25 = vld [vmem:[%s6955_s0 + $0x7f8] sm:$0xff] }
 0x17e   :  { %3585 = vmatprep.subr.bf16.mxu1 %v4077_v0 }
 0x17f   :  { %1478 = vmatmul.mubr.f32.gmra.mrb[24].mxu1 %v121_v26  ;;  %v567_v26 = vld [vmem:[%s6955_s0 + $0x1160] sm:$0xff] }
 0x180   :  { %2443 = vmatmul.mubr.f32.gmra.mrb[90].mxu0 %v422_v28  ;;  %1482 = vmatprep.mubr.f32.mxu1 %v131_v5  ;;  %v265_v28 = vld [vmem:[%s6955_s0 + $0x7f0] sm:$0xff]  ;;  %v566_v5 = vld [vmem:[%s6955_s0 + $0x1158] sm:$0xff] }
 0x181   :  { %2447 = vmatprep.mubr.f32.mxu0 %v432_v29  ;;  %3601 = vmatpush1.bf16.msra.mxu1 %v4318_v20  ;;  %v149_v20 = vld [vmem:[%s6955_s0 + $0x450] sm:$0xff]  ;;  %v275_v29 = vld [vmem:[%s6955_s0 + $0x840] sm:$0xff] }
 0x182   :  { %3586 = vmatprep.subr.bf16.mxu1 %v4077_v0 }
 0x183   :  { %1483 = vmatmul.mubr.f32.gmra.mrb[26].mxu1 %v130_v31  ;;  %v576_v31 = vld [vmem:[%s6955_s0 + $0x11a8] sm:$0xff] }
 0x184   :  { %2448 = vmatmul.mubr.f32.gmra.mrb[92].mxu0 %v431_v32  ;;  %1487 = vmatprep.mubr.f32.mxu1 %v140_v13  ;;  %v274_v32 = vld [vmem:[%s6955_s0 + $0x838] sm:$0xff]  ;;  %v575_v13 = vld [vmem:[%s6955_s0 + $0x11a0] sm:$0xff] }
 0x185   :  { %2452 = vmatprep.mubr.f32.mxu0 %v441_v33  ;;  %3602 = vmatpush1.bf16.msra.mxu1 %v4335_v27  ;;  %v158_v27 = vld [vmem:[%s6955_s0 + $0x498] sm:$0xff]  ;;  %v284_v33 = vld [vmem:[%s6955_s0 + $0x888] sm:$0xff] }
 0x186   :  { %3587 = vmatprep.subr.bf16.mxu1 %v4077_v0 }
 0x187   :  { %1488 = vmatmul.mubr.f32.gmra.mrb[28].mxu1 %v139_v35  ;;  %v585_v35 = vld [vmem:[%s6955_s0 + $0x11f0] sm:$0xff] }
 0x188   :  { %2453 = vmatmul.mubr.f32.gmra.mrb[94].mxu0 %v440_v37  ;;  %1492 = vmatprep.mubr.f32.mxu1 %v149_v20  ;;  %v283_v37 = vld [vmem:[%s6955_s0 + $0x880] sm:$0xff]  ;;  %v584_v20 = vld [vmem:[%s6955_s0 + $0x11e8] sm:$0xff] }
 0x189   :  { %2457 = vmatprep.mubr.f32.mxu0 %v450_v38  ;;  %3603 = vmatpush1.bf16.msra.mxu1 %v4352_v34  ;;  %v167_v34 = vld [vmem:[%s6955_s0 + $0x4e0] sm:$0xff]  ;;  %v293_v38 = vld [vmem:[%s6955_s0 + $0x8d0] sm:$0xff] }
 0x18a   :  { %3588 = vmatprep.subr.bf16.mxu1 %v4077_v0  ;;  %v468_v0 = vld [vmem:[%s6955_s0 + $0xe48] sm:$0xff] }
 0x18b   :  { %1493 = vmatmul.mubr.f32.gmra.mrb[30].mxu1 %v148_v39  ;;  %v594_v39 = vld [vmem:[%s6955_s0 + $0x1238] sm:$0xff] }
 0x18c   :  { %2458 = vmatmul.mubr.f32.gmra.mrb[96].mxu0 %v449_v40  ;;  %1497 = vmatprep.mubr.f32.mxu1 %v158_v27  ;;  %v292_v40 = vld [vmem:[%s6955_s0 + $0x8c8] sm:$0xff]  ;;  %v593_v27 = vld [vmem:[%s6955_s0 + $0x1230] sm:$0xff] }
 0x18d   :  { %2462 = vmatprep.mubr.f32.mxu0 %v459_v42  ;;  %3604 = vmatpush1.bf16.msra.mxu1 %v4369_v41  ;;  %v176_v41 = vld [vmem:[%s6955_s0 + $0x528] sm:$0xff]  ;;  %v302_v42 = vld [vmem:[%s6955_s0 + $0x918] sm:$0xff] }
 0x18f   :  { %1498 = vmatmul.mubr.f32.gmra.mrb[32].mxu1 %v157_v43  ;;  %v603_v43 = vld [vmem:[%s6955_s0 + $0x1280] sm:$0xff] }
 0x190   :  { %2463 = vmatmul.mubr.f32.gmra.mrb[98].mxu0 %v458_v45  ;;  %1502 = vmatprep.mubr.f32.mxu1 %v167_v34  ;;  %v301_v45 = vld [vmem:[%s6955_s0 + $0x910] sm:$0xff]  ;;  %v602_v34 = vld [vmem:[%s6955_s0 + $0x1278] sm:$0xff] }
 0x191   :  { %2467 = vmatprep.mubr.f32.mxu0 %v468_v0  ;;  %v311_v0 = vld [vmem:[%s6955_s0 + $0x960] sm:$0xff] }
 0x193   :  { %1503 = vmatmul.mubr.f32.gmra.mrb[34].mxu1 %v166_v46  ;;  %v612_v46 = vld [vmem:[%s6955_s0 + $0x12c8] sm:$0x1] }
 0x194   :  { %2468 = vmatmul.mubr.f32.gmra.mrb[100].mxu0 %v467_v47  ;;  %1507 = vmatprep.mubr.f32.mxu1 %v176_v41  ;;  %v310_v47 = vld [vmem:[%s6955_s0 + $0x958] sm:$0xff]  ;;  %v611_v41 = vld [vmem:[%s6955_s0 + $0x12c0] sm:$0x1] }
 0x195   :  { %2472 = vmatprep.mubr.f32.mxu0 %v477_v48  ;;  %v320_v48 = vld [vmem:[%s6955_s0 + $0x9a8] sm:$0xff] }
 0x197   :  { %1508 = vmatmul.mubr.f32.gmra.mrb[36].mxu1 %v175_v8  ;;  %v319_v8 = vld [vmem:[%s6955_s0 + $0x9a0] sm:$0xff] }
 0x198   :  { %2473 = vmatmul.mubr.f32.gmra.mrb[102].mxu0 %v476_v49  ;;  %1512 = vmatprep.mubr.f32.mxu1 %v185_v51  ;;  %v19_v49 = vld [vmem:[%s6955_s0 + $0x40] sm:$0xff]  ;;  %v329_v51 = vld [vmem:[%s6955_s0 + $0x9f0] sm:$0xff] }
 0x199   :  { %2477 = vmatprep.mubr.f32.mxu0 %v486_v52  ;;  %v328_v52 = vld [vmem:[%s6955_s0 + $0x9e8] sm:$0xff] }
 0x19b   :  { %1513 = vmatmul.mubr.f32.gmra.mrb[38].mxu1 %v184_v53  ;;  %v28_v53 = vld [vmem:[%s6955_s0 + $0x88] sm:$0xff] }
 0x19c   :  { %2478 = vmatmul.mubr.f32.gmra.mrb[104].mxu0 %v485_v12  ;;  %1517 = vmatprep.mubr.f32.mxu1 %v194_v54  ;;  %v338_v12 = vld [vmem:[%s6955_s0 + $0xa38] sm:$0xff]  ;;  %v337_v54 = vld [vmem:[%s6955_s0 + $0xa30] sm:$0xff] }
 0x19d   :  { %2482 = vmatprep.mubr.f32.mxu0 %v495_v55  ;;  %v37_v55 = vld [vmem:[%s6955_s0 + $0xd0] sm:$0xff] }
 0x19f   :  { %1518 = vmatmul.mubr.f32.gmra.mrb[40].mxu1 %v193_v58  ;;  %v347_v58 = vld [vmem:[%s6955_s0 + $0xa80] sm:$0xff] }
 0x1a0   :  { %2483 = vmatmul.mubr.f32.gmra.mrb[106].mxu0 %v494_v18  ;;  %1522 = vmatprep.mubr.f32.mxu1 %v203_v59  ;;  %v346_v18 = vld [vmem:[%s6955_s0 + $0xa78] sm:$0xff] }
 0x1a1   :  { %2487 = vmatprep.mubr.f32.mxu0 %v504_v60  ;;  %v46_v59 = vld [vmem:[%s6955_s0 + $0x118] sm:$0xff]  ;;  %v356_v60 = vld [vmem:[%s6955_s0 + $0xac8] sm:$0xff] }
 0x1a3   :  { %1523 = vmatmul.mubr.f32.gmra.mrb[42].mxu1 %v202_v61  ;;  %v355_v61 = vld [vmem:[%s6955_s0 + $0xac0] sm:$0xff] }
 0x1a4   :  { %2488 = vmatmul.mubr.f32.gmra.mrb[108].mxu0 %v503_v24  ;;  %1527 = vmatprep.mubr.f32.mxu1 %v212_v63  ;;  %v55_v24 = vld [vmem:[%s6955_s0 + $0x160] sm:$0xff]  ;;  %v365_v63 = vld [vmem:[%s6955_s0 + $0xb10] sm:$0xff] }
 0x1a5   :  { %2492 = vmatprep.mubr.f32.mxu0 %v513_v1  ;;  %v364_v1 = vld [vmem:[%s6955_s0 + $0xb08] sm:$0xff] }
 0x1a7   :  { %1528 = vmatmul.mubr.f32.gmra.mrb[44].mxu1 %v211_v2  ;;  %v64_v2 = vld [vmem:[%s6955_s0 + $0x1a8] sm:$0xff] }
 0x1a8   :  { %2493 = vmatmul.mubr.f32.gmra.mrb[110].mxu0 %v512_v30  ;;  %1532 = vmatprep.mubr.f32.mxu1 %v221_v3  ;;  %v374_v30 = vld [vmem:[%s6955_s0 + $0xb58] sm:$0xff]  ;;  %v373_v3 = vld [vmem:[%s6955_s0 + $0xb50] sm:$0xff] }
 0x1a9   :  { %2497 = vmatprep.mubr.f32.mxu0 %v522_v4  ;;  %v73_v4 = vld [vmem:[%s6955_s0 + $0x1f0] sm:$0xff] }
 0x1ab   :  { %1533 = vmatmul.mubr.f32.gmra.mrb[46].mxu1 %v220_v6  ;;  %v383_v6 = vld [vmem:[%s6955_s0 + $0xba0] sm:$0xff] }
 0x1ac   :  { %2498 = vmatmul.mubr.f32.gmra.mrb[112].mxu0 %v521_v36  ;;  %1537 = vmatprep.mubr.f32.mxu1 %v230_v7  ;;  %v382_v36 = vld [vmem:[%s6955_s0 + $0xb98] sm:$0xff] }
 0x1ad   :  { %2502 = vmatprep.mubr.f32.mxu0 %v531_v9  ;;  %v82_v7 = vld [vmem:[%s6955_s0 + $0x238] sm:$0xff]  ;;  %v392_v9 = vld [vmem:[%s6955_s0 + $0xbe8] sm:$0xff] }
 0x1af   :  { %1538 = vmatmul.mubr.f32.gmra.mrb[48].mxu1 %v229_v10  ;;  %v391_v10 = vld [vmem:[%s6955_s0 + $0xbe0] sm:$0xff] }
 0x1b0   :  { %2503 = vmatmul.mubr.f32.gmra.mrb[114].mxu0 %v530_v44  ;;  %1542 = vmatprep.mubr.f32.mxu1 %v239_v11  ;;  %v91_v44 = vld [vmem:[%s6955_s0 + $0x280] sm:$0xff]  ;;  %v401_v11 = vld [vmem:[%s6955_s0 + $0xc30] sm:$0xff] }
 0x1b1   :  { %2507 = vmatprep.mubr.f32.mxu0 %v540_v14  ;;  %v400_v14 = vld [vmem:[%s6955_s0 + $0xc28] sm:$0xff] }
 0x1b3   :  { %1543 = vmatmul.mubr.f32.gmra.mrb[50].mxu1 %v238_v15  ;;  %v100_v15 = vld [vmem:[%s6955_s0 + $0x2c8] sm:$0xff] }
 0x1b4   :  { %2508 = vmatmul.mubr.f32.gmra.mrb[116].mxu0 %v539_v50  ;;  %1547 = vmatprep.mubr.f32.mxu1 %v248_v16  ;;  %v410_v50 = vld [vmem:[%s6955_s0 + $0xc78] sm:$0xff]  ;;  %v409_v16 = vld [vmem:[%s6955_s0 + $0xc70] sm:$0xff] }
 0x1b5   :  { %2512 = vmatprep.mubr.f32.mxu0 %v549_v17  ;;  %v109_v17 = vld [vmem:[%s6955_s0 + $0x310] sm:$0xff] }
 0x1b7   :  { %1548 = vmatmul.mubr.f32.gmra.mrb[52].mxu1 %v247_v19  ;;  %v419_v19 = vld [vmem:[%s6955_s0 + $0xcc0] sm:$0xff] }
 0x1b8   :  { %2513 = vmatmul.mubr.f32.gmra.mrb[118].mxu0 %v548_v56  ;;  %1552 = vmatprep.mubr.f32.mxu1 %v257_v21  ;;  %v418_v56 = vld [vmem:[%s6955_s0 + $0xcb8] sm:$0xff] }
 0x1b9   :  { %2517 = vmatprep.mubr.f32.mxu0 %v558_v22  ;;  %v118_v21 = vld [vmem:[%s6955_s0 + $0x358] sm:$0xff]  ;;  %v428_v22 = vld [vmem:[%s6955_s0 + $0xd08] sm:$0xff] }
 0x1bb   :  { %1553 = vmatmul.mubr.f32.gmra.mrb[54].mxu1 %v256_v23  ;;  %v427_v23 = vld [vmem:[%s6955_s0 + $0xd00] sm:$0xff] }
 0x1bc   :  { %2518 = vmatmul.mubr.f32.gmra.mrb[120].mxu0 %v557_v62  ;;  %1557 = vmatprep.mubr.f32.mxu1 %v266_v25  ;;  %v127_v62 = vld [vmem:[%s6955_s0 + $0x3a0] sm:$0xff]  ;;  %v437_v25 = vld [vmem:[%s6955_s0 + $0xd50] sm:$0xff] }
 0x1bd   :  { %2522 = vmatprep.mubr.f32.mxu0 %v567_v26  ;;  %v436_v26 = vld [vmem:[%s6955_s0 + $0xd48] sm:$0xff] }
 0x1bf   :  { %1558 = vmatmul.mubr.f32.gmra.mrb[56].mxu1 %v265_v28  ;;  %v136_v28 = vld [vmem:[%s6955_s0 + $0x3e8] sm:$0xff] }
 0x1c0   :  { %2523 = vmatmul.mubr.f32.gmra.mrb[122].mxu0 %v566_v5  ;;  %1562 = vmatprep.mubr.f32.mxu1 %v275_v29  ;;  %v446_v5 = vld [vmem:[%s6955_s0 + $0xd98] sm:$0xff]  ;;  %v445_v29 = vld [vmem:[%s6955_s0 + $0xd90] sm:$0xff] }
 0x1c1   :  { %2527 = vmatprep.mubr.f32.mxu0 %v576_v31  ;;  %v145_v31 = vld [vmem:[%s6955_s0 + $0x430] sm:$0xff] }
 0x1c3   :  { %1563 = vmatmul.mubr.f32.gmra.mrb[58].mxu1 %v274_v32  ;;  %v455_v32 = vld [vmem:[%s6955_s0 + $0xde0] sm:$0xff] }
 0x1c4   :  { %2528 = vmatmul.mubr.f32.gmra.mrb[124].mxu0 %v575_v13  ;;  %1567 = vmatprep.mubr.f32.mxu1 %v284_v33  ;;  %v454_v13 = vld [vmem:[%s6955_s0 + $0xdd8] sm:$0xff] }
 0x1c5   :  { %2532 = vmatprep.mubr.f32.mxu0 %v585_v35  ;;  %v154_v33 = vld [vmem:[%s6955_s0 + $0x478] sm:$0xff]  ;;  %v464_v35 = vld [vmem:[%s6955_s0 + $0xe28] sm:$0xff] }
 0x1c7   :  { %1568 = vmatmul.mubr.f32.gmra.mrb[60].mxu1 %v283_v37  ;;  %v463_v37 = vld [vmem:[%s6955_s0 + $0xe20] sm:$0xff] }
 0x1c8   :  { %2533 = vmatmul.mubr.f32.gmra.mrb[126].mxu0 %v584_v20  ;;  %1572 = vmatprep.mubr.f32.mxu1 %v293_v38  ;;  %v163_v20 = vld [vmem:[%s6955_s0 + $0x4c0] sm:$0xff]  ;;  %v473_v38 = vld [vmem:[%s6955_s0 + $0xe70] sm:$0xff] }
 0x1c9   :  { %2537 = vmatprep.mubr.f32.mxu0 %v594_v39  ;;  %v472_v39 = vld [vmem:[%s6955_s0 + $0xe68] sm:$0xff] }
 0x1cb   :  { %1573 = vmatmul.mubr.f32.gmra.mrb[62].mxu1 %v292_v40  ;;  %v172_v40 = vld [vmem:[%s6955_s0 + $0x508] sm:$0xff] }
 0x1cc   :  { %2538 = vmatmul.mubr.f32.gmra.mrb[128].mxu0 %v593_v27  ;;  %1577 = vmatprep.mubr.f32.mxu1 %v302_v42  ;;  %v482_v27 = vld [vmem:[%s6955_s0 + $0xeb8] sm:$0xff]  ;;  %v481_v42 = vld [vmem:[%s6955_s0 + $0xeb0] sm:$0xff] }
 0x1cd   :  { %2542 = vmatprep.mubr.f32.mxu0 %v603_v43  ;;  %v181_v43 = vld [vmem:[%s6955_s0 + $0x550] sm:$0xff] }
 0x1cf   :  { %1578 = vmatmul.mubr.f32.gmra.mrb[64].mxu1 %v301_v45  ;;  %v491_v45 = vld [vmem:[%s6955_s0 + $0xf00] sm:$0xff] }
 0x1d0   :  { %2543 = vmatmul.mubr.f32.gmra.mrb[130].mxu0 %v602_v34  ;;  %1582 = vmatprep.mubr.f32.mxu1 %v311_v0  ;;  %v490_v34 = vld [vmem:[%s6955_s0 + $0xef8] sm:$0xff] }
 0x1d1   :  { %2547 = vmatprep.mubr.f32.mxu0 %v612_v46  ;;  %v190_v0 = vld [vmem:[%s6955_s0 + $0x598] sm:$0xff]  ;;  %v500_v46 = vld [vmem:[%s6955_s0 + $0xf48] sm:$0xff] }
 0x1d3   :  { %1583 = vmatmul.mubr.f32.gmra.mrb[66].mxu1 %v310_v47 }
 0x1d4   :  { %2548 = vmatmul.mubr.f32.gmra.mrb[132].mxu0 %v611_v41  ;;  %1587 = vmatprep.mubr.f32.mxu1 %v320_v48  ;;  %v499_v48 = vld [vmem:[%s6955_s0 + $0xf40] sm:$0xff] }
 0x1d5   :  { %3174 = vmatprep.mubr.msk.f32.mxu0 %vm4079_vm1, %v4078_v57 }
 0x1d7   :  { %1588 = vmatmul.mubr.f32.gmra.mrb[68].mxu1 %v319_v8  ;;  %v199_v8 = vld [vmem:[%s6955_s0 + $0x5e0] sm:$0xff] }
 0x1d8   :  { %3175 = vmatmul.mubr.msk.f32.vlgmr.msra.gmra.mrb[0].mxu0 %vm747_vm2, %v19_v49  ;;  %1592 = vmatprep.mubr.f32.mxu1 %v329_v51  ;;  %v509_v49 = vld [vmem:[%s6955_s0 + $0xf90] sm:$0xff] }
 0x1d9   :  { %3177 = vmatprep.mubr.msk.f32.mxu0 %vm4079_vm1, %v4078_v57 }
 0x1db   :  { %1593 = vmatmul.mubr.f32.gmra.mrb[70].mxu1 %v328_v52 }
 0x1dc   :  { %3178 = vmatmul.mubr.msk.f32.gmra.mrb[2].mxu0 %vm747_vm2, %v28_v53  ;;  %1597 = vmatprep.mubr.f32.mxu1 %v338_v12  ;;  %v508_v53 = vld [vmem:[%s6955_s0 + $0xf88] sm:$0xff] }
 0x1dd   :  { %3180 = vmatprep.mubr.msk.f32.mxu0 %vm4079_vm1, %v4078_v57  ;;  %v208_v12 = vld [vmem:[%s6955_s0 + $0x628] sm:$0xff] }
 0x1df   :  { %1598 = vmatmul.mubr.f32.gmra.mrb[72].mxu1 %v337_v54  ;;  %v518_v54 = vld [vmem:[%s6955_s0 + $0xfd8] sm:$0xff] }
 0x1e0   :  { %3181 = vmatmul.mubr.msk.f32.gmra.mrb[4].mxu0 %vm747_vm2, %v37_v55  ;;  %1602 = vmatprep.mubr.f32.mxu1 %v347_v58 }
 0x1e1   :  { %3183 = vmatprep.mubr.msk.f32.mxu0 %vm4079_vm1, %v4078_v57 }
 0x1e3   :  { %1603 = vmatmul.mubr.f32.gmra.mrb[74].mxu1 %v346_v18  ;;  %v517_v18 = vld [vmem:[%s6955_s0 + $0xfd0] sm:$0xff] }
 0x1e4   :  { %3184 = vmatmul.mubr.msk.f32.gmra.mrb[6].mxu0 %vm747_vm2, %v46_v59  ;;  %1607 = vmatprep.mubr.f32.mxu1 %v356_v60  ;;  %v217_v59 = vld [vmem:[%s6955_s0 + $0x670] sm:$0xff]  ;;  %v527_v60 = vld [vmem:[%s6955_s0 + $0x1020] sm:$0xff] }
 0x1e5   :  { %3186 = vmatprep.mubr.msk.f32.mxu0 %vm4079_vm1, %v4078_v57 }
 0x1e7   :  { %1608 = vmatmul.mubr.f32.gmra.mrb[76].mxu1 %v355_v61 }
 0x1e8   :  { %3187 = vmatmul.mubr.msk.f32.gmra.mrb[8].mxu0 %vm747_vm2, %v55_v24  ;;  %1612 = vmatprep.mubr.f32.mxu1 %v365_v63  ;;  %v526_v63 = vld [vmem:[%s6955_s0 + $0x1018] sm:$0xff] }
 0x1e9   :  { %3189 = vmatprep.mubr.msk.f32.mxu0 %vm4079_vm1, %v4078_v57 }
 0x1eb   :  { %1613 = vmatmul.mubr.f32.gmra.mrb[78].mxu1 %v364_v1  ;;  %v226_v1 = vld [vmem:[%s6955_s0 + $0x6b8] sm:$0xff] }
 0x1ec   :  { %3190 = vmatmul.mubr.msk.f32.gmra.mrb[10].mxu0 %vm747_vm2, %v64_v2  ;;  %1617 = vmatprep.mubr.f32.mxu1 %v374_v30  ;;  %v536_v2 = vld [vmem:[%s6955_s0 + $0x1068] sm:$0xff] }
 0x1ed   :  { %3192 = vmatprep.mubr.msk.f32.mxu0 %vm4079_vm1, %v4078_v57 }
 0x1ef   :  { %1618 = vmatmul.mubr.f32.gmra.mrb[80].mxu1 %v373_v3 }
 0x1f0   :  { %3193 = vmatmul.mubr.msk.f32.gmra.mrb[12].mxu0 %vm747_vm2, %v73_v4  ;;  %1622 = vmatprep.mubr.f32.mxu1 %v383_v6  ;;  %v535_v4 = vld [vmem:[%s6955_s0 + $0x1060] sm:$0xff] }
 0x1f1   :  { %3195 = vmatprep.mubr.msk.f32.mxu0 %vm4079_vm1, %v4078_v57  ;;  %v235_v6 = vld [vmem:[%s6955_s0 + $0x700] sm:$0xff] }
 0x1f3   :  { %1623 = vmatmul.mubr.f32.gmra.mrb[82].mxu1 %v382_v36  ;;  %v545_v36 = vld [vmem:[%s6955_s0 + $0x10b0] sm:$0xff] }
 0x1f4   :  { %3196 = vmatmul.mubr.msk.f32.gmra.mrb[14].mxu0 %vm747_vm2, %v82_v7  ;;  %1627 = vmatprep.mubr.f32.mxu1 %v392_v9 }
 0x1f5   :  { %3198 = vmatprep.mubr.msk.f32.mxu0 %vm4079_vm1, %v4078_v57 }
 0x1f7   :  { %1628 = vmatmul.mubr.f32.gmra.mrb[84].mxu1 %v391_v10  ;;  %v544_v10 = vld [vmem:[%s6955_s0 + $0x10a8] sm:$0xff] }
 0x1f8   :  { %3199 = vmatmul.mubr.msk.f32.gmra.mrb[16].mxu0 %vm747_vm2, %v91_v44  ;;  %1632 = vmatprep.mubr.f32.mxu1 %v401_v11  ;;  %v244_v44 = vld [vmem:[%s6955_s0 + $0x748] sm:$0xff]  ;;  %v554_v11 = vld [vmem:[%s6955_s0 + $0x10f8] sm:$0xff] }
 0x1f9   :  { %3201 = vmatprep.mubr.msk.f32.mxu0 %vm4079_vm1, %v4078_v57 }
 0x1fb   :  { %1633 = vmatmul.mubr.f32.gmra.mrb[86].mxu1 %v400_v14 }
 0x1fc   :  { %3202 = vmatmul.mubr.msk.f32.gmra.mrb[18].mxu0 %vm747_vm2, %v100_v15  ;;  %1637 = vmatprep.mubr.f32.mxu1 %v410_v50  ;;  %v553_v50 = vld [vmem:[%s6955_s0 + $0x10f0] sm:$0xff] }
 0x1fd   :  { %3204 = vmatprep.mubr.msk.f32.mxu0 %vm4079_vm1, %v4078_v57 }
 0x1ff   :  { %1638 = vmatmul.mubr.f32.gmra.mrb[88].mxu1 %v409_v16  ;;  %v253_v16 = vld [vmem:[%s6955_s0 + $0x790] sm:$0xff] }
 0x200   :  { %3205 = vmatmul.mubr.msk.f32.gmra.mrb[20].mxu0 %vm747_vm2, %v109_v17  ;;  %1642 = vmatprep.mubr.f32.mxu1 %v419_v19  ;;  %v563_v17 = vld [vmem:[%s6955_s0 + $0x1140] sm:$0xff] }
 0x201   :  { %3207 = vmatprep.mubr.msk.f32.mxu0 %vm4079_vm1, %v4078_v57 }
 0x203   :  { %1643 = vmatmul.mubr.f32.gmra.mrb[90].mxu1 %v418_v56 }
 0x204   :  { %3208 = vmatmul.mubr.msk.f32.gmra.mrb[22].mxu0 %vm747_vm2, %v118_v21  ;;  %1647 = vmatprep.mubr.f32.mxu1 %v428_v22  ;;  %v562_v21 = vld [vmem:[%s6955_s0 + $0x1138] sm:$0xff] }
 0x205   :  { %3210 = vmatprep.mubr.msk.f32.mxu0 %vm4079_vm1, %v4078_v57  ;;  %v262_v22 = vld [vmem:[%s6955_s0 + $0x7d8] sm:$0xff] }
 0x207   :  { %1648 = vmatmul.mubr.f32.gmra.mrb[92].mxu1 %v427_v23  ;;  %v572_v23 = vld [vmem:[%s6955_s0 + $0x1188] sm:$0xff] }
 0x208   :  { %3211 = vmatmul.mubr.msk.f32.gmra.mrb[24].mxu0 %vm747_vm2, %v127_v62  ;;  %1652 = vmatprep.mubr.f32.mxu1 %v437_v25 }
 0x209   :  { %3213 = vmatprep.mubr.msk.f32.mxu0 %vm4079_vm1, %v4078_v57 }
 0x20b   :  { %1653 = vmatmul.mubr.f32.gmra.mrb[94].mxu1 %v436_v26  ;;  %v571_v26 = vld [vmem:[%s6955_s0 + $0x1180] sm:$0xff] }
 0x20c   :  { %3214 = vmatmul.mubr.msk.f32.gmra.mrb[26].mxu0 %vm747_vm2, %v136_v28  ;;  %1657 = vmatprep.mubr.f32.mxu1 %v446_v5  ;;  %v271_v28 = vld [vmem:[%s6955_s0 + $0x820] sm:$0xff]  ;;  %v581_v5 = vld [vmem:[%s6955_s0 + $0x11d0] sm:$0xff] }
 0x20d   :  { %3216 = vmatprep.mubr.msk.f32.mxu0 %vm4079_vm1, %v4078_v57 }
 0x20f   :  { %1658 = vmatmul.mubr.f32.gmra.mrb[96].mxu1 %v445_v29 }
 0x210   :  { %3217 = vmatmul.mubr.msk.f32.gmra.mrb[28].mxu0 %vm747_vm2, %v145_v31  ;;  %1662 = vmatprep.mubr.f32.mxu1 %v455_v32  ;;  %v580_v32 = vld [vmem:[%s6955_s0 + $0x11c8] sm:$0xff] }
 0x211   :  { %3219 = vmatprep.mubr.msk.f32.mxu0 %vm4079_vm1, %v4078_v57 }
 0x213   :  { %1663 = vmatmul.mubr.f32.gmra.mrb[98].mxu1 %v454_v13  ;;  %v280_v13 = vld [vmem:[%s6955_s0 + $0x868] sm:$0xff] }
 0x214   :  { %3220 = vmatmul.mubr.msk.f32.gmra.mrb[30].mxu0 %vm747_vm2, %v154_v33  ;;  %1667 = vmatprep.mubr.f32.mxu1 %v464_v35  ;;  %v590_v33 = vld [vmem:[%s6955_s0 + $0x1218] sm:$0xff] }
 0x215   :  { %3222 = vmatprep.mubr.msk.f32.mxu0 %vm4079_vm1, %v4078_v57 }
 0x217   :  { %1668 = vmatmul.mubr.f32.gmra.mrb[100].mxu1 %v463_v37 }
 0x218   :  { %3223 = vmatmul.mubr.msk.f32.gmra.mrb[32].mxu0 %vm747_vm2, %v163_v20  ;;  %1672 = vmatprep.mubr.f32.mxu1 %v473_v38  ;;  %v589_v20 = vld [vmem:[%s6955_s0 + $0x1210] sm:$0xff] }
 0x219   :  { %3225 = vmatprep.mubr.msk.f32.mxu0 %vm4079_vm1, %v4078_v57  ;;  %v289_v38 = vld [vmem:[%s6955_s0 + $0x8b0] sm:$0xff] }
 0x21b   :  { %1673 = vmatmul.mubr.f32.gmra.mrb[102].mxu1 %v472_v39  ;;  %v599_v39 = vld [vmem:[%s6955_s0 + $0x1260] sm:$0xff] }
 0x21c   :  { %3226 = vmatmul.mubr.msk.f32.gmra.mrb[34].mxu0 %vm747_vm2, %v172_v40  ;;  %1677 = vmatprep.mubr.f32.mxu1 %v482_v27 }
 0x21d   :  { %3228 = vmatprep.mubr.msk.f32.mxu0 %vm4079_vm1, %v4078_v57 }
 0x21f   :  { %1678 = vmatmul.mubr.f32.gmra.mrb[104].mxu1 %v481_v42  ;;  %v598_v42 = vld [vmem:[%s6955_s0 + $0x1258] sm:$0xff] }
 0x220   :  { %3229 = vmatmul.mubr.msk.f32.gmra.mrb[36].mxu0 %vm747_vm2, %v181_v43  ;;  %1682 = vmatprep.mubr.f32.mxu1 %v491_v45  ;;  %v298_v43 = vld [vmem:[%s6955_s0 + $0x8f8] sm:$0xff]  ;;  %v608_v45 = vld [vmem:[%s6955_s0 + $0x12a8] sm:$0x1] }
 0x221   :  { %3231 = vmatprep.mubr.msk.f32.mxu0 %vm4079_vm1, %v4078_v57 }
 0x222   :  { %v6095_v47 = vpop.f32.mrb[0].mxu1 }
 0x223   :  { %v1421_v41 = vpop.f32.mrb[1].mxu1  ;;  %1683 = vmatmul.mubr.f32.gmra.mrb[106].mxu1 %v490_v34 }
 0x224   :  { %3232 = vmatmul.mubr.msk.f32.gmra.mrb[38].mxu0 %vm747_vm2, %v190_v0  ;;  %1687 = vmatprep.mubr.f32.mxu1 %v500_v46  ;;  %v607_v46 = vld [vmem:[%s6955_s0 + $0x12a0] sm:$0x1] }
 0x225   :  { %3234 = vmatprep.mubr.msk.f32.mxu0 %vm4079_vm1, %v4078_v57  ;;  %v307_v41 = vld [vmem:[%s6955_s0 + $0x940] sm:$0xff] }
 0x226   :  { %v6109_v51 = vpop.f32.mrb[2].mxu1 }
 0x227   :  { %v1426_v52 = vpop.f32.mrb[3].mxu1  ;;  %1688 = vmatmul.mubr.f32.gmra.mrb[108].mxu1 %v499_v48  ;;  %v322_v48 = vld [vmem:[%s6955_s0 + $0x9b8] sm:$0xff] }
 0x228   :  { %3235 = vmatmul.mubr.msk.f32.gmra.mrb[40].mxu0 %vm747_vm2, %v199_v8  ;;  %1692 = vmatprep.mubr.f32.mxu1 %v509_v49  ;;  %v321_v52 = vld [vmem:[%s6955_s0 + $0x9b0] sm:$0xff] }
 0x229   :  { %3237 = vmatprep.mubr.msk.f32.mxu0 %vm4079_vm1, %v4078_v57 }
 0x22a   :  { %v6123_v55 = vpop.f32.mrb[4].mxu1 }
 0x22b   :  { %v1431_v58 = vpop.f32.mrb[5].mxu1  ;;  %1693 = vmatmul.mubr.f32.gmra.mrb[110].mxu1 %v508_v53  ;;  %v316_v53 = vld [vmem:[%s6955_s0 + $0x988] sm:$0xff] }
 0x22c   :  { %3238 = vmatmul.mubr.msk.f32.gmra.mrb[42].mxu0 %vm747_vm2, %v208_v12  ;;  %1697 = vmatprep.mubr.f32.mxu1 %v518_v54  ;;  %v331_v12 = vld [vmem:[%s6955_s0 + $0xa00] sm:$0xff] }
 0x22d   :  { %3240 = vmatprep.mubr.msk.f32.mxu0 %vm4079_vm1, %v4078_v57 }
 0x22e   :  { %v6137_v61 = vpop.f32.mrb[6].mxu1 }
 0x22f   :  { %v1436_v24 = vpop.f32.mrb[7].mxu1  ;;  %1698 = vmatmul.mubr.f32.gmra.mrb[112].mxu1 %v517_v18  ;;  %v330_v18 = vld [vmem:[%s6955_s0 + $0x9f8] sm:$0xff] }
 0x230   :  { %3241 = vmatmul.mubr.msk.f32.gmra.mrb[44].mxu0 %vm747_vm2, %v217_v59  ;;  %1702 = vmatprep.mubr.f32.mxu1 %v527_v60  ;;  %v325_v59 = vld [vmem:[%s6955_s0 + $0x9d0] sm:$0xff]  ;;  %v340_v60 = vld [vmem:[%s6955_s0 + $0xa48] sm:$0xff] }
 0x231   :  { %3243 = vmatprep.mubr.msk.f32.mxu0 %vm4079_vm1, %v4078_v57 }
 0x232   :  { %v6151_v30 = vpop.f32.mrb[8].mxu1 }
 0x233   :  { %v1441_v3 = vpop.f32.mrb[9].mxu1  ;;  %1703 = vmatmul.mubr.f32.gmra.mrb[114].mxu1 %v526_v63 }
 0x234   :  { %3244 = vmatmul.mubr.msk.f32.gmra.mrb[46].mxu0 %vm747_vm2, %v226_v1  ;;  %1707 = vmatprep.mubr.f32.mxu1 %v536_v2  ;;  %v339_v1 = vld [vmem:[%s6955_s0 + $0xa40] sm:$0xff]  ;;  %v334_v2 = vld [vmem:[%s6955_s0 + $0xa18] sm:$0xff]  ;;  %v349_v3 = vld [vmem:[%s6955_s0 + $0xa90] sm:$0xff] }
 0x235   :  { %3246 = vmatprep.mubr.msk.f32.mxu0 %vm4079_vm1, %v4078_v57 }
 0x236   :  { %v6165_v7 = vpop.f32.mrb[10].mxu1 }
 0x237   :  { %v1446_v9 = vpop.f32.mrb[11].mxu1  ;;  %1708 = vmatmul.mubr.f32.gmra.mrb[116].mxu1 %v535_v4 }
 0x238   :  { %3247 = vmatmul.mubr.msk.f32.gmra.mrb[48].mxu0 %vm747_vm2, %v235_v6  ;;  %1712 = vmatprep.mubr.f32.mxu1 %v545_v36  ;;  %v348_v36 = vld [vmem:[%s6955_s0 + $0xa88] sm:$0xff]  ;;  %v343_v9 = vld [vmem:[%s6955_s0 + $0xa60] sm:$0xff] }
 0x239   :  { %3249 = vmatprep.mubr.msk.f32.mxu0 %vm4079_vm1, %v4078_v57 }
 0x23a   :  { %v6179_v14 = vpop.f32.mrb[12].mxu1 }
 0x23b   :  { %v1451_v15 = vpop.f32.mrb[13].mxu1  ;;  %1713 = vmatmul.mubr.f32.gmra.mrb[118].mxu1 %v544_v10  ;;  %v358_v10 = vld [vmem:[%s6955_s0 + $0xad8] sm:$0xff] }
 0x23c   :  { %3250 = vmatmul.mubr.msk.f32.gmra.mrb[50].mxu0 %vm747_vm2, %v244_v44  ;;  %1717 = vmatprep.mubr.f32.mxu1 %v554_v11  ;;  %v357_v15 = vld [vmem:[%s6955_s0 + $0xad0] sm:$0xff] }
 0x23d   :  { %3252 = vmatprep.mubr.msk.f32.mxu0 %vm4079_vm1, %v4078_v57 }
 0x23e   :  { %v6193_v19 = vpop.f32.mrb[14].mxu1 }
 0x23f   :  { %v1456_v56 = vpop.f32.mrb[15].mxu1  ;;  %1718 = vmatmul.mubr.f32.gmra.mrb[120].mxu1 %v553_v50  ;;  %v352_v50 = vld [vmem:[%s6955_s0 + $0xaa8] sm:$0xff] }
 0x240   :  { %3253 = vmatmul.mubr.msk.f32.gmra.mrb[52].mxu0 %vm747_vm2, %v253_v16  ;;  %1722 = vmatprep.mubr.f32.mxu1 %v563_v17  ;;  %v367_v16 = vld [vmem:[%s6955_s0 + $0xb20] sm:$0xff] }
 0x241   :  { %3255 = vmatprep.mubr.msk.f32.mxu0 %vm4079_vm1, %v4078_v57 }
 0x242   :  { %v6207_v62 = vpop.f32.mrb[16].mxu1 }
 0x243   :  { %v1461_v25 = vpop.f32.mrb[17].mxu1  ;;  %1723 = vmatmul.mubr.f32.gmra.mrb[122].mxu1 %v562_v21  ;;  %v366_v21 = vld [vmem:[%s6955_s0 + $0xb18] sm:$0xff] }
 0x244   :  { %3256 = vmatmul.mubr.msk.f32.gmra.mrb[54].mxu0 %vm747_vm2, %v262_v22  ;;  %1727 = vmatprep.mubr.f32.mxu1 %v572_v23  ;;  %v361_v22 = vld [vmem:[%s6955_s0 + $0xaf0] sm:$0xff]  ;;  %v376_v23 = vld [vmem:[%s6955_s0 + $0xb68] sm:$0xff] }
 0x245   :  { %3258 = vmatprep.mubr.msk.f32.mxu0 %vm4079_vm1, %v4078_v57 }
 0x246   :  { %v6221_v29 = vpop.f32.mrb[18].mxu1 }
 0x247   :  { %v1466_v31 = vpop.f32.mrb[19].mxu1  ;;  %1728 = vmatmul.mubr.f32.gmra.mrb[124].mxu1 %v571_v26 }
 0x248   :  { %3259 = vmatmul.mubr.msk.f32.gmra.mrb[56].mxu0 %vm747_vm2, %v271_v28  ;;  %1732 = vmatprep.mubr.f32.mxu1 %v581_v5  ;;  %v375_v28 = vld [vmem:[%s6955_s0 + $0xb60] sm:$0xff]  ;;  %v370_v5 = vld [vmem:[%s6955_s0 + $0xb38] sm:$0xff]  ;;  %v385_v31 = vld [vmem:[%s6955_s0 + $0xbb0] sm:$0xff] }
 0x249   :  { %3261 = vmatprep.mubr.msk.f32.mxu0 %vm4079_vm1, %v4078_v57 }
 0x24a   :  { %v6235_v35 = vpop.f32.mrb[20].mxu1 }
 0x24b   :  { %v1471_v37 = vpop.f32.mrb[21].mxu1  ;;  %1733 = vmatmul.mubr.f32.gmra.mrb[126].mxu1 %v580_v32 }
 0x24c   :  { %3262 = vmatmul.mubr.msk.f32.gmra.mrb[58].mxu0 %vm747_vm2, %v280_v13  ;;  %1737 = vmatprep.mubr.f32.mxu1 %v590_v33  ;;  %v384_v33 = vld [vmem:[%s6955_s0 + $0xba8] sm:$0xff]  ;;  %v379_v37 = vld [vmem:[%s6955_s0 + $0xb80] sm:$0xff] }
 0x24d   :  { %3264 = vmatprep.mubr.msk.f32.mxu0 %vm4079_vm1, %v4078_v57 }
 0x24e   :  { %v6249_v40 = vpop.f32.mrb[22].mxu1 }
 0x24f   :  { %v1476_v27 = vpop.f32.mrb[23].mxu1  ;;  %1738 = vmatmul.mubr.f32.gmra.mrb[128].mxu1 %v589_v20  ;;  %v394_v20 = vld [vmem:[%s6955_s0 + $0xbf8] sm:$0xff] }
 0x250   :  { %3265 = vmatmul.mubr.msk.f32.gmra.mrb[60].mxu0 %vm747_vm2, %v289_v38  ;;  %1742 = vmatprep.mubr.f32.mxu1 %v599_v39  ;;  %v393_v27 = vld [vmem:[%s6955_s0 + $0xbf0] sm:$0xff] }
 0x251   :  { %3267 = vmatprep.mubr.msk.f32.mxu0 %vm4079_vm1, %v4078_v57 }
 0x252   :  { %v6263_v34 = vpop.f32.mrb[24].mxu1 }
 0x253   :  { %v1481_v0 = vpop.f32.mrb[25].mxu1  ;;  %1743 = vmatmul.mubr.f32.gmra.mrb[130].mxu1 %v598_v42  ;;  %v388_v42 = vld [vmem:[%s6955_s0 + $0xbc8] sm:$0xff] }
 0x254   :  { %3268 = vmatmul.mubr.msk.f32.gmra.mrb[62].mxu0 %vm747_vm2, %v298_v43  ;;  %1747 = vmatprep.mubr.f32.mxu1 %v608_v45  ;;  %v403_v43 = vld [vmem:[%s6955_s0 + $0xc40] sm:$0xff] }
 0x255   :  { %3270 = vmatprep.mubr.msk.f32.mxu0 %vm4079_vm1, %v4078_v57 }
 0x256   :  { %v6277_v8 = vpop.f32.mrb[26].mxu1 }
 0x257   :  { %v1486_v49 = vpop.f32.mrb[27].mxu1  ;;  %1748 = vmatmul.mubr.f32.gmra.mrb[132].mxu1 %v607_v46  ;;  %v402_v46 = vld [vmem:[%s6955_s0 + $0xc38] sm:$0xff] }
 0x258   :  { %3271 = vmatmul.mubr.msk.f32.gmra.mrb[64].mxu0 %vm747_vm2, %v307_v41  ;;  %1987 = vmatprep.mubr.f32.mxu1 %v322_v48  ;;  %v397_v41 = vld [vmem:[%s6955_s0 + $0xc10] sm:$0xff]  ;;  %v412_v48 = vld [vmem:[%s6955_s0 + $0xc88] sm:$0xff] }
 0x259   :  { %3273 = vmatprep.mubr.msk.f32.mxu0 %vm4079_vm1, %v4078_v57 }
 0x25a   :  { %v6291_v54 = vpop.f32.mrb[28].mxu1 }
 0x25b   :  { %v1491_v58 = vpop.f32.mrb[29].mxu1  ;;  %1988 = vmatmul.mubr.f32.vlgmr.msra.gmra.mrb[68].mxu1 %v321_v52 }
 0x25c   :  { %3274 = vmatmul.mubr.msk.f32.gmra.mrb[66].mxu0 %vm747_vm2, %v316_v53  ;;  %1992 = vmatprep.mubr.f32.mxu1 %v331_v12  ;;  %v411_v53 = vld [vmem:[%s6955_s0 + $0xc80] sm:$0xff]  ;;  %v406_v12 = vld [vmem:[%s6955_s0 + $0xc58] sm:$0xff]  ;;  %v421_v58 = vld [vmem:[%s6955_s0 + $0xcd0] sm:$0xff] }
 0x25d   :  { %3276 = vmatprep.mubr.msk.f32.mxu0 %vm4079_vm1, %v4078_v57 }
 0x25e   :  { %v6305_v24 = vpop.f32.mrb[30].mxu1 }
 0x25f   :  { %v1496_v63 = vpop.f32.mrb[31].mxu1  ;;  %1993 = vmatmul.mubr.f32.gmra.mrb[70].mxu1 %v330_v18 }
 0x260   :  { %3277 = vmatmul.mubr.msk.f32.gmra.mrb[68].mxu0 %vm747_vm2, %v325_v59  ;;  %1997 = vmatprep.mubr.f32.mxu1 %v340_v60  ;;  %v420_v60 = vld [vmem:[%s6955_s0 + $0xcc8] sm:$0xff]  ;;  %v415_v63 = vld [vmem:[%s6955_s0 + $0xca0] sm:$0xff] }
 0x261   :  { %3279 = vmatprep.mubr.msk.f32.mxu0 %vm4079_vm1, %v4078_v57 }
 0x262   :  { %v6319_v4 = vpop.f32.mrb[32].mxu1 }
 0x263   :  { %v1501_v6 = vpop.f32.mrb[33].mxu1  ;;  %1998 = vmatmul.mubr.f32.gmra.mrb[72].mxu1 %v339_v1  ;;  %v430_v1 = vld [vmem:[%s6955_s0 + $0xd18] sm:$0xff] }
 0x264   :  { %3280 = vmatmul.mubr.msk.f32.gmra.mrb[70].mxu0 %vm747_vm2, %v334_v2  ;;  %2002 = vmatprep.mubr.f32.mxu1 %v349_v3  ;;  %v429_v6 = vld [vmem:[%s6955_s0 + $0xd10] sm:$0xff] }
 0x265   :  { %3282 = vmatprep.mubr.msk.f32.mxu0 %vm4079_vm1, %v4078_v57 }
 0x266   :  { %v6333_v44 = vpop.f32.mrb[34].mxu1 }
 0x267   :  { %v1506_v11 = vpop.f32.mrb[35].mxu1  ;;  %2003 = vmatmul.mubr.f32.gmra.mrb[74].mxu1 %v348_v36  ;;  %v424_v36 = vld [vmem:[%s6955_s0 + $0xce8] sm:$0xff] }
 0x268   :  { %3283 = vmatmul.mubr.msk.f32.gmra.mrb[72].mxu0 %vm747_vm2, %v343_v9  ;;  %2007 = vmatprep.mubr.f32.mxu1 %v358_v10  ;;  %v439_v9 = vld [vmem:[%s6955_s0 + $0xd60] sm:$0xff] }
 0x269   :  { %3285 = vmatprep.mubr.msk.f32.mxu0 %vm4079_vm1, %v4078_v57 }
 0x26a   :  { %v6347_v17 = vpop.f32.mrb[36].mxu1 }
 0x26b   :  { %v1511_v56 = vpop.f32.mrb[37].mxu1  ;;  %2008 = vmatmul.mubr.f32.gmra.mrb[76].mxu1 %v357_v15  ;;  %v438_v15 = vld [vmem:[%s6955_s0 + $0xd58] sm:$0xff] }
 0x26c   :  { %3286 = vmatmul.mubr.msk.f32.gmra.mrb[74].mxu0 %vm747_vm2, %v352_v50  ;;  %2012 = vmatprep.mubr.f32.mxu1 %v367_v16  ;;  %v433_v50 = vld [vmem:[%s6955_s0 + $0xd30] sm:$0xff]  ;;  %v448_v16 = vld [vmem:[%s6955_s0 + $0xda8] sm:$0xff] }
 0x26d   :  { %3288 = vmatprep.mubr.msk.f32.mxu0 %vm4079_vm1, %v4078_v57 }
 0x26e   :  { %v6361_v25 = vpop.f32.mrb[38].mxu1 }
 0x26f   :  { %v1516_v26 = vpop.f32.mrb[39].mxu1  ;;  %2013 = vmatmul.mubr.f32.gmra.mrb[78].mxu1 %v366_v21 }
 0x270   :  { %3289 = vmatmul.mubr.msk.f32.gmra.mrb[76].mxu0 %vm747_vm2, %v361_v22  ;;  %2017 = vmatprep.mubr.f32.mxu1 %v376_v23  ;;  %v447_v22 = vld [vmem:[%s6955_s0 + $0xda0] sm:$0xff]  ;;  %v442_v23 = vld [vmem:[%s6955_s0 + $0xd78] sm:$0xff]  ;;  %v457_v26 = vld [vmem:[%s6955_s0 + $0xdf0] sm:$0xff] }
 0x271   :  { %3291 = vmatprep.mubr.msk.f32.mxu0 %vm4079_vm1, %v4078_v57 }
 0x272   :  { %v6375_v32 = vpop.f32.mrb[40].mxu1 }
 0x273   :  { %v1521_v13 = vpop.f32.mrb[41].mxu1  ;;  %2018 = vmatmul.mubr.f32.gmra.mrb[80].mxu1 %v375_v28 }
 0x274   :  { %3292 = vmatmul.mubr.msk.f32.gmra.mrb[78].mxu0 %vm747_vm2, %v370_v5  ;;  %2022 = vmatprep.mubr.f32.mxu1 %v385_v31  ;;  %v456_v31 = vld [vmem:[%s6955_s0 + $0xde8] sm:$0xff]  ;;  %v451_v13 = vld [vmem:[%s6955_s0 + $0xdc0] sm:$0xff] }
 0x275   :  { %3294 = vmatprep.mubr.msk.f32.mxu0 %vm4079_vm1, %v4078_v57 }
 0x276   :  { %v6389_v38 = vpop.f32.mrb[42].mxu1 }
 0x277   :  { %v1526_v39 = vpop.f32.mrb[43].mxu1  ;;  %2023 = vmatmul.mubr.f32.gmra.mrb[82].mxu1 %v384_v33  ;;  %v466_v33 = vld [vmem:[%s6955_s0 + $0xe38] sm:$0xff] }
 0x278   :  { %3295 = vmatmul.mubr.msk.f32.gmra.mrb[80].mxu0 %vm747_vm2, %v379_v37  ;;  %2027 = vmatprep.mubr.f32.mxu1 %v394_v20  ;;  %v465_v39 = vld [vmem:[%s6955_s0 + $0xe30] sm:$0xff] }
 0x279   :  { %3297 = vmatprep.mubr.msk.f32.mxu0 %vm4079_vm1, %v4078_v57 }
 0x27a   :  { %v6403_v45 = vpop.f32.mrb[44].mxu1 }
 0x27b   :  { %v1531_v0 = vpop.f32.mrb[45].mxu1  ;;  %2028 = vmatmul.mubr.f32.gmra.mrb[84].mxu1 %v393_v27  ;;  %v460_v27 = vld [vmem:[%s6955_s0 + $0xe08] sm:$0xff] }
 0x27c   :  { %3298 = vmatmul.mubr.msk.f32.gmra.mrb[82].mxu0 %vm747_vm2, %v388_v42  ;;  %2032 = vmatprep.mubr.f32.mxu1 %v403_v43  ;;  %v475_v42 = vld [vmem:[%s6955_s0 + $0xe80] sm:$0xff] }
 0x27d   :  { %3300 = vmatprep.mubr.msk.f32.mxu0 %vm4079_vm1, %v4078_v57 }
 0x27e   :  { %v6417_v49 = vpop.f32.mrb[46].mxu1 }
 0x27f   :  { %v1536_v52 = vpop.f32.mrb[47].mxu1  ;;  %2033 = vmatmul.mubr.f32.gmra.mrb[86].mxu1 %v402_v46  ;;  %v474_v46 = vld [vmem:[%s6955_s0 + $0xe78] sm:$0xff] }
 0x280   :  { %3301 = vmatmul.mubr.msk.f32.gmra.mrb[84].mxu0 %vm747_vm2, %v397_v41  ;;  %2037 = vmatprep.mubr.f32.mxu1 %v412_v48  ;;  %v469_v41 = vld [vmem:[%s6955_s0 + $0xe50] sm:$0xff]  ;;  %v484_v48 = vld [vmem:[%s6955_s0 + $0xec8] sm:$0xff] }
 0x281   :  { %3303 = vmatprep.mubr.msk.f32.mxu0 %vm4079_vm1, %v4078_v57 }
 0x282   :  { %v6431_v18 = vpop.f32.mrb[48].mxu1 }
 0x283   :  { %v1541_v59 = vpop.f32.mrb[49].mxu1  ;;  %2038 = vmatmul.mubr.f32.gmra.mrb[88].mxu1 %v411_v53 }
 0x284   :  { %3304 = vmatmul.mubr.msk.f32.gmra.mrb[86].mxu0 %vm747_vm2, %v406_v12  ;;  %2042 = vmatprep.mubr.f32.mxu1 %v421_v58  ;;  %v483_v12 = vld [vmem:[%s6955_s0 + $0xec0] sm:$0xff]  ;;  %v478_v58 = vld [vmem:[%s6955_s0 + $0xe98] sm:$0xff]  ;;  %v493_v59 = vld [vmem:[%s6955_s0 + $0xf10] sm:$0xff] }
 0x285   :  { %3306 = vmatprep.mubr.msk.f32.mxu0 %vm4079_vm1, %v4078_v57 }
 0x286   :  { %v6445_v2 = vpop.f32.mrb[50].mxu1 }
 0x287   :  { %v1546_v3 = vpop.f32.mrb[51].mxu1  ;;  %2043 = vmatmul.mubr.f32.gmra.mrb[90].mxu1 %v420_v60 }
 0x288   :  { %3307 = vmatmul.mubr.msk.f32.gmra.mrb[88].mxu0 %vm747_vm2, %v415_v63  ;;  %2047 = vmatprep.mubr.f32.mxu1 %v430_v1  ;;  %v492_v1 = vld [vmem:[%s6955_s0 + $0xf08] sm:$0xff]  ;;  %v487_v3 = vld [vmem:[%s6955_s0 + $0xee0] sm:$0xff] }
 0x289   :  { %3309 = vmatprep.mubr.msk.f32.mxu0 %vm4079_vm1, %v4078_v57 }
 0x28a   :  { %v6459_v10 = vpop.f32.mrb[52].mxu1 }
 0x28b   :  { %v1551_v11 = vpop.f32.mrb[53].mxu1  ;;  %2048 = vmatmul.mubr.f32.gmra.mrb[92].mxu1 %v429_v6  ;;  %v502_v6 = vld [vmem:[%s6955_s0 + $0xf58] sm:$0xff] }
 0x28c   :  { %3310 = vmatmul.mubr.msk.f32.gmra.mrb[90].mxu0 %vm747_vm2, %v424_v36  ;;  %2052 = vmatprep.mubr.f32.mxu1 %v439_v9  ;;  %v501_v11 = vld [vmem:[%s6955_s0 + $0xf50] sm:$0xff] }
 0x28d   :  { %3312 = vmatprep.mubr.msk.f32.mxu0 %vm4079_vm1, %v4078_v57 }
 0x28e   :  { %v6473_v56 = vpop.f32.mrb[54].mxu1 }
 0x28f   :  { %v1556_v21 = vpop.f32.mrb[55].mxu1  ;;  %2053 = vmatmul.mubr.f32.gmra.mrb[94].mxu1 %v438_v15  ;;  %v496_v15 = vld [vmem:[%s6955_s0 + $0xf28] sm:$0xff] }
 0x290   :  { %3313 = vmatmul.mubr.msk.f32.gmra.mrb[92].mxu0 %vm747_vm2, %v433_v50  ;;  %2057 = vmatprep.mubr.f32.mxu1 %v448_v16  ;;  %v511_v50 = vld [vmem:[%s6955_s0 + $0xfa0] sm:$0xff] }
 0x291   :  { %3315 = vmatprep.mubr.msk.f32.mxu0 %vm4079_vm1, %v4078_v57 }
 0x292   :  { %v6487_v28 = vpop.f32.mrb[56].mxu1 }
 0x293   :  { %v1561_v5 = vpop.f32.mrb[57].mxu1  ;;  %2058 = vmatmul.mubr.f32.gmra.mrb[96].mxu1 %v447_v22 }
 0x294   :  { %3316 = vmatmul.mubr.msk.f32.gmra.mrb[94].mxu0 %vm747_vm2, %v442_v23  ;;  %2062 = vmatprep.mubr.f32.mxu1 %v457_v26  ;;  %v510_v23 = vld [vmem:[%s6955_s0 + $0xf98] sm:$0xff]  ;;  %v505_v26 = vld [vmem:[%s6955_s0 + $0xf70] sm:$0xff]  ;;  %v520_v5 = vld [vmem:[%s6955_s0 + $0xfe8] sm:$0xff] }
 0x295   :  { %3318 = vmatprep.mubr.msk.f32.mxu0 %vm4079_vm1, %v4078_v57 }
 0x296   :  { %v6501_v37 = vpop.f32.mrb[58].mxu1 }
 0x297   :  { %v1566_v20 = vpop.f32.mrb[59].mxu1  ;;  %2063 = vmatmul.mubr.f32.gmra.mrb[98].mxu1 %v456_v31 }
 0x298   :  { %3319 = vmatmul.mubr.msk.f32.gmra.mrb[96].mxu0 %vm747_vm2, %v451_v13  ;;  %2067 = vmatprep.mubr.f32.mxu1 %v466_v33  ;;  %v519_v33 = vld [vmem:[%s6955_s0 + $0xfe0] sm:$0xff]  ;;  %v514_v20 = vld [vmem:[%s6955_s0 + $0xfb8] sm:$0xff] }
 0x299   :  { %3321 = vmatprep.mubr.msk.f32.mxu0 %vm4079_vm1, %v4078_v57 }
 0x29a   :  { %v6515_v43 = vpop.f32.mrb[60].mxu1 }
 0x29b   :  { %v1571_v0 = vpop.f32.mrb[61].mxu1  ;;  %2068 = vmatmul.mubr.f32.gmra.mrb[100].mxu1 %v465_v39  ;;  %v529_v39 = vld [vmem:[%s6955_s0 + $0x1030] sm:$0xff] }
 0x29c   :  { %3322 = vmatmul.mubr.msk.f32.gmra.mrb[98].mxu0 %vm747_vm2, %v460_v27  ;;  %2072 = vmatprep.mubr.f32.mxu1 %v475_v42  ;;  %v528_v0 = vld [vmem:[%s6955_s0 + $0x1028] sm:$0xff] }
 0x29d   :  { %3324 = vmatprep.mubr.msk.f32.mxu0 %vm4079_vm1, %v4078_v57 }
 0x29e   :  { %v6529_v52 = vpop.f32.mrb[62].mxu1 }
 0x29f   :  { %v1576_v53 = vpop.f32.mrb[63].mxu1  ;;  %2073 = vmatmul.mubr.f32.gmra.mrb[102].mxu1 %v474_v46  ;;  %v523_v46 = vld [vmem:[%s6955_s0 + $0x1000] sm:$0xff] }
 0x2a0   :  { %3325 = vmatmul.mubr.msk.f32.gmra.mrb[100].mxu0 %vm747_vm2, %v469_v41  ;;  %2077 = vmatprep.mubr.f32.mxu1 %v484_v48  ;;  %v538_v41 = vld [vmem:[%s6955_s0 + $0x1078] sm:$0xff] }
 0x2a1   :  { %3327 = vmatprep.mubr.msk.f32.mxu0 %vm4079_vm1, %v4078_v57 }
 0x2a2   :  { %v6543_v60 = vpop.f32.mrb[64].mxu1 }
 0x2a3   :  { %v1581_v63 = vpop.f32.mrb[65].mxu1  ;;  %2078 = vmatmul.mubr.f32.gmra.mrb[104].mxu1 %v483_v12  ;;  %v537_v12 = vld [vmem:[%s6955_s0 + $0x1070] sm:$0xff] }
 0x2a4   :  { %3328 = vmatmul.mubr.msk.f32.gmra.mrb[102].mxu0 %vm747_vm2, %v478_v58  ;;  %2082 = vmatprep.mubr.f32.mxu1 %v493_v59  ;;  %v532_v58 = vld [vmem:[%s6955_s0 + $0x1048] sm:$0xff]  ;;  %v547_v59 = vld [vmem:[%s6955_s0 + $0x10c0] sm:$0xff] }
 0x2a5   :  { %3330 = vmatprep.mubr.msk.f32.mxu0 %vm4079_vm1, %v4078_v57 }
 0x2a6   :  { %v6557_v36 = vpop.f32.mrb[66].mxu1 }
 0x2a7   :  { %v1586_v9 = vpop.f32.mrb[67].mxu1  ;;  %2083 = vmatmul.mubr.f32.gmra.mrb[106].mxu1 %v492_v1 }
 0x2a8   :  { %3331 = vmatmul.mubr.msk.f32.gmra.mrb[104].mxu0 %vm747_vm2, %v487_v3  ;;  %2087 = vmatprep.mubr.f32.mxu1 %v502_v6  ;;  %v546_v3 = vld [vmem:[%s6955_s0 + $0x10b8] sm:$0xff]  ;;  %v541_v6 = vld [vmem:[%s6955_s0 + $0x1090] sm:$0xff]  ;;  %v556_v9 = vld [vmem:[%s6955_s0 + $0x1108] sm:$0xff] }
 0x2a9   :  { %3333 = vmatprep.mubr.msk.f32.mxu0 %vm4079_vm1, %v4078_v57 }
 0x2ab   :  { %v2619_v16 = vpop.f32.mrb[0].mxu0  ;;  %2088 = vmatmul.mubr.f32.gmra.mrb[108].mxu1 %v501_v11 }
 0x2ac   :  { %v3605_v21 = vadd.f32 %v2619_v16, %v6095_v47  ;;  %v3176_v22 = vpop.f32.mrb[1].mxu0  ;;  %3334 = vmatmul.mubr.msk.f32.gmra.mrb[106].mxu0 %vm747_vm2, %v496_v15  ;;  %2092 = vmatprep.mubr.f32.mxu1 %v511_v50  ;;  %v555_v50 = vld [vmem:[%s6955_s0 + $0x1100] sm:$0xff]  ;;  %v550_v16 = vld [vmem:[%s6955_s0 + $0x10d8] sm:$0xff] }
 0x2ad   :  { %3336 = vmatprep.mubr.msk.f32.mxu0 %vm4079_vm1, %v4078_v57 }
 0x2ae   :  { %2953 = vst [vmem:[%s6956_s2] sm:$0xff] %v3605_v21  ;;  %v565_v21 = vld [vmem:[%s6955_s0 + $0x1150] sm:$0xff] }
 0x2af   :  { %v2624_v47 = vpop.f32.mrb[2].mxu0  ;;  %2093 = vmatmul.mubr.f32.gmra.mrb[110].mxu1 %v510_v23 }
 0x2b0   :  { %v3606_v31 = vadd.f32 %v2624_v47, %v6109_v51  ;;  %v3179_v13 = vpop.f32.mrb[3].mxu0  ;;  %3337 = vmatmul.mubr.msk.f32.gmra.mrb[108].mxu0 %vm747_vm2, %v505_v26  ;;  %2097 = vmatprep.mubr.f32.mxu1 %v520_v5  ;;  %v564_v26 = vld [vmem:[%s6955_s0 + $0x1148] sm:$0xff]  ;;  %v559_v5 = vld [vmem:[%s6955_s0 + $0x1120] sm:$0xff]  ;;  %v574_v47 = vld [vmem:[%s6955_s0 + $0x1198] sm:$0xff] }
 0x2b1   :  { %3339 = vmatprep.mubr.msk.f32.mxu0 %vm4079_vm1, %v4078_v57 }
 0x2b2   :  { %2954 = vst [vmem:[%s6956_s2 + $0x8] sm:$0xff] %v3606_v31 }
 0x2b3   :  { %v2629_v51 = vpop.f32.mrb[4].mxu0  ;;  %2098 = vmatmul.mubr.f32.gmra.mrb[112].mxu1 %v519_v33  ;;  %v573_v33 = vld [vmem:[%s6955_s0 + $0x1190] sm:$0xff] }
 0x2b4   :  { %v3607_v27 = vadd.f32 %v2629_v51, %v6123_v55  ;;  %v3182_v42 = vpop.f32.mrb[5].mxu0  ;;  %3340 = vmatmul.mubr.msk.f32.gmra.mrb[110].mxu0 %vm747_vm2, %v514_v20  ;;  %2102 = vmatprep.mubr.f32.mxu1 %v529_v39  ;;  %v568_v20 = vld [vmem:[%s6955_s0 + $0x1168] sm:$0xff]  ;;  %v583_v39 = vld [vmem:[%s6955_s0 + $0x11e0] sm:$0xff] }
 0x2b5   :  { %3342 = vmatprep.mubr.msk.f32.mxu0 %vm4079_vm1, %v4078_v57  ;;  %v582_v42 = vld [vmem:[%s6955_s0 + $0x11d8] sm:$0xff] }
 0x2b6   :  { %2955 = vst [vmem:[%s6956_s2 + $0x10] sm:$0xff] %v3607_v27 }
 0x2b7   :  { %v2634_v55 = vpop.f32.mrb[6].mxu0  ;;  %2103 = vmatmul.mubr.f32.gmra.mrb[114].mxu1 %v528_v0  ;;  %v577_v0 = vld [vmem:[%s6955_s0 + $0x11b0] sm:$0xff] }
 0x2b8   :  { %v3608_v48 = vadd.f32 %v2634_v55, %v6137_v61  ;;  %v3185_v53 = vpop.f32.mrb[7].mxu0  ;;  %3343 = vmatmul.mubr.msk.f32.gmra.mrb[112].mxu0 %vm747_vm2, %v523_v46  ;;  %2107 = vmatprep.mubr.f32.mxu1 %v538_v41  ;;  %v592_v46 = vld [vmem:[%s6955_s0 + $0x1228] sm:$0xff] }
 0x2b9   :  { %3345 = vmatprep.mubr.msk.f32.mxu0 %vm4079_vm1, %v4078_v57  ;;  %v586_v53 = vld [vmem:[%s6955_s0 + $0x11f8] sm:$0xff] }
 0x2ba   :  { %2956 = vst [vmem:[%s6956_s2 + $0x18] sm:$0xff] %v3608_v48  ;;  %v591_v48 = vld [vmem:[%s6955_s0 + $0x1220] sm:$0xff] }
 0x2bb   :  { %v2639_v61 = vpop.f32.mrb[8].mxu0  ;;  %2108 = vmatmul.mubr.f32.gmra.mrb[116].mxu1 %v537_v12  ;;  %v601_v12 = vld [vmem:[%s6955_s0 + $0x1270] sm:$0xff] }
 0x2bc   :  { %v3609_v63 = vadd.f32 %v2639_v61, %v6151_v30  ;;  %v3188_v1 = vpop.f32.mrb[9].mxu0  ;;  %3346 = vmatmul.mubr.msk.f32.gmra.mrb[114].mxu0 %vm747_vm2, %v532_v58  ;;  %2112 = vmatprep.mubr.f32.mxu1 %v547_v59  ;;  %v600_v61 = vld [vmem:[%s6955_s0 + $0x1268] sm:$0xff] }
 0x2bd   :  { %3348 = vmatprep.mubr.msk.f32.mxu0 %vm4079_vm1, %v4078_v57  ;;  %v610_v1 = vld [vmem:[%s6955_s0 + $0x12b8] sm:$0x1] }
 0x2be   :  { %2957 = vst [vmem:[%s6956_s2 + $0x20] sm:$0xff] %v3609_v63  ;;  %v595_v63 = vld [vmem:[%s6955_s0 + $0x1240] sm:$0xff] }
 0x2bf   :  { %v2644_v30 = vpop.f32.mrb[10].mxu0  ;;  %2113 = vmatmul.mubr.f32.gmra.mrb[118].mxu1 %v546_v3 }
 0x2c0   :  { %v3610_v11 = vadd.f32 %v2644_v30, %v6165_v7  ;;  %v3191_v15 = vpop.f32.mrb[11].mxu0  ;;  %3349 = vmatmul.mubr.msk.f32.gmra.mrb[116].mxu0 %vm747_vm2, %v541_v6  ;;  %2117 = vmatprep.mubr.f32.mxu1 %v556_v9  ;;  %v609_v9 = vld [vmem:[%s6955_s0 + $0x12b0] sm:$0x1]  ;;  %v604_v30 = vld [vmem:[%s6955_s0 + $0x1288] sm:$0xff] }
 0x2c1   :  { %3351 = vmatprep.mubr.msk.f32.mxu0 %vm4079_vm1, %v4078_v57 }
 0x2c2   :  { %2958 = vst [vmem:[%s6956_s2 + $0x28] sm:$0xff] %v3610_v11 }
 0x2c3   :  { %v2649_v7 = vpop.f32.mrb[12].mxu0  ;;  %2118 = vmatmul.mubr.f32.gmra.mrb[120].mxu1 %v555_v50  ;;  %v613_v50 = vld [vmem:[%s6955_s0 + $0x12d0] sm:$0x1] }
 0x2c4   :  { %v3611_v22 = vadd.f32 %v2649_v7, %v6179_v14  ;;  %v3194_v23 = vpop.f32.mrb[13].mxu0  ;;  %3352 = vmatmul.mubr.msk.f32.gmra.mrb[118].mxu0 %vm747_vm2, %v550_v16  ;;  %2122 = vmatprep.mubr.f32.mxu1 %v565_v21 }
 0x2c5   :  { %3354 = vmatprep.mubr.msk.f32.mxu0 %vm4079_vm1, %v4078_v57 }
 0x2c6   :  { %2959 = vst [vmem:[%s6956_s2 + $0x30] sm:$0xff] %v3611_v22 }
 0x2c7   :  { %v2654_v14 = vpop.f32.mrb[14].mxu0  ;;  %2123 = vmatmul.mubr.f32.gmra.mrb[122].mxu1 %v564_v26 }
 0x2c8   :  { %v3612_v31 = vadd.f32 %v2654_v14, %v6193_v19  ;;  %v3197_v13 = vpop.f32.mrb[15].mxu0  ;;  %3355 = vmatmul.mubr.msk.f32.gmra.mrb[120].mxu0 %vm747_vm2, %v559_v5  ;;  %2127 = vmatprep.mubr.f32.mxu1 %v574_v47 }
 0x2c9   :  { %3357 = vmatprep.mubr.msk.f32.mxu0 %vm4079_vm1, %v4078_v57 }
 0x2ca   :  { %2960 = vst [vmem:[%s6956_s2 + $0x38] sm:$0xff] %v3612_v31 }
 0x2cb   :  { %v2659_v19 = vpop.f32.mrb[16].mxu0  ;;  %2128 = vmatmul.mubr.f32.gmra.mrb[124].mxu1 %v573_v33 }
 0x2cc   :  { %v3613_v51 = vadd.f32 %v2659_v19, %v6207_v62  ;;  %v3200_v27 = vpop.f32.mrb[17].mxu0  ;;  %3358 = vmatmul.mubr.msk.f32.gmra.mrb[122].mxu0 %vm747_vm2, %v568_v20  ;;  %2132 = vmatprep.mubr.f32.mxu1 %v583_v39 }
 0x2cd   :  { %3360 = vmatprep.mubr.msk.f32.mxu0 %vm4079_vm1, %v4078_v57 }
 0x2ce   :  { %2961 = vst [vmem:[%s6956_s2 + $0x40] sm:$0xff] %v3613_v51 }
 0x2cf   :  { %v2664_v62 = vpop.f32.mrb[18].mxu0  ;;  %2133 = vmatmul.mubr.f32.gmra.mrb[126].mxu1 %v582_v42 }
 0x2d0   :  { %v3614_v41 = vadd.f32 %v2664_v62, %v6221_v29  ;;  %v3203_v55 = vpop.f32.mrb[19].mxu0  ;;  %3361 = vmatmul.mubr.msk.f32.gmra.mrb[124].mxu0 %vm747_vm2, %v577_v0  ;;  %2137 = vmatprep.mubr.f32.mxu1 %v592_v46 }
 0x2d1   :  { %3363 = vmatprep.mubr.msk.f32.mxu0 %vm4079_vm1, %v4078_v57 }
 0x2d2   :  { %2962 = vst [vmem:[%s6956_s2 + $0x48] sm:$0xff] %v3614_v41 }
 0x2d3   :  { %v2669_v29 = vpop.f32.mrb[20].mxu0  ;;  %2138 = vmatmul.mubr.f32.gmra.mrb[128].mxu1 %v591_v48 }
 0x2d4   :  { %v3615_v58 = vadd.f32 %v2669_v29, %v6235_v35  ;;  %v3206_v59 = vpop.f32.mrb[21].mxu0  ;;  %3364 = vmatmul.mubr.msk.f32.gmra.mrb[126].mxu0 %vm747_vm2, %v586_v53  ;;  %2142 = vmatprep.mubr.f32.mxu1 %v601_v12 }
 0x2d5   :  { %3366 = vmatprep.mubr.msk.f32.mxu0 %vm4079_vm1, %v4078_v57 }
 0x2d6   :  { %2963 = vst [vmem:[%s6956_s2 + $0x50] sm:$0xff] %v3615_v58 }
 0x2d7   :  { %v2674_v35 = vpop.f32.mrb[22].mxu0  ;;  %2143 = vmatmul.mubr.f32.gmra.mrb[130].mxu1 %v600_v61 }
 0x2d8   :  { %v3616_v3 = vadd.f32 %v2674_v35, %v6249_v40  ;;  %v3209_v6 = vpop.f32.mrb[23].mxu0  ;;  %3367 = vmatmul.mubr.msk.f32.gmra.mrb[128].mxu0 %vm747_vm2, %v595_v63  ;;  %2147 = vmatprep.mubr.f32.mxu1 %v610_v1 }
 0x2d9   :  { %3369 = vmatprep.mubr.msk.f32.mxu0 %vm4079_vm1, %v4078_v57 }
 0x2da   :  { %2964 = vst [vmem:[%s6956_s2 + $0x58] sm:$0xff] %v3616_v3 }
 0x2db   :  { %v2679_v40 = vpop.f32.mrb[24].mxu0  ;;  %2148 = vmatmul.mubr.f32.gmra.mrb[132].mxu1 %v609_v9 }
 0x2dc   :  { %v3617_v11 = vadd.f32 %v2679_v40, %v6263_v34  ;;  %v3212_v15 = vpop.f32.mrb[25].mxu0  ;;  %3370 = vmatmul.mubr.msk.f32.gmra.mrb[130].mxu0 %vm747_vm2, %v604_v30 }
 0x2dd   :  { %3372 = vmatprep.mubr.msk.f32.mxu0 %vm4079_vm1, %v4078_v57 }
 0x2de   :  { %2965 = vst [vmem:[%s6956_s2 + $0x60] sm:$0xff] %v3617_v11 }
 0x2df   :  { %v2684_v16 = vpop.f32.mrb[26].mxu0 }
 0x2e0   :  { %v3618_v21 = vadd.f32 %v2684_v16, %v6277_v8  ;;  %v3215_v7 = vpop.f32.mrb[27].mxu0  ;;  %3373 = vmatmul.mubr.msk.f32.gmra.mrb[132].mxu0 %vm747_vm2, %v613_v50 }
 0x2e2   :  { %2966 = vst [vmem:[%s6956_s2 + $0x68] sm:$0xff] %v3618_v21 }
 0x2e3   :  { %v2689_v34 = vpop.f32.mrb[28].mxu0 }
 0x2e4   :  { %v3619_v57 = vadd.f32 %v2689_v34, %v6291_v54  ;;  %v3218_v22 = vpop.f32.mrb[29].mxu0 }
 0x2e6   :  { %2967 = vst [vmem:[%s6956_s2 + $0x70] sm:$0xff] %v3619_v57 }
 0x2e7   :  { %v2694_v23 = vpop.f32.mrb[30].mxu0 }
 0x2e8   :  { %v3620_v26 = vadd.f32 %v2694_v23, %v6305_v24  ;;  %v3221_v5 = vpop.f32.mrb[31].mxu0 }
 0x2ea   :  { %2968 = vst [vmem:[%s6956_s2 + $0x78] sm:$0xff] %v3620_v26 }
 0x2eb   :  { %v2699_v8 = vpop.f32.mrb[32].mxu0 }
 0x2ec   :  { %v3621_v47 = vadd.f32 %v2699_v8, %v6319_v4  ;;  %v3224_v14 = vpop.f32.mrb[33].mxu0 }
 0x2ee   :  { %2969 = vst [vmem:[%s6956_s2 + $0x80] sm:$0xff] %v3621_v47 }
 0x2ef   :  { %v2704_v54 = vpop.f32.mrb[34].mxu0 }
 0x2f0   :  { %v3622_v31 = vadd.f32 %v2704_v54, %v6333_v44  ;;  %v3227_v13 = vpop.f32.mrb[35].mxu0 }
 0x2f2   :  { %2970 = vst [vmem:[%s6956_s2 + $0x88] sm:$0xff] %v3622_v31 }
 0x2f3   :  { %v2709_v24 = vpop.f32.mrb[36].mxu0 }
 0x2f4   :  { %v3623_v33 = vadd.f32 %v2709_v24, %v6347_v17  ;;  %v3230_v20 = vpop.f32.mrb[37].mxu0 }
 0x2f6   :  { %2971 = vst [vmem:[%s6956_s2 + $0x90] sm:$0xff] %v3623_v33 }
 0x2f7   :  { %v2714_v4 = vpop.f32.mrb[38].mxu0 }
 0x2f8   :  { %v3624_v39 = vadd.f32 %v2714_v4, %v6361_v25  ;;  %v3233_v19 = vpop.f32.mrb[39].mxu0 }
 0x2fa   :  { %2972 = vst [vmem:[%s6956_s2 + $0x98] sm:$0xff] %v3624_v39 }
 0x2fb   :  { %v2719_v44 = vpop.f32.mrb[40].mxu0 }
 0x2fc   :  { %v3625_v51 = vadd.f32 %v2719_v44, %v6375_v32  ;;  %v3236_v27 = vpop.f32.mrb[41].mxu0 }
 0x2fe   :  { %2973 = vst [vmem:[%s6956_s2 + $0xa0] sm:$0xff] %v3625_v51 }
 0x2ff   :  { %v2724_v17 = vpop.f32.mrb[42].mxu0 }
 0x300   :  { %v3626_v42 = vadd.f32 %v2724_v17, %v6389_v38  ;;  %v3239_v0 = vpop.f32.mrb[43].mxu0 }
 0x302   :  { %2974 = vst [vmem:[%s6956_s2 + $0xa8] sm:$0xff] %v3626_v42 }
 0x303   :  { %v2729_v25 = vpop.f32.mrb[44].mxu0 }
 0x304   :  { %v3627_v46 = vadd.f32 %v2729_v25, %v6403_v45  ;;  %v3242_v62 = vpop.f32.mrb[45].mxu0 }
 0x306   :  { %2975 = vst [vmem:[%s6956_s2 + $0xb0] sm:$0xff] %v3627_v46 }
 0x307   :  { %v2734_v32 = vpop.f32.mrb[46].mxu0 }
 0x308   :  { %v3628_v41 = vadd.f32 %v2734_v32, %v6417_v49  ;;  %v3245_v55 = vpop.f32.mrb[47].mxu0 }
 0x30a   :  { %2976 = vst [vmem:[%s6956_s2 + $0xb8] sm:$0xff] %v3628_v41 }
 0x30b   :  { %v2739_v38 = vpop.f32.mrb[48].mxu0 }
 0x30c   :  { %v3629_v48 = vadd.f32 %v2739_v38, %v6431_v18  ;;  %v3248_v53 = vpop.f32.mrb[49].mxu0 }
 0x30e   :  { %2977 = vst [vmem:[%s6956_s2 + $0xc0] sm:$0xff] %v3629_v48 }
 0x30f   :  { %v2744_v45 = vpop.f32.mrb[50].mxu0 }
 0x310   :  { %v3630_v12 = vadd.f32 %v2744_v45, %v6445_v2  ;;  %v3251_v29 = vpop.f32.mrb[51].mxu0 }
 0x312   :  { %2978 = vst [vmem:[%s6956_s2 + $0xc8] sm:$0xff] %v3630_v12 }
 0x313   :  { %v2749_v49 = vpop.f32.mrb[52].mxu0 }
 0x314   :  { %v3631_v58 = vadd.f32 %v2749_v49, %v6459_v10  ;;  %v3254_v59 = vpop.f32.mrb[53].mxu0 }
 0x316   :  { %2979 = vst [vmem:[%s6956_s2 + $0xd0] sm:$0xff] %v3631_v58 }
 0x317   :  { %v2754_v18 = vpop.f32.mrb[54].mxu0 }
 0x318   :  { %v3632_v61 = vadd.f32 %v2754_v18, %v6473_v56  ;;  %v3257_v63 = vpop.f32.mrb[55].mxu0 }
 0x31a   :  { %2980 = vst [vmem:[%s6956_s2 + $0xd8] sm:$0xff] %v3632_v61 }
 0x31b   :  { %v2759_v2 = vpop.f32.mrb[56].mxu0 }
 0x31c   :  { %v3633_v1 = vadd.f32 %v2759_v2, %v6487_v28  ;;  %v3260_v35 = vpop.f32.mrb[57].mxu0 }
 0x31e   :  { %2981 = vst [vmem:[%s6956_s2 + $0xe0] sm:$0xff] %v3633_v1 }
 0x31f   :  { %v2764_v10 = vpop.f32.mrb[58].mxu0 }
 0x320   :  { %v3634_v3 = vadd.f32 %v2764_v10, %v6501_v37  ;;  %v3263_v6 = vpop.f32.mrb[59].mxu0 }
 0x322   :  { %2982 = vst [vmem:[%s6956_s2 + $0xe8] sm:$0xff] %v3634_v3 }
 0x323   :  { %v2769_v56 = vpop.f32.mrb[60].mxu0 }
 0x324   :  { %v3635_v9 = vadd.f32 %v2769_v56, %v6515_v43  ;;  %v3266_v30 = vpop.f32.mrb[61].mxu0 }
 0x326   :  { %2983 = vst [vmem:[%s6956_s2 + $0xf0] sm:$0xff] %v3635_v9 }
 0x327   :  { %v2774_v28 = vpop.f32.mrb[62].mxu0 }
 0x328   :  { %v3636_v40 = vadd.f32 %v2774_v28, %v6529_v52  ;;  %v3269_v11 = vpop.f32.mrb[63].mxu0 }
 0x32a   :  { %2984 = vst [vmem:[%s6956_s2 + $0xf8] sm:$0xff] %v3636_v40 }
 0x32b   :  { %v2779_v37 = vpop.f32.mrb[64].mxu0 }
 0x32c   :  { %v3637_v15 = vadd.f32 %v2779_v37, %v6543_v60  ;;  %v3272_v50 = vpop.f32.mrb[65].mxu0 }
 0x32e   :  { %2985 = vst [vmem:[%s6956_s2 + $0x100] sm:$0xff] %v3637_v15  ;;  %v1989_v43 = vpop.f32.mrb[68].mxu1 }
 0x32f   :  { %v2784_v16 = vpop.f32.mrb[66].mxu0  ;;  %v1991_v21 = vpop.f32.mrb[69].mxu1 }
 0x330   :  { %v3638_v7 = vadd.f32 %v2784_v16, %v6557_v36  ;;  %v3275_v34 = vpop.f32.mrb[67].mxu0 }
 0x332   :  { %2986 = vst [vmem:[%s6956_s2 + $0x108] sm:$0xff] %v3638_v7  ;;  %v1994_v52 = vpop.f32.mrb[70].mxu1 }
 0x333   :  { %v2789_v57 = vpop.f32.mrb[68].mxu0  ;;  %v1996_v22 = vpop.f32.mrb[71].mxu1 }
 0x334   :  { %v3639_v23 = vadd.f32 %v2789_v57, %v1989_v43  ;;  %v3278_v60 = vpop.f32.mrb[69].mxu0 }
 0x336   :  { %2987 = vst [vmem:[%s6956_s2 + $0x110] sm:$0xff] %v3639_v23  ;;  %v1999_v26 = vpop.f32.mrb[72].mxu1 }
 0x337   :  { %v2794_v5 = vpop.f32.mrb[70].mxu0  ;;  %v2001_v8 = vpop.f32.mrb[73].mxu1 }
 0x338   :  { %v3640_v47 = vadd.f32 %v2794_v5, %v1994_v52  ;;  %v3281_v14 = vpop.f32.mrb[71].mxu0 }
 0x33a   :  { %2988 = vst [vmem:[%s6956_s2 + $0x118] sm:$0xff] %v3640_v47  ;;  %v2004_v36 = vpop.f32.mrb[74].mxu1 }
 0x33b   :  { %v2799_v54 = vpop.f32.mrb[72].mxu0  ;;  %v2006_v31 = vpop.f32.mrb[75].mxu1 }
 0x33c   :  { %v3641_v13 = vadd.f32 %v2799_v54, %v1999_v26  ;;  %v3284_v24 = vpop.f32.mrb[73].mxu0 }
 0x33e   :  { %2989 = vst [vmem:[%s6956_s2 + $0x120] sm:$0xff] %v3641_v13  ;;  %v2009_v33 = vpop.f32.mrb[76].mxu1 }
 0x33f   :  { %v2804_v20 = vpop.f32.mrb[74].mxu0  ;;  %v2011_v4 = vpop.f32.mrb[77].mxu1 }
 0x340   :  { %v3642_v39 = vadd.f32 %v2804_v20, %v2004_v36  ;;  %v3287_v19 = vpop.f32.mrb[75].mxu0 }
 0x342   :  { %2990 = vst [vmem:[%s6956_s2 + $0x128] sm:$0xff] %v3642_v39  ;;  %v2014_v44 = vpop.f32.mrb[78].mxu1 }
 0x343   :  { %v2809_v51 = vpop.f32.mrb[76].mxu0  ;;  %v2016_v27 = vpop.f32.mrb[79].mxu1 }
 0x344   :  { %v3643_v17 = vadd.f32 %v2809_v51, %v2009_v33  ;;  %v3290_v42 = vpop.f32.mrb[77].mxu0 }
 0x346   :  { %2991 = vst [vmem:[%s6956_s2 + $0x130] sm:$0xff] %v3643_v17  ;;  %v2019_v0 = vpop.f32.mrb[80].mxu1 }
 0x347   :  { %v2814_v25 = vpop.f32.mrb[78].mxu0  ;;  %v2021_v46 = vpop.f32.mrb[81].mxu1 }
 0x348   :  { %v3644_v62 = vadd.f32 %v2814_v25, %v2014_v44  ;;  %v3293_v32 = vpop.f32.mrb[79].mxu0 }
 0x34a   :  { %2992 = vst [vmem:[%s6956_s2 + $0x138] sm:$0xff] %v3644_v62  ;;  %v2024_v41 = vpop.f32.mrb[82].mxu1 }
 0x34b   :  { %v2819_v55 = vpop.f32.mrb[80].mxu0  ;;  %v2026_v38 = vpop.f32.mrb[83].mxu1 }
 0x34c   :  { %v3645_v48 = vadd.f32 %v2819_v55, %v2019_v0  ;;  %v3296_v53 = vpop.f32.mrb[81].mxu0 }
 0x34e   :  { %2993 = vst [vmem:[%s6956_s2 + $0x140] sm:$0xff] %v3645_v48  ;;  %v2029_v45 = vpop.f32.mrb[84].mxu1 }
 0x34f   :  { %v2824_v12 = vpop.f32.mrb[82].mxu0  ;;  %v2031_v29 = vpop.f32.mrb[85].mxu1 }
 0x350   :  { %v3646_v49 = vadd.f32 %v2824_v12, %v2024_v41  ;;  %v3299_v58 = vpop.f32.mrb[83].mxu0 }
 0x352   :  { %2994 = vst [vmem:[%s6956_s2 + $0x148] sm:$0xff] %v3646_v49  ;;  %v2034_v59 = vpop.f32.mrb[86].mxu1 }
 0x353   :  { %v2829_v18 = vpop.f32.mrb[84].mxu0  ;;  %v2036_v61 = vpop.f32.mrb[87].mxu1 }
 0x354   :  { %v3647_v63 = vadd.f32 %v2829_v18, %v2029_v45  ;;  %v3302_v2 = vpop.f32.mrb[85].mxu0 }
 0x356   :  { %2995 = vst [vmem:[%s6956_s2 + $0x150] sm:$0xff] %v3647_v63  ;;  %v2039_v1 = vpop.f32.mrb[88].mxu1 }
 0x357   :  { %v2834_v35 = vpop.f32.mrb[86].mxu0  ;;  %v2041_v10 = vpop.f32.mrb[89].mxu1 }
 0x358   :  { %v3648_v3 = vadd.f32 %v2834_v35, %v2034_v59  ;;  %v3305_v6 = vpop.f32.mrb[87].mxu0 }
 0x35a   :  { %2996 = vst [vmem:[%s6956_s2 + $0x158] sm:$0xff] %v3648_v3  ;;  %v2044_v56 = vpop.f32.mrb[90].mxu1 }
 0x35b   :  { %v2839_v9 = vpop.f32.mrb[88].mxu0  ;;  %v2046_v30 = vpop.f32.mrb[91].mxu1 }
 0x35c   :  { %v3649_v28 = vadd.f32 %v2839_v9, %v2039_v1  ;;  %v3308_v40 = vpop.f32.mrb[89].mxu0 }
 0x35e   :  { %2997 = vst [vmem:[%s6956_s2 + $0x160] sm:$0xff] %v3649_v28  ;;  %v2049_v11 = vpop.f32.mrb[92].mxu1 }
 0x35f   :  { %v2844_v37 = vpop.f32.mrb[90].mxu0  ;;  %v2051_v15 = vpop.f32.mrb[93].mxu1 }
 0x360   :  { %v3650_v50 = vadd.f32 %v2844_v37, %v2044_v56  ;;  %v3311_v43 = vpop.f32.mrb[91].mxu0 }
 0x362   :  { %2998 = vst [vmem:[%s6956_s2 + $0x168] sm:$0xff] %v3650_v50  ;;  %v2054_v16 = vpop.f32.mrb[94].mxu1 }
 0x363   :  { %v2849_v21 = vpop.f32.mrb[92].mxu0  ;;  %v2056_v7 = vpop.f32.mrb[95].mxu1 }
 0x364   :  { %v3651_v34 = vadd.f32 %v2849_v21, %v2049_v11  ;;  %v3314_v52 = vpop.f32.mrb[93].mxu0 }
 0x366   :  { %2999 = vst [vmem:[%s6956_s2 + $0x170] sm:$0xff] %v3651_v34  ;;  %v2059_v57 = vpop.f32.mrb[96].mxu1 }
 0x367   :  { %v2854_v22 = vpop.f32.mrb[94].mxu0  ;;  %v2061_v23 = vpop.f32.mrb[97].mxu1 }
 0x368   :  { %v3652_v60 = vadd.f32 %v2854_v22, %v2054_v16  ;;  %v3317_v26 = vpop.f32.mrb[95].mxu0 }
 0x36a   :  { %3000 = vst [vmem:[%s6956_s2 + $0x178] sm:$0xff] %v3652_v60  ;;  %v2064_v5 = vpop.f32.mrb[98].mxu1 }
 0x36b   :  { %v2859_v8 = vpop.f32.mrb[96].mxu0  ;;  %v2066_v47 = vpop.f32.mrb[99].mxu1 }
 0x36c   :  { %v3653_v14 = vadd.f32 %v2859_v8, %v2059_v57  ;;  %v3320_v36 = vpop.f32.mrb[97].mxu0 }
 0x36e   :  { %3001 = vst [vmem:[%s6956_s2 + $0x180] sm:$0xff] %v3653_v14  ;;  %v2069_v54 = vpop.f32.mrb[100].mxu1 }
 0x36f   :  { %v2864_v31 = vpop.f32.mrb[98].mxu0  ;;  %v2071_v13 = vpop.f32.mrb[101].mxu1 }
 0x370   :  { %v3654_v24 = vadd.f32 %v2864_v31, %v2064_v5  ;;  %v3323_v33 = vpop.f32.mrb[99].mxu0 }
 0x372   :  { %3002 = vst [vmem:[%s6956_s2 + $0x188] sm:$0xff] %v3654_v24  ;;  %v2074_v20 = vpop.f32.mrb[102].mxu1 }
 0x373   :  { %v2869_v4 = vpop.f32.mrb[100].mxu0  ;;  %v2076_v39 = vpop.f32.mrb[103].mxu1 }
 0x374   :  { %v3655_v19 = vadd.f32 %v2869_v4, %v2069_v54  ;;  %v3326_v44 = vpop.f32.mrb[101].mxu0 }
 0x376   :  { %3003 = vst [vmem:[%s6956_s2 + $0x190] sm:$0xff] %v3655_v19  ;;  %v2079_v51 = vpop.f32.mrb[104].mxu1 }
 0x377   :  { %v2874_v27 = vpop.f32.mrb[102].mxu0  ;;  %v2081_v17 = vpop.f32.mrb[105].mxu1 }
 0x378   :  { %v3656_v42 = vadd.f32 %v2874_v27, %v2074_v20  ;;  %v3329_v0 = vpop.f32.mrb[103].mxu0 }
 0x37a   :  { %3004 = vst [vmem:[%s6956_s2 + $0x198] sm:$0xff] %v3656_v42  ;;  %v2084_v25 = vpop.f32.mrb[106].mxu1 }
 0x37b   :  { %v2879_v46 = vpop.f32.mrb[104].mxu0  ;;  %v2086_v62 = vpop.f32.mrb[107].mxu1 }
 0x37c   :  { %v3657_v32 = vadd.f32 %v2879_v46, %v2079_v51  ;;  %v3332_v41 = vpop.f32.mrb[105].mxu0 }
 0x37e   :  { %3005 = vst [vmem:[%s6956_s2 + $0x1a0] sm:$0xff] %v3657_v32  ;;  %v2089_v55 = vpop.f32.mrb[108].mxu1 }
 0x37f   :  { %v2884_v38 = vpop.f32.mrb[106].mxu0  ;;  %v2091_v48 = vpop.f32.mrb[109].mxu1 }
 0x380   :  { %v3658_v53 = vadd.f32 %v2884_v38, %v2084_v25  ;;  %v3335_v45 = vpop.f32.mrb[107].mxu0 }
 0x382   :  { %3006 = vst [vmem:[%s6956_s2 + $0x1a8] sm:$0xff] %v3658_v53  ;;  %v2094_v12 = vpop.f32.mrb[110].mxu1 }
 0x383   :  { %v2889_v29 = vpop.f32.mrb[108].mxu0  ;;  %v2096_v49 = vpop.f32.mrb[111].mxu1 }
 0x384   :  { %v3659_v58 = vadd.f32 %v2889_v29, %v2089_v55  ;;  %v3338_v59 = vpop.f32.mrb[109].mxu0 }
 0x386   :  { %3007 = vst [vmem:[%s6956_s2 + $0x1b0] sm:$0xff] %v3659_v58  ;;  %v2099_v18 = vpop.f32.mrb[112].mxu1 }
 0x387   :  { %v2894_v61 = vpop.f32.mrb[110].mxu0  ;;  %v2101_v63 = vpop.f32.mrb[113].mxu1 }
 0x388   :  { %v3660_v2 = vadd.f32 %v2894_v61, %v2094_v12  ;;  %v3341_v1 = vpop.f32.mrb[111].mxu0 }
 0x38a   :  { %3008 = vst [vmem:[%s6956_s2 + $0x1b8] sm:$0xff] %v3660_v2  ;;  %v2104_v35 = vpop.f32.mrb[114].mxu1 }
 0x38b   :  { %v2899_v10 = vpop.f32.mrb[112].mxu0  ;;  %v2106_v3 = vpop.f32.mrb[115].mxu1 }
 0x38c   :  { %v3661_v6 = vadd.f32 %v2899_v10, %v2099_v18  ;;  %v3344_v56 = vpop.f32.mrb[113].mxu0 }
 0x38e   :  { %3009 = vst [vmem:[%s6956_s2 + $0x1c0] sm:$0xff] %v3661_v6  ;;  %v2109_v9 = vpop.f32.mrb[116].mxu1 }
 0x38f   :  { %v2904_v30 = vpop.f32.mrb[114].mxu0  ;;  %v2111_v28 = vpop.f32.mrb[117].mxu1 }
 0x390   :  { %v3662_v40 = vadd.f32 %v2904_v30, %v2104_v35  ;;  %v3347_v11 = vpop.f32.mrb[115].mxu0 }
 0x392   :  { %3010 = vst [vmem:[%s6956_s2 + $0x1c8] sm:$0xff] %v3662_v40  ;;  %v2114_v37 = vpop.f32.mrb[118].mxu1 }
 0x393   :  { %v2909_v15 = vpop.f32.mrb[116].mxu0  ;;  %v2116_v50 = vpop.f32.mrb[119].mxu1 }
 0x394   :  { %v3663_v43 = vadd.f32 %v2909_v15, %v2109_v9  ;;  %v3350_v16 = vpop.f32.mrb[117].mxu0 }
 0x396   :  { %3011 = vst [vmem:[%s6956_s2 + $0x1d0] sm:$0xff] %v3663_v43  ;;  %v2119_v21 = vpop.f32.mrb[120].mxu1 }
 0x397   :  { %v2914_v7 = vpop.f32.mrb[118].mxu0  ;;  %v2121_v34 = vpop.f32.mrb[121].mxu1 }
 0x398   :  { %v3664_v52 = vadd.f32 %v2914_v7, %v2114_v37  ;;  %v3353_v57 = vpop.f32.mrb[119].mxu0 }
 0x39a   :  { %3012 = vst [vmem:[%s6956_s2 + $0x1d8] sm:$0xff] %v3664_v52  ;;  %v2124_v22 = vpop.f32.mrb[122].mxu1 }
 0x39b   :  { %v2919_v23 = vpop.f32.mrb[120].mxu0  ;;  %v2126_v60 = vpop.f32.mrb[123].mxu1 }
 0x39c   :  { %v3665_v26 = vadd.f32 %v2919_v23, %v2119_v21  ;;  %v3356_v5 = vpop.f32.mrb[121].mxu0 }
 0x39e   :  { %3013 = vst [vmem:[%s6956_s2 + $0x1e0] sm:$0xff] %v3665_v26  ;;  %v2129_v8 = vpop.f32.mrb[124].mxu1 }
 0x39f   :  { %v2924_v47 = vpop.f32.mrb[122].mxu0  ;;  %v2131_v14 = vpop.f32.mrb[125].mxu1 }
 0x3a0   :  { %v3666_v36 = vadd.f32 %v2924_v47, %v2124_v22  ;;  %v3359_v54 = vpop.f32.mrb[123].mxu0 }
 0x3a2   :  { %3014 = vst [vmem:[%s6956_s2 + $0x1e8] sm:$0xff] %v3666_v36  ;;  %v2134_v31 = vpop.f32.mrb[126].mxu1 }
 0x3a3   :  { %v2929_v13 = vpop.f32.mrb[124].mxu0  ;;  %v2136_v24 = vpop.f32.mrb[127].mxu1 }
 0x3a4   :  { %v3667_v33 = vadd.f32 %v2929_v13, %v2129_v8  ;;  %v3362_v20 = vpop.f32.mrb[125].mxu0 }
 0x3a6   :  { %3015 = vst [vmem:[%s6956_s2 + $0x1f0] sm:$0xff] %v3667_v33  ;;  %v2139_v4 = vpop.f32.mrb[128].mxu1 }
 0x3a7   :  { %v2934_v39 = vpop.f32.mrb[126].mxu0  ;;  %v2141_v19 = vpop.f32.mrb[129].mxu1 }
 0x3a8   :  { %v3668_v44 = vadd.f32 %v2934_v39, %v2134_v31  ;;  %v3365_v51 = vpop.f32.mrb[127].mxu0 }
 0x3aa   :  { %3016 = vst [vmem:[%s6956_s2 + $0x1f8] sm:$0xff] %v3668_v44  ;;  %v2144_v27 = vpop.f32.mrb[130].mxu1 }
 0x3ab   :  { %v2939_v17 = vpop.f32.mrb[128].mxu0  ;;  %v2146_v42 = vpop.f32.mrb[131].mxu1 }
 0x3ac   :  { %v3669_v0 = vadd.f32 %v2939_v17, %v2139_v4  ;;  %v3368_v25 = vpop.f32.mrb[129].mxu0 }
 0x3ae   :  { %3017 = vst [vmem:[%s6956_s2 + $0x200] sm:$0xff] %v3669_v0  ;;  %v2149_v46 = vpop.f32.mrb[132].mxu1 }
 0x3af   :  { %v2944_v62 = vpop.f32.mrb[130].mxu0  ;;  %v2151_v32 = vpop.f32.mrb[133].mxu1 }
 0x3b0   :  { %v3670_v41 = vadd.f32 %v2944_v62, %v2144_v27  ;;  %v3371_v55 = vpop.f32.mrb[131].mxu0 }
 0x3b2   :  { %3018 = vst [vmem:[%s6956_s2 + $0x208] sm:$0xff] %v3670_v41 }
 0x3b3   :  { %v2949_v38 = vpop.f32.mrb[132].mxu0 }
 0x3b4   :  { %v3671_v48 = vadd.f32 %v2949_v38, %v2149_v46  ;;  %v3374_v53 = vpop.f32.mrb[133].mxu0 }
 0x3b6   :  { %3019 = vst [vmem:[%s6956_s2 + $0x210] sm:$0x1] %v3671_v48 }

</bundles_post_ra>
